<compile_context>
chip_gen: v5e
topology: v5e:2x2
jax: 0.10.0
libtpu: 0.0.40
codegen_flags: <defaults>
</compile_context>

<pallas_src>
import numpy as np
import jax
import jax.numpy as jnp
from jax.experimental import pallas as pl
from jax.experimental.pallas import tpu as pltpu

CHANNELS = 32              # embed dim (divisible by NUM_HEADS)
SIZE = 8                   # spatial size -> seq len S = SIZE*SIZE = 64
SEQ = SIZE * SIZE
NUM_HEADS = 4
HEAD_DIM = CHANNELS // NUM_HEADS
LN_EPS = 1e-5

# Row indices of the packed (8, C) vector operand.
_LN1_W, _LN1_B, _BO, _LN2_W, _LN2_B, _B1, _B2 = range(7)


def _erf(x):
    # Abramowitz & Stegun 7.1.26 rational approximation (|err| < 1.5e-7);
    # matches torch's exact (erf-based) GELU to well within test tolerance.
    p = 0.3275911
    a1, a2, a3, a4, a5 = (0.254829592, -0.284496736, 1.421413741,
                          -1.453152027, 1.061405429)
    ax = jnp.abs(x)
    t = 1.0 / (1.0 + p * ax)
    poly = ((((a5 * t + a4) * t + a3) * t + a2) * t + a1) * t
    y = 1.0 - poly * jnp.exp(-ax * ax)
    return jnp.where(x >= 0, y, -y)


def _gelu_exact(x):
    return 0.5 * x * (1.0 + _erf(x * (1.0 / np.sqrt(2.0))))


def _layer_norm(v, w, b):
    mu = jnp.mean(v, axis=-1, keepdims=True)
    var = jnp.mean((v - mu) ** 2, axis=-1, keepdims=True)
    return (v - mu) * jax.lax.rsqrt(var + LN_EPS) * w + b


def self_attention_kernel(x_ref, wqkv_ref, bqkv_ref, wstack_ref, vecs_ref,
                          consts_ref, o_ref):
    # x_ref block: (B, C, S) channels-first -- B batch examples per grid step.
    B, C, S = x_ref.shape
    H = NUM_HEADS
    f32 = jnp.float32

    vecs = vecs_ref[...]                       # (8, C) packed vectors
    eye = consts_ref[0:C, :]                   # (C, C) identity (hoisted constant)
    hmask = consts_ref[C:C + H * S, :]         # (H*S, C) block-diagonal head mask

    # (B, C, S) -> (M, C) channels-last via identity matmuls on the MXU
    # (avoids wrapper-side HBM transposes and XLU transpose lowering).
    dn_t = (((0,), (0,)), ((), ()))            # contract dim 0 of both: lhs^T @ rhs
    xs = [jax.lax.dot_general(x_ref[b], eye, dn_t, preferred_element_type=f32)
          for b in range(B)]                   # each (S, C)
    x = xs[0] if B == 1 else jnp.concatenate(xs, axis=0)            # (M, C)

    x_ln = _layer_norm(x, vecs[_LN1_W:_LN1_W + 1], vecs[_LN1_B:_LN1_B + 1])

    # Fused QKV projection (softmax scale pre-folded into the Q columns).
    qkv = (jnp.dot(x_ln, wqkv_ref[...], preferred_element_type=f32)
           + bqkv_ref[...])                                          # (M, 3C)

    # Block-diagonal wide attention: per batch element, 2 wide MXU ops replace
    # the 8 tiny per-head K=8 matmuls of the naive formulation.
    dn_bt = (((1,), (1,)), ((), ()))           # contract last dims: A @ B^T
    attn_rows = []
    for b in range(B):                         # B <= 2, static unroll
        r0 = b * S
        qb = qkv[r0:r0 + S, 0:C]               # (S, C)  (already scaled)
        kb = qkv[r0:r0 + S, C:2 * C]           # (S, C)
        vb = qkv[r0:r0 + S, 2 * C:3 * C]       # (S, C)

        # rows = (head, query); zero channels outside each head's slice
        q_wide = jnp.concatenate([qb] * H, axis=0) * hmask           # (H*S, C)
        scores = jax.lax.dot_general(q_wide, kb, dn_bt,
                                     preferred_element_type=f32)      # (H*S, S)
        scores = scores - jnp.max(scores, axis=-1, keepdims=True)
        p = jnp.exp(scores)
        p = p * pl.reciprocal(jnp.sum(p, axis=-1, keepdims=True), approx=True)
        pv = jnp.dot(p, vb, preferred_element_type=f32)               # (H*S, C)

        # Pick head h's channel slice from row-block h and sum -> (S, C)
        # (this is exactly the per-head concat of the reference MHA).
        acc = pv[0:S, :] * hmask[0:1, :]
        for h in range(1, H):
            acc = acc + pv[h * S:(h + 1) * S, :] * hmask[h * S:h * S + 1, :]
        attn_rows.append(acc)
    attn = attn_rows[0] if B == 1 else jnp.concatenate(attn_rows, axis=0)

    # Single (M,C)@(C,C) output projection + bias + residual 1.
    av = (jnp.dot(attn, wstack_ref[0], preferred_element_type=f32)
          + vecs[_BO:_BO + 1] + x)

    hdn = _layer_norm(av, vecs[_LN2_W:_LN2_W + 1], vecs[_LN2_B:_LN2_B + 1])
    hdn = jnp.dot(hdn, wstack_ref[1], preferred_element_type=f32) + vecs[_B1:_B1 + 1]
    hdn = _gelu_exact(hdn)
    hdn = jnp.dot(hdn, wstack_ref[2], preferred_element_type=f32) + vecs[_B2:_B2 + 1]
    out = hdn + av                                                    # (M, C)

    # (M, C) -> (B, C, S) and store channels-first (no wrapper transpose needed).
    # TODO(synk): on v5e/v6e an XLU-based tail transpose may avoid MRF
    # serialization behind the last MLP matmul; keep the MXU form (verified).
    dn_n = (((1,), (1,)), ((), ()))            # lhs @ rhs^T
    for b in range(B):
        o_ref[b] = jax.lax.dot_general(eye, out[b * S:(b + 1) * S, :], dn_n,
                                       preferred_element_type=f32
                                       ).astype(o_ref.dtype)


def pack_params(p):
    """Fuse the per-tensor module parameters into 6 kernel operands."""
    C = p['ln1_w'].shape[1]
    S = SEQ
    scale = 1.0 / np.sqrt(HEAD_DIM)
    # Fold the softmax 1/sqrt(head_dim) scale into the Q projection (host-side).
    wqkv = jnp.concatenate([p['wq_t'] * scale, p['wk_t'], p['wv_t']], axis=1)  # (C, 3C)
    bqkv = jnp.concatenate([p['bq'] * scale, p['bk'], p['bv']], axis=1)        # (1, 3C)
    w_stack = jnp.stack([p['wo_t'], p['w1_t'], p['w2_t']], axis=0)             # (3, C, C)
    vecs = jnp.concatenate([p['ln1_w'], p['ln1_b'], p['bo'], p['ln2_w'],
                            p['ln2_b'], p['b1'], p['b2'],
                            jnp.zeros((1, C), jnp.float32)], axis=0)           # (8, C)
    # Hoisted constants: identity for in/out transposes + block-diag head mask.
    eye = jnp.eye(C, dtype=jnp.float32)                                        # (C, C)
    row_h = jnp.arange(NUM_HEADS * S) // S
    col_h = jnp.arange(C) // HEAD_DIM
    hmask = (row_h[:, None] == col_h[None, :]).astype(jnp.float32)             # (H*S, C)
    consts = jnp.concatenate([eye, hmask], axis=0)                             # (C+H*S, C)
    return wqkv, bqkv, w_stack, vecs, consts


def _grid_steps(N):
    """G=1 on single-TensorCore chips (v5e/v6e): the 2nd grid step is pure
    overhead and halves MXU row occupancy.  G=2 only where a second
    TensorCore can take the other half of the batch (v7x)."""
    two_tc = False
    try:
        kind = jax.devices()[0].device_kind.lower()
        two_tc = "v7" in kind
    except Exception:
        pass
    if two_tc and N >= 2 and N % 2 == 0:
        return 2
    return 1


def self_attention_forward(x_nchw, params):
    N, C, H, W = x_nchw.shape
    S = H * W
    x3 = x_nchw.reshape(N, C, S)              # free contiguous reshape, no transpose

    G = _grid_steps(N)
    B = N // G

    wqkv, bqkv, w_stack, vecs, consts = pack_params(params)

    out = pl.pallas_call(
        self_attention_kernel,
        out_shape=jax.ShapeDtypeStruct((N, C, S), jnp.float32),
        grid_spec=pltpu.PrefetchScalarGridSpec(
            num_scalar_prefetch=0,
            grid=(G,),
            in_specs=[
                pl.BlockSpec((B, C, S), lambda i: (i, 0, 0)),
                pl.BlockSpec(wqkv.shape, lambda i: (0, 0)),
                pl.BlockSpec(bqkv.shape, lambda i: (0, 0)),
                pl.BlockSpec(w_stack.shape, lambda i: (0, 0, 0)),
                pl.BlockSpec(vecs.shape, lambda i: (0, 0)),
                pl.BlockSpec(consts.shape, lambda i: (0, 0)),
            ],
            out_specs=pl.BlockSpec((B, C, S), lambda i: (i, 0, 0)),
        ),
        compiler_params=pltpu.CompilerParams(
            dimension_semantics=("parallel",)),
    )(x3, wqkv, bqkv, w_stack, vecs, consts)

    return out.reshape(N, C, H, W)


def init_params(key, C):
    ks = jax.random.split(key, 16)
    f32 = jnp.float32

    def mat(k):  # (in, out) i.e. already transposed for x @ W convention
        return 0.1 * jax.random.normal(k, (C, C), f32)

    def vec(k, scale=0.05, shift=0.0):
        return shift + scale * jax.random.normal(k, (1, C), f32)

    return dict(
        ln1_w=vec(ks[0], 0.1, 1.0), ln1_b=vec(ks[1]),
        wq_t=mat(ks[2]), wk_t=mat(ks[3]), wv_t=mat(ks[4]),
        bq=vec(ks[5]), bk=vec(ks[6]), bv=vec(ks[7]),
        wo_t=mat(ks[8]), bo=vec(ks[9]),
        ln2_w=vec(ks[10], 0.1, 1.0), ln2_b=vec(ks[11]),
        w1_t=mat(ks[12]), b1=vec(ks[13]),
        w2_t=mat(ks[14]), b2=vec(ks[15]),
    )


def reference_forward(x_nchw, p):
    # Pure-JAX reference mirroring the PyTorch forward pass exactly.
    N, C, H, W = x_nchw.shape
    S = H * W
    x = x_nchw.reshape(N, C, S).transpose(0, 2, 1)

    def ln(v, w, b):
        mu = v.mean(-1, keepdims=True)
        var = ((v - mu) ** 2).mean(-1, keepdims=True)
        return (v - mu) / jnp.sqrt(var + LN_EPS) * w + b

    x_ln = ln(x, p['ln1_w'], p['ln1_b'])
    q = x_ln @ p['wq_t'] + p['bq']
    k = x_ln @ p['wk_t'] + p['bk']
    v = x_ln @ p['wv_t'] + p['bv']

    def split(t):
        return t.reshape(N, S, NUM_HEADS, HEAD_DIM).transpose(0, 2, 1, 3)

    qh, kh, vh = split(q), split(k), split(v)
    s = jnp.einsum('nhqd,nhkd->nhqk', qh, kh) / np.sqrt(HEAD_DIM)
    a = jax.nn.softmax(s, axis=-1)
    o = jnp.einsum('nhqk,nhkd->nhqd', a, vh).transpose(0, 2, 1, 3).reshape(N, S, C)
    av = o @ p['wo_t'] + p['bo'] + x
    h = ln(av, p['ln2_w'], p['ln2_b'])
    h = h @ p['w1_t'] + p['b1']
    h = jax.nn.gelu(h, approximate=False)
    h = h @ p['w2_t'] + p['b2']
    out = h + av
    return out.transpose(0, 2, 1).reshape(N, C, H, W)


if __name__ == "__main__":
    key = jax.random.PRNGKey(0)
    kx, kp = jax.random.split(key)
    x = jax.random.normal(kx, (2, CHANNELS, SIZE, SIZE), jnp.float32)
    params = init_params(kp, CHANNELS)

    out = self_attention_forward(x, params)
    jax.block_until_ready(out)

    ref = reference_forward(x, params)
    np.testing.assert_allclose(np.asarray(out), np.asarray(ref),
                               rtol=2e-3, atol=2e-3)
    assert out.shape == x.shape
    print("KERNEL_OK")
</pallas_src>

<mosaic_0001>
module attributes {stable_mosaic.version = 11 : i64} {
  func.func @self_attention_kernel(%arg0: i32, %arg1: memref<2x32x64xf32, #tpu.memory_space<vmem>>, %arg2: memref<32x96xf32, #tpu.memory_space<vmem>>, %arg3: memref<1x96xf32, #tpu.memory_space<vmem>>, %arg4: memref<3x32x32xf32, #tpu.memory_space<vmem>>, %arg5: memref<8x32xf32, #tpu.memory_space<vmem>>, %arg6: memref<288x32xf32, #tpu.memory_space<vmem>>, %arg7: memref<2x32x64xf32, #tpu.memory_space<vmem>>) attributes {dimension_semantics = [#tpu.dimension_semantics<parallel>], iteration_bounds = array<i64: 1>, scalar_prefetch = 0 : i64, scratch_operands = 0 : i64, tpu.core_type = #tpu.core_type<tc>, window_params = [{transform_indices = @transform_0, window_bounds = array<i64: 2, 32, 64>}, {pipeline_mode = #tpu.pipeline_mode<synchronous>, transform_indices = @transform_1, window_bounds = array<i64: 32, 96>}, {pipeline_mode = #tpu.pipeline_mode<synchronous>, transform_indices = @transform_2, window_bounds = array<i64: 1, 96>}, {pipeline_mode = #tpu.pipeline_mode<synchronous>, transform_indices = @transform_3, window_bounds = array<i64: 3, 32, 32>}, {pipeline_mode = #tpu.pipeline_mode<synchronous>, transform_indices = @transform_4, window_bounds = array<i64: 8, 32>}, {pipeline_mode = #tpu.pipeline_mode<synchronous>, transform_indices = @transform_5, window_bounds = array<i64: 288, 32>}, {transform_indices = @transform_6, window_bounds = array<i64: 2, 32, 64>}]} {
    %c0 = arith.constant 0 : index
    %c0_0 = arith.constant 0 : index
    %0 = vector.load %arg5[%c0, %c0_0] : memref<8x32xf32, #tpu.memory_space<vmem>>, vector<8x32xf32>
    %c0_1 = arith.constant 0 : index
    %c0_2 = arith.constant 0 : index
    %1 = vector.load %arg6[%c0_1, %c0_2] : memref<288x32xf32, #tpu.memory_space<vmem>>, vector<32x32xf32>
    %c32 = arith.constant 32 : index
    %c0_3 = arith.constant 0 : index
    %2 = vector.load %arg6[%c32, %c0_3] : memref<288x32xf32, #tpu.memory_space<vmem>>, vector<256x32xf32>
    %c0_4 = arith.constant 0 : index
    %c0_5 = arith.constant 0 : index
    %c0_6 = arith.constant 0 : index
    %3 = vector.load %arg1[%c0_4, %c0_5, %c0_6] : memref<2x32x64xf32, #tpu.memory_space<vmem>>, vector<1x32x64xf32>
    %4 = vector.shape_cast %3 : vector<1x32x64xf32> to vector<32x64xf32>
    %cst = arith.constant dense<0.000000e+00> : vector<64x32xf32>
    %5 = tpu.matmul %4, %1, %cst {dimension_numbers = #tpu.dot_dimension_numbers<[0], [0], [1], [1], [0, 1, 1, 1], [], []>} : vector<32x64xf32>, vector<32x32xf32>, vector<64x32xf32> -> vector<64x32xf32>
    %c1 = arith.constant 1 : index
    %c0_7 = arith.constant 0 : index
    %c0_8 = arith.constant 0 : index
    %6 = vector.load %arg1[%c1, %c0_7, %c0_8] : memref<2x32x64xf32, #tpu.memory_space<vmem>>, vector<1x32x64xf32>
    %7 = vector.shape_cast %6 : vector<1x32x64xf32> to vector<32x64xf32>
    %cst_9 = arith.constant dense<0.000000e+00> : vector<64x32xf32>
    %8 = tpu.matmul %7, %1, %cst_9 {dimension_numbers = #tpu.dot_dimension_numbers<[0], [0], [1], [1], [0, 1, 1, 1], [], []>} : vector<32x64xf32>, vector<32x32xf32>, vector<64x32xf32> -> vector<64x32xf32>
    %9 = tpu.concatenate %5, %8 in 0 : vector<64x32xf32>, vector<64x32xf32> -> vector<128x32xf32>
    %10 = vector.extract_strided_slice %0 {offsets = [0, 0], sizes = [1, 32], strides = [1, 1]} : vector<8x32xf32> to vector<1x32xf32>
    %11 = vector.extract_strided_slice %0 {offsets = [1, 0], sizes = [1, 32], strides = [1, 1]} : vector<8x32xf32> to vector<1x32xf32>
    %cst_10 = arith.constant dense<0.000000e+00> : vector<128xf32>
    %12 = vector.multi_reduction <add>, %9, %cst_10 [1] : vector<128x32xf32> to vector<128xf32>
    %13 = vector.shape_cast %12 : vector<128xf32> to vector<128x1xf32>
    %cst_11 = arith.constant 3.200000e+01 : f32
    %14 = vector.broadcast %cst_11 : f32 to vector<128x1xf32>
    %15 = arith.divf %13, %14 : vector<128x1xf32>
    %16 = vector.broadcast %15 : vector<128x1xf32> to vector<128x32xf32>
    %17 = arith.subf %9, %16 : vector<128x32xf32>
    %18 = arith.mulf %17, %17 : vector<128x32xf32>
    %cst_12 = arith.constant dense<0.000000e+00> : vector<128xf32>
    %19 = vector.multi_reduction <add>, %18, %cst_12 [1] : vector<128x32xf32> to vector<128xf32>
    %20 = vector.shape_cast %19 : vector<128xf32> to vector<128x1xf32>
    %cst_13 = arith.constant 3.200000e+01 : f32
    %21 = vector.broadcast %cst_13 : f32 to vector<128x1xf32>
    %22 = arith.divf %20, %21 : vector<128x1xf32>
    %23 = vector.broadcast %15 : vector<128x1xf32> to vector<128x32xf32>
    %24 = arith.subf %9, %23 : vector<128x32xf32>
    %cst_14 = arith.constant 9.99999974E-6 : f32
    %25 = vector.broadcast %cst_14 : f32 to vector<128x1xf32>
    %26 = arith.addf %22, %25 : vector<128x1xf32>
    %27 = math.rsqrt %26 : vector<128x1xf32>
    %28 = vector.broadcast %27 : vector<128x1xf32> to vector<128x32xf32>
    %29 = arith.mulf %24, %28 : vector<128x32xf32>
    %30 = vector.broadcast %10 : vector<1x32xf32> to vector<128x32xf32>
    %31 = arith.mulf %29, %30 : vector<128x32xf32>
    %32 = vector.broadcast %11 : vector<1x32xf32> to vector<128x32xf32>
    %33 = arith.addf %31, %32 : vector<128x32xf32>
    %c0_15 = arith.constant 0 : index
    %c0_16 = arith.constant 0 : index
    %34 = vector.load %arg2[%c0_15, %c0_16] : memref<32x96xf32, #tpu.memory_space<vmem>>, vector<32x96xf32>
    %cst_17 = arith.constant dense<0.000000e+00> : vector<128x96xf32>
    %35 = tpu.matmul %33, %34, %cst_17 {dimension_numbers = #tpu.dot_dimension_numbers<[1], [0], [0], [1], [0, 0, 1, 1], [], []>} : vector<128x32xf32>, vector<32x96xf32>, vector<128x96xf32> -> vector<128x96xf32>
    %c0_18 = arith.constant 0 : index
    %c0_19 = arith.constant 0 : index
    %36 = vector.load %arg3[%c0_18, %c0_19] : memref<1x96xf32, #tpu.memory_space<vmem>>, vector<1x96xf32>
    %37 = vector.broadcast %36 : vector<1x96xf32> to vector<128x96xf32>
    %38 = arith.addf %35, %37 : vector<128x96xf32>
    %39 = vector.extract_strided_slice %38 {offsets = [0, 0], sizes = [64, 32], strides = [1, 1]} : vector<128x96xf32> to vector<64x32xf32>
    %40 = vector.extract_strided_slice %38 {offsets = [0, 32], sizes = [64, 32], strides = [1, 1]} : vector<128x96xf32> to vector<64x32xf32>
    %41 = vector.extract_strided_slice %38 {offsets = [0, 64], sizes = [64, 32], strides = [1, 1]} : vector<128x96xf32> to vector<64x32xf32>
    %42 = tpu.concatenate %39, %39, %39, %39 in 0 : vector<64x32xf32>, vector<64x32xf32>, vector<64x32xf32>, vector<64x32xf32> -> vector<256x32xf32>
    %43 = arith.mulf %42, %2 : vector<256x32xf32>
    %cst_20 = arith.constant dense<0.000000e+00> : vector<256x64xf32>
    %44 = tpu.matmul %43, %40, %cst_20 {dimension_numbers = #tpu.dot_dimension_numbers<[1], [1], [0], [0], [0, 0, 1, 0], [], []>} : vector<256x32xf32>, vector<64x32xf32>, vector<256x64xf32> -> vector<256x64xf32>
    %cst_21 = arith.constant dense<0xFF800000> : vector<256xf32>
    %45 = vector.multi_reduction <maximumf>, %44, %cst_21 [1] : vector<256x64xf32> to vector<256xf32>
    %46 = vector.shape_cast %45 : vector<256xf32> to vector<256x1xf32>
    %47 = vector.broadcast %46 : vector<256x1xf32> to vector<256x64xf32>
    %48 = arith.subf %44, %47 : vector<256x64xf32>
    %49 = math.exp %48 : vector<256x64xf32>
    %cst_22 = arith.constant dense<0.000000e+00> : vector<256xf32>
    %50 = vector.multi_reduction <add>, %49, %cst_22 [1] : vector<256x64xf32> to vector<256xf32>
    %51 = vector.shape_cast %50 : vector<256xf32> to vector<256x1xf32>
    %52 = tpu.reciprocal %51 {approx = true} : vector<256x1xf32> -> vector<256x1xf32>
    %53 = vector.broadcast %52 : vector<256x1xf32> to vector<256x64xf32>
    %54 = arith.mulf %49, %53 : vector<256x64xf32>
    %cst_23 = arith.constant dense<0.000000e+00> : vector<256x32xf32>
    %55 = tpu.matmul %54, %41, %cst_23 {dimension_numbers = #tpu.dot_dimension_numbers<[1], [0], [0], [1], [0, 0, 1, 1], [], []>} : vector<256x64xf32>, vector<64x32xf32>, vector<256x32xf32> -> vector<256x32xf32>
    %56 = vector.extract_strided_slice %55 {offsets = [0, 0], sizes = [64, 32], strides = [1, 1]} : vector<256x32xf32> to vector<64x32xf32>
    %57 = vector.extract_strided_slice %2 {offsets = [0, 0], sizes = [1, 32], strides = [1, 1]} : vector<256x32xf32> to vector<1x32xf32>
    %58 = vector.broadcast %57 : vector<1x32xf32> to vector<64x32xf32>
    %59 = arith.mulf %56, %58 : vector<64x32xf32>
    %60 = vector.extract_strided_slice %55 {offsets = [64, 0], sizes = [64, 32], strides = [1, 1]} : vector<256x32xf32> to vector<64x32xf32>
    %61 = vector.extract_strided_slice %2 {offsets = [64, 0], sizes = [1, 32], strides = [1, 1]} : vector<256x32xf32> to vector<1x32xf32>
    %62 = vector.broadcast %61 : vector<1x32xf32> to vector<64x32xf32>
    %63 = arith.mulf %60, %62 : vector<64x32xf32>
    %64 = arith.addf %59, %63 : vector<64x32xf32>
    %65 = vector.extract_strided_slice %55 {offsets = [128, 0], sizes = [64, 32], strides = [1, 1]} : vector<256x32xf32> to vector<64x32xf32>
    %66 = vector.extract_strided_slice %2 {offsets = [128, 0], sizes = [1, 32], strides = [1, 1]} : vector<256x32xf32> to vector<1x32xf32>
    %67 = vector.broadcast %66 : vector<1x32xf32> to vector<64x32xf32>
    %68 = arith.mulf %65, %67 : vector<64x32xf32>
    %69 = arith.addf %64, %68 : vector<64x32xf32>
    %70 = vector.extract_strided_slice %55 {offsets = [192, 0], sizes = [64, 32], strides = [1, 1]} : vector<256x32xf32> to vector<64x32xf32>
    %71 = vector.extract_strided_slice %2 {offsets = [192, 0], sizes = [1, 32], strides = [1, 1]} : vector<256x32xf32> to vector<1x32xf32>
    %72 = vector.broadcast %71 : vector<1x32xf32> to vector<64x32xf32>
    %73 = arith.mulf %70, %72 : vector<64x32xf32>
    %74 = arith.addf %69, %73 : vector<64x32xf32>
    %75 = vector.extract_strided_slice %38 {offsets = [64, 0], sizes = [64, 32], strides = [1, 1]} : vector<128x96xf32> to vector<64x32xf32>
    %76 = vector.extract_strided_slice %38 {offsets = [64, 32], sizes = [64, 32], strides = [1, 1]} : vector<128x96xf32> to vector<64x32xf32>
    %77 = vector.extract_strided_slice %38 {offsets = [64, 64], sizes = [64, 32], strides = [1, 1]} : vector<128x96xf32> to vector<64x32xf32>
    %78 = tpu.concatenate %75, %75, %75, %75 in 0 : vector<64x32xf32>, vector<64x32xf32>, vector<64x32xf32>, vector<64x32xf32> -> vector<256x32xf32>
    %79 = arith.mulf %78, %2 : vector<256x32xf32>
    %cst_24 = arith.constant dense<0.000000e+00> : vector<256x64xf32>
    %80 = tpu.matmul %79, %76, %cst_24 {dimension_numbers = #tpu.dot_dimension_numbers<[1], [1], [0], [0], [0, 0, 1, 0], [], []>} : vector<256x32xf32>, vector<64x32xf32>, vector<256x64xf32> -> vector<256x64xf32>
    %cst_25 = arith.constant dense<0xFF800000> : vector<256xf32>
    %81 = vector.multi_reduction <maximumf>, %80, %cst_25 [1] : vector<256x64xf32> to vector<256xf32>
    %82 = vector.shape_cast %81 : vector<256xf32> to vector<256x1xf32>
    %83 = vector.broadcast %82 : vector<256x1xf32> to vector<256x64xf32>
    %84 = arith.subf %80, %83 : vector<256x64xf32>
    %85 = math.exp %84 : vector<256x64xf32>
    %cst_26 = arith.constant dense<0.000000e+00> : vector<256xf32>
    %86 = vector.multi_reduction <add>, %85, %cst_26 [1] : vector<256x64xf32> to vector<256xf32>
    %87 = vector.shape_cast %86 : vector<256xf32> to vector<256x1xf32>
    %88 = tpu.reciprocal %87 {approx = true} : vector<256x1xf32> -> vector<256x1xf32>
    %89 = vector.broadcast %88 : vector<256x1xf32> to vector<256x64xf32>
    %90 = arith.mulf %85, %89 : vector<256x64xf32>
    %cst_27 = arith.constant dense<0.000000e+00> : vector<256x32xf32>
    %91 = tpu.matmul %90, %77, %cst_27 {dimension_numbers = #tpu.dot_dimension_numbers<[1], [0], [0], [1], [0, 0, 1, 1], [], []>} : vector<256x64xf32>, vector<64x32xf32>, vector<256x32xf32> -> vector<256x32xf32>
    %92 = vector.extract_strided_slice %91 {offsets = [0, 0], sizes = [64, 32], strides = [1, 1]} : vector<256x32xf32> to vector<64x32xf32>
    %93 = vector.extract_strided_slice %2 {offsets = [0, 0], sizes = [1, 32], strides = [1, 1]} : vector<256x32xf32> to vector<1x32xf32>
    %94 = vector.broadcast %93 : vector<1x32xf32> to vector<64x32xf32>
    %95 = arith.mulf %92, %94 : vector<64x32xf32>
    %96 = vector.extract_strided_slice %91 {offsets = [64, 0], sizes = [64, 32], strides = [1, 1]} : vector<256x32xf32> to vector<64x32xf32>
    %97 = vector.extract_strided_slice %2 {offsets = [64, 0], sizes = [1, 32], strides = [1, 1]} : vector<256x32xf32> to vector<1x32xf32>
    %98 = vector.broadcast %97 : vector<1x32xf32> to vector<64x32xf32>
    %99 = arith.mulf %96, %98 : vector<64x32xf32>
    %100 = arith.addf %95, %99 : vector<64x32xf32>
    %101 = vector.extract_strided_slice %91 {offsets = [128, 0], sizes = [64, 32], strides = [1, 1]} : vector<256x32xf32> to vector<64x32xf32>
    %102 = vector.extract_strided_slice %2 {offsets = [128, 0], sizes = [1, 32], strides = [1, 1]} : vector<256x32xf32> to vector<1x32xf32>
    %103 = vector.broadcast %102 : vector<1x32xf32> to vector<64x32xf32>
    %104 = arith.mulf %101, %103 : vector<64x32xf32>
    %105 = arith.addf %100, %104 : vector<64x32xf32>
    %106 = vector.extract_strided_slice %91 {offsets = [192, 0], sizes = [64, 32], strides = [1, 1]} : vector<256x32xf32> to vector<64x32xf32>
    %107 = vector.extract_strided_slice %2 {offsets = [192, 0], sizes = [1, 32], strides = [1, 1]} : vector<256x32xf32> to vector<1x32xf32>
    %108 = vector.broadcast %107 : vector<1x32xf32> to vector<64x32xf32>
    %109 = arith.mulf %106, %108 : vector<64x32xf32>
    %110 = arith.addf %105, %109 : vector<64x32xf32>
    %111 = tpu.concatenate %74, %110 in 0 : vector<64x32xf32>, vector<64x32xf32> -> vector<128x32xf32>
    %c0_28 = arith.constant 0 : index
    %c0_29 = arith.constant 0 : index
    %c0_30 = arith.constant 0 : index
    %112 = vector.load %arg4[%c0_28, %c0_29, %c0_30] : memref<3x32x32xf32, #tpu.memory_space<vmem>>, vector<1x32x32xf32>
    %113 = vector.shape_cast %112 : vector<1x32x32xf32> to vector<32x32xf32>
    %cst_31 = arith.constant dense<0.000000e+00> : vector<128x32xf32>
    %114 = tpu.matmul %111, %113, %cst_31 {dimension_numbers = #tpu.dot_dimension_numbers<[1], [0], [0], [1], [0, 0, 1, 1], [], []>} : vector<128x32xf32>, vector<32x32xf32>, vector<128x32xf32> -> vector<128x32xf32>
    %115 = vector.extract_strided_slice %0 {offsets = [2, 0], sizes = [1, 32], strides = [1, 1]} : vector<8x32xf32> to vector<1x32xf32>
    %116 = vector.broadcast %115 : vector<1x32xf32> to vector<128x32xf32>
    %117 = arith.addf %114, %116 : vector<128x32xf32>
    %118 = arith.addf %117, %9 : vector<128x32xf32>
    %119 = vector.extract_strided_slice %0 {offsets = [3, 0], sizes = [1, 32], strides = [1, 1]} : vector<8x32xf32> to vector<1x32xf32>
    %120 = vector.extract_strided_slice %0 {offsets = [4, 0], sizes = [1, 32], strides = [1, 1]} : vector<8x32xf32> to vector<1x32xf32>
    %cst_32 = arith.constant dense<0.000000e+00> : vector<128xf32>
    %121 = vector.multi_reduction <add>, %118, %cst_32 [1] : vector<128x32xf32> to vector<128xf32>
    %122 = vector.shape_cast %121 : vector<128xf32> to vector<128x1xf32>
    %cst_33 = arith.constant 3.200000e+01 : f32
    %123 = vector.broadcast %cst_33 : f32 to vector<128x1xf32>
    %124 = arith.divf %122, %123 : vector<128x1xf32>
    %125 = vector.broadcast %124 : vector<128x1xf32> to vector<128x32xf32>
    %126 = arith.subf %118, %125 : vector<128x32xf32>
    %127 = arith.mulf %126, %126 : vector<128x32xf32>
    %cst_34 = arith.constant dense<0.000000e+00> : vector<128xf32>
    %128 = vector.multi_reduction <add>, %127, %cst_34 [1] : vector<128x32xf32> to vector<128xf32>
    %129 = vector.shape_cast %128 : vector<128xf32> to vector<128x1xf32>
    %cst_35 = arith.constant 3.200000e+01 : f32
    %130 = vector.broadcast %cst_35 : f32 to vector<128x1xf32>
    %131 = arith.divf %129, %130 : vector<128x1xf32>
    %132 = vector.broadcast %124 : vector<128x1xf32> to vector<128x32xf32>
    %133 = arith.subf %118, %132 : vector<128x32xf32>
    %cst_36 = arith.constant 9.99999974E-6 : f32
    %134 = vector.broadcast %cst_36 : f32 to vector<128x1xf32>
    %135 = arith.addf %131, %134 : vector<128x1xf32>
    %136 = math.rsqrt %135 : vector<128x1xf32>
    %137 = vector.broadcast %136 : vector<128x1xf32> to vector<128x32xf32>
    %138 = arith.mulf %133, %137 : vector<128x32xf32>
    %139 = vector.broadcast %119 : vector<1x32xf32> to vector<128x32xf32>
    %140 = arith.mulf %138, %139 : vector<128x32xf32>
    %141 = vector.broadcast %120 : vector<1x32xf32> to vector<128x32xf32>
    %142 = arith.addf %140, %141 : vector<128x32xf32>
    %c1_37 = arith.constant 1 : index
    %c0_38 = arith.constant 0 : index
    %c0_39 = arith.constant 0 : index
    %143 = vector.load %arg4[%c1_37, %c0_38, %c0_39] : memref<3x32x32xf32, #tpu.memory_space<vmem>>, vector<1x32x32xf32>
    %144 = vector.shape_cast %143 : vector<1x32x32xf32> to vector<32x32xf32>
    %cst_40 = arith.constant dense<0.000000e+00> : vector<128x32xf32>
    %145 = tpu.matmul %142, %144, %cst_40 {dimension_numbers = #tpu.dot_dimension_numbers<[1], [0], [0], [1], [0, 0, 1, 1], [], []>} : vector<128x32xf32>, vector<32x32xf32>, vector<128x32xf32> -> vector<128x32xf32>
    %146 = vector.extract_strided_slice %0 {offsets = [5, 0], sizes = [1, 32], strides = [1, 1]} : vector<8x32xf32> to vector<1x32xf32>
    %147 = vector.broadcast %146 : vector<1x32xf32> to vector<128x32xf32>
    %148 = arith.addf %145, %147 : vector<128x32xf32>
    %cst_41 = arith.constant 5.000000e-01 : f32
    %149 = vector.broadcast %cst_41 : f32 to vector<128x32xf32>
    %150 = arith.mulf %149, %148 : vector<128x32xf32>
    %cst_42 = arith.constant 0.707106769 : f32
    %151 = vector.broadcast %cst_42 : f32 to vector<128x32xf32>
    %152 = arith.mulf %148, %151 : vector<128x32xf32>
    %153 = math.absf %152 : vector<128x32xf32>
    %cst_43 = arith.constant 0.327591091 : f32
    %154 = vector.broadcast %cst_43 : f32 to vector<128x32xf32>
    %155 = arith.mulf %154, %153 : vector<128x32xf32>
    %cst_44 = arith.constant 1.000000e+00 : f32
    %156 = vector.broadcast %cst_44 : f32 to vector<128x32xf32>
    %157 = arith.addf %156, %155 : vector<128x32xf32>
    %cst_45 = arith.constant 1.000000e+00 : f32
    %158 = vector.broadcast %cst_45 : f32 to vector<128x32xf32>
    %159 = arith.divf %158, %157 : vector<128x32xf32>
    %cst_46 = arith.constant 1.06140542 : f32
    %160 = vector.broadcast %cst_46 : f32 to vector<128x32xf32>
    %161 = arith.mulf %160, %159 : vector<128x32xf32>
    %cst_47 = arith.constant -1.45315206 : f32
    %162 = vector.broadcast %cst_47 : f32 to vector<128x32xf32>
    %163 = arith.addf %161, %162 : vector<128x32xf32>
    %164 = arith.mulf %163, %159 : vector<128x32xf32>
    %cst_48 = arith.constant 1.42141378 : f32
    %165 = vector.broadcast %cst_48 : f32 to vector<128x32xf32>
    %166 = arith.addf %164, %165 : vector<128x32xf32>
    %167 = arith.mulf %166, %159 : vector<128x32xf32>
    %cst_49 = arith.constant -0.284496725 : f32
    %168 = vector.broadcast %cst_49 : f32 to vector<128x32xf32>
    %169 = arith.addf %167, %168 : vector<128x32xf32>
    %170 = arith.mulf %169, %159 : vector<128x32xf32>
    %cst_50 = arith.constant 0.254829586 : f32
    %171 = vector.broadcast %cst_50 : f32 to vector<128x32xf32>
    %172 = arith.addf %170, %171 : vector<128x32xf32>
    %173 = arith.mulf %172, %159 : vector<128x32xf32>
    %cst_51 = arith.constant 0.000000e+00 : f32
    %174 = vector.broadcast %cst_51 : f32 to vector<128x32xf32>
    %175 = arith.subf %174, %153 : vector<128x32xf32>
    %176 = arith.mulf %175, %153 : vector<128x32xf32>
    %177 = math.exp %176 : vector<128x32xf32>
    %178 = arith.mulf %173, %177 : vector<128x32xf32>
    %cst_52 = arith.constant 1.000000e+00 : f32
    %179 = vector.broadcast %cst_52 : f32 to vector<128x32xf32>
    %180 = arith.subf %179, %178 : vector<128x32xf32>
    %cst_53 = arith.constant 0.000000e+00 : f32
    %181 = vector.broadcast %cst_53 : f32 to vector<128x32xf32>
    %182 = arith.cmpf oge, %152, %181 : vector<128x32xf32>
    %cst_54 = arith.constant 0.000000e+00 : f32
    %183 = vector.broadcast %cst_54 : f32 to vector<128x32xf32>
    %184 = arith.subf %183, %180 : vector<128x32xf32>
    %185 = arith.select %182, %180, %184 : vector<128x32xi1>, vector<128x32xf32>
    %cst_55 = arith.constant 1.000000e+00 : f32
    %186 = vector.broadcast %cst_55 : f32 to vector<128x32xf32>
    %187 = arith.addf %186, %185 : vector<128x32xf32>
    %188 = arith.mulf %150, %187 : vector<128x32xf32>
    %c2 = arith.constant 2 : index
    %c0_56 = arith.constant 0 : index
    %c0_57 = arith.constant 0 : index
    %189 = vector.load %arg4[%c2, %c0_56, %c0_57] : memref<3x32x32xf32, #tpu.memory_space<vmem>>, vector<1x32x32xf32>
    %190 = vector.shape_cast %189 : vector<1x32x32xf32> to vector<32x32xf32>
    %cst_58 = arith.constant dense<0.000000e+00> : vector<128x32xf32>
    %191 = tpu.matmul %188, %190, %cst_58 {dimension_numbers = #tpu.dot_dimension_numbers<[1], [0], [0], [1], [0, 0, 1, 1], [], []>} : vector<128x32xf32>, vector<32x32xf32>, vector<128x32xf32> -> vector<128x32xf32>
    %192 = vector.extract_strided_slice %0 {offsets = [6, 0], sizes = [1, 32], strides = [1, 1]} : vector<8x32xf32> to vector<1x32xf32>
    %193 = vector.broadcast %192 : vector<1x32xf32> to vector<128x32xf32>
    %194 = arith.addf %191, %193 : vector<128x32xf32>
    %195 = arith.addf %194, %118 : vector<128x32xf32>
    %196 = vector.extract_strided_slice %195 {offsets = [0, 0], sizes = [64, 32], strides = [1, 1]} : vector<128x32xf32> to vector<64x32xf32>
    %cst_59 = arith.constant dense<0.000000e+00> : vector<32x64xf32>
    %197 = tpu.matmul %1, %196, %cst_59 {dimension_numbers = #tpu.dot_dimension_numbers<[1], [1], [0], [0], [0, 0, 1, 0], [], []>} : vector<32x32xf32>, vector<64x32xf32>, vector<32x64xf32> -> vector<32x64xf32>
    %c0_60 = arith.constant 0 : index
    %c0_61 = arith.constant 0 : index
    %c0_62 = arith.constant 0 : index
    %198 = vector.load %arg7[%c0_60, %c0_61, %c0_62] : memref<2x32x64xf32, #tpu.memory_space<vmem>>, vector<1x32x64xf32>
    %199 = vector.shape_cast %198 : vector<1x32x64xf32> to vector<32x64xf32>
    %200 = vector.shape_cast %197 : vector<32x64xf32> to vector<1x32x64xf32>
    tpu.vector_store %arg7[%c0_60, %c0_61, %c0_62], %200 {strides = array<i32>} : memref<2x32x64xf32, #tpu.memory_space<vmem>>, vector<1x32x64xf32>,
    %201 = vector.extract_strided_slice %195 {offsets = [64, 0], sizes = [64, 32], strides = [1, 1]} : vector<128x32xf32> to vector<64x32xf32>
    %cst_63 = arith.constant dense<0.000000e+00> : vector<32x64xf32>
    %202 = tpu.matmul %1, %201, %cst_63 {dimension_numbers = #tpu.dot_dimension_numbers<[1], [1], [0], [0], [0, 0, 1, 0], [], []>} : vector<32x32xf32>, vector<64x32xf32>, vector<32x64xf32> -> vector<32x64xf32>
    %c1_64 = arith.constant 1 : index
    %c0_65 = arith.constant 0 : index
    %c0_66 = arith.constant 0 : index
    %203 = vector.load %arg7[%c1_64, %c0_65, %c0_66] : memref<2x32x64xf32, #tpu.memory_space<vmem>>, vector<1x32x64xf32>
    %204 = vector.shape_cast %203 : vector<1x32x64xf32> to vector<32x64xf32>
    %205 = vector.shape_cast %202 : vector<32x64xf32> to vector<1x32x64xf32>
    tpu.vector_store %arg7[%c1_64, %c0_65, %c0_66], %205 {strides = array<i32>} : memref<2x32x64xf32, #tpu.memory_space<vmem>>, vector<1x32x64xf32>,
    return
  }
  func.func @transform_0(%arg0: i32) -> (i32, i32, i32) {
    %c0_i32 = arith.constant 0 : i32
    %c0_i32_0 = arith.constant 0 : i32
    %c0_i32_1 = arith.constant 0 : i32
    return %arg0, %c0_i32, %c0_i32_0 : i32, i32, i32
  }
  func.func @transform_1(%arg0: i32) -> (i32, i32) {
    %c0_i32 = arith.constant 0 : i32
    %c0_i32_0 = arith.constant 0 : i32
    %c0_i32_1 = arith.constant 0 : i32
    return %c0_i32, %c0_i32_0 : i32, i32
  }
  func.func @transform_2(%arg0: i32) -> (i32, i32) {
    %c0_i32 = arith.constant 0 : i32
    %c0_i32_0 = arith.constant 0 : i32
    %c0_i32_1 = arith.constant 0 : i32
    return %c0_i32, %c0_i32_0 : i32, i32
  }
  func.func @transform_3(%arg0: i32) -> (i32, i32, i32) {
    %c0_i32 = arith.constant 0 : i32
    %c0_i32_0 = arith.constant 0 : i32
    %c0_i32_1 = arith.constant 0 : i32
    %c0_i32_2 = arith.constant 0 : i32
    return %c0_i32, %c0_i32_0, %c0_i32_1 : i32, i32, i32
  }
  func.func @transform_4(%arg0: i32) -> (i32, i32) {
    %c0_i32 = arith.constant 0 : i32
    %c0_i32_0 = arith.constant 0 : i32
    %c0_i32_1 = arith.constant 0 : i32
    return %c0_i32, %c0_i32_0 : i32, i32
  }
  func.func @transform_5(%arg0: i32) -> (i32, i32) {
    %c0_i32 = arith.constant 0 : i32
    %c0_i32_0 = arith.constant 0 : i32
    %c0_i32_1 = arith.constant 0 : i32
    return %c0_i32, %c0_i32_0 : i32, i32
  }
  func.func @transform_6(%arg0: i32) -> (i32, i32, i32) {
    %c0_i32 = arith.constant 0 : i32
    %c0_i32_0 = arith.constant 0 : i32
    %c0_i32_1 = arith.constant 0 : i32
    return %arg0, %c0_i32, %c0_i32_0 : i32, i32, i32
  }
}

</mosaic_0001>

<bundles_post_ra>
// kernel: tpu_custom_call.1
= control target key start
LH: loop header
LB: loop body
LE: loop exit
PB: predicated region body
PF: predicated region fallthrough
CT: control target
= control target key end

     0   :  { %s7470_s0 = inlined_call_operand.vmem [shape: f32[2,32,64], index: 0, kind: input, shape index: {}]   ;;  %s7471_s1 = inlined_call_operand.vmem [shape: f32[32,96], index: 1, kind: input, shape index: {}]   ;;  %s7472_s2 = inlined_call_operand.vmem [shape: f32[1,96], index: 2, kind: input, shape index: {}]   ;;  %s7473_s3 = inlined_call_operand.vmem [shape: f32[3,32,32], index: 3, kind: input, shape index: {}]   ;;  %s7474_s4 = inlined_call_operand.vmem [shape: f32[8,32], index: 4, kind: input, shape index: {}]   ;;  %s7475_s5 = inlined_call_operand.vmem [shape: f32[288,32], index: 5, kind: input, shape index: {}]   ;;  %s7476_s6 = inlined_call_operand.hbm [shape: f32[2,32,64], index: 6, kind: output, shape index: {}]  }
   0x1   :  { %v61_v0 = vld [vmem:[%s7470_s0] sm:$0xff]  ;;  %v28_v2 = vld [vmem:[%s7475_s5 + $0x18] sm:$0xff]  ;;  %v27_v3 = vld [vmem:[%s7475_s5 + $0x10] sm:$0xff] }
   0x2   :  { %65 = vxpose.xlu0.b32.start [1/4] (short) (narrow) %v61_v0, 64  ;;  %v4195_v1 = vld [vmem:[%s7470_s0 + $0x20] sm:$0xff]  ;;  %134 = vmatpush.msra.mxu0 %v28_v2  ;;  %v26_v4 = vld [vmem:[%s7475_s5 + $0x8] sm:$0xff] }
   0x3   :  { %168 = vxpose.xlu1.b32.start [1/4] (short) (narrow) %v4195_v1, 64  ;;  %236 = vmatpush.msra.mxu1 %v28_v2 }
   0x4   :  { %4447 = vmatpush.msra.mxu2 %v28_v2 }
   0x5   :  { %11 = vsyncpa [#allocation3], 0  ;;  %135 = vmatpush.msra.mxu0 %v27_v3  ;;  %237 = vmatpush.msra.mxu1 %v27_v3  ;;  %v62_v5 = vld [vmem:[%s7470_s0 + $0x8] sm:$0xff]  ;;  %v63_v7 = vld [vmem:[%s7470_s0 + $0x10] sm:$0xff]  ;;  %vm97_vm0 = vcmask 261120   ;;  %v4925_v54 = vmov 32.0  }
   0x6   :  { %4448 = vmatpush.msra.mxu2 %v27_v3  ;;  %v4196_v6 = vld [vmem:[%s7470_s0 + $0x28] sm:$0xff]  ;;  %v4197_v8 = vld [vmem:[%s7470_s0 + $0x30] sm:$0xff]  ;;  %v64_v9 = vld [vmem:[%s7470_s0 + $0x18] sm:$0xff]  ;;  %4503 = vrcp.f32 %v4925_v54  ;;  %s4926_s7 = smov 96   ;;  %s4927_s9 = smov 64  }
   0x7   :  { %136 = vmatpush.msra.mxu0 %v26_v4  ;;  %238 = vmatpush.msra.mxu1 %v26_v4  ;;  %v4198_v10 = vld [vmem:[%s7470_s0 + $0x38] sm:$0xff]  ;;  %v25_v11 = vld [vmem:[%s7475_s5] sm:$0xff]  ;;  %s4175_s11 = sshll.u32 %s7476_s6, 4  ;;  %s4929_s12 = smov 128   ;;  %s4176_s11 = int_to_ptr.hbm [resolvable:$true] %s4175_s11 }
   0x8   :  { %4449 = vmatpush.msra.mxu2 %v26_v4  ;;  %s4930_s13 = smov 8  }
   0x9   :  { %137 = vmatpush.msra.mxu0 %v25_v11  ;;  %239 = vmatpush.msra.mxu1 %v25_v11 }
   0xa   :  { %66 = vxpose.xlu0.b32.cont [2/4] (short) (narrow) %v62_v5, 64  ;;  %4450 = vmatpush.msra.mxu2 %v25_v11 }
   0xb   :  { %169 = vxpose.xlu1.b32.cont [2/4] (short) (narrow) %v4196_v6, 64 }
   0xc   :  { %4451 = vmatpush.msrb.mxu2 %v28_v2  ;;  %v4504_v55 = vpop.eup %4503 }
   0xd   :  { %v314_v56 = vmul.f32 32.0, %v4504_v55  ;;  %vm318_vm1 = vweird.f32 %v4504_v55 }
   0xe   :  { %4452 = vmatpush.msrb.mxu2 %v27_v3 }
   0xf   :  { %v315_v57 = vsub.f32 1.0, %v314_v56 }
  0x10   :  { %4453 = vmatpush.msrb.mxu2 %v26_v4 }
  0x11   :  { %v316_v58 = vmul.f32 %v4504_v55, %v315_v57 }
  0x12   :  { %67 = vxpose.xlu0.b32.cont [3/4] (short) (narrow) %v63_v7, 64  ;;  %4454 = vmatpush.msrb.mxu2 %v25_v11 }
  0x13   :  { %170 = vxpose.xlu1.b32.cont [3/4] (short) (narrow) %v4197_v8, 64  ;;  %v317_v59 = vadd.f32 %v4504_v55, %v316_v58 }
  0x15   :  { %v5070_v60 = vsel %vm318_vm1, %v4504_v55, %v317_v59 }
  0x16   :  { %7504 = vst [vmem:[#allocation16_spill] sm:$0xff] %v5070_v60 }
  0x1a   :  { %68 = vxpose.xlu0.b32.end [4/4] (short) (narrow) %v64_v9, 64 }
  0x1b   :  { %171 = vxpose.xlu1.b32.end [4/4] (short) (narrow) %v4198_v10, 64 }
  0xa6   :  { %v81_v12 = vpop.trf.xlu0 }
  0xa7   :  { %4187 = vmatmul.msk.f32.vlgmr.msra.gmra.mxu0 %vm97_vm0, %v81_v12  ;;  %v184_v13 = vpop.trf.xlu1 }
  0xa8   :  { %4199 = vmatmul.msk.f32.vlgmr.msra.gmra.mxu1 %vm97_vm0, %v184_v13 }
  0xae   :  { %v82_v14 = vpop.trf.xlu0 }
  0xaf   :  { %4188 = vmatmul.msk.f32.gmra.mxu0 %vm97_vm0, %v82_v14  ;;  %v185_v15 = vpop.trf.xlu1 }
  0xb0   :  { %4200 = vmatmul.msk.f32.gmra.mxu1 %vm97_vm0, %v185_v15 }
  0xb6   :  { %v83_v16 = vpop.trf.xlu0 }
  0xb7   :  { %4189 = vmatmul.msk.f32.gmra.mxu0 %vm97_vm0, %v83_v16  ;;  %v186_v17 = vpop.trf.xlu1 }
  0xb8   :  { %4201 = vmatmul.msk.f32.gmra.mxu1 %vm97_vm0, %v186_v17 }
  0xbe   :  { %v84_v18 = vpop.trf.xlu0 }
  0xbf   :  { %4190 = vmatmul.msk.f32.gmra.mxu0 %vm97_vm0, %v84_v18  ;;  %v187_v19 = vpop.trf.xlu1 }
  0xc0   :  { %4202 = vmatmul.msk.f32.gmra.mxu1 %vm97_vm0, %v187_v19 }
  0xc6   :  { %v85_v20 = vpop.trf.xlu0 }
  0xc7   :  { %4191 = vmatmul.msk.f32.gmra.mxu0 %vm97_vm0, %v85_v20  ;;  %v188_v21 = vpop.trf.xlu1 }
  0xc8   :  { %4203 = vmatmul.msk.f32.gmra.mxu1 %vm97_vm0, %v188_v21 }
  0xce   :  { %v86_v22 = vpop.trf.xlu0 }
  0xcf   :  { %4192 = vmatmul.msk.f32.gmra.mxu0 %vm97_vm0, %v86_v22  ;;  %v189_v42 = vpop.trf.xlu1 }
  0xd0   :  { %4204 = vmatmul.msk.f32.gmra.mxu1 %vm97_vm0, %v189_v42 }
  0xd6   :  { %v87_v23 = vpop.trf.xlu0 }
  0xd7   :  { %4193 = vmatmul.msk.f32.gmra.mxu0 %vm97_vm0, %v87_v23  ;;  %v190_v45 = vpop.trf.xlu1 }
  0xd8   :  { %4205 = vmatmul.msk.f32.gmra.mxu1 %vm97_vm0, %v190_v45 }
  0xde   :  { %v88_v24 = vpop.trf.xlu0 }
  0xdf   :  { %4194 = vmatmul.msk.f32.vlgmr.msra.gmra.mxu2 %vm97_vm0, %v88_v24  ;;  %v191_v47 = vpop.trf.xlu1 }
  0xe7   :  { %4206 = vmatmul.msk.f32.vlgmr.msrb.gmra.mxu2 %vm97_vm0, %v191_v47 }
 0x124   :  { %v5015_v25 = vpop.f32.mrf.mxu0 }
 0x125   :  { %v265_v26 = vsel %vm97_vm0, %v5015_v25, 0.0  ;;  %v5027_v31 = vpop.f32.mrf.mxu1 }
 0x126   :  { %266 = vadd.xlane.f32.xlu2 %v265_v26  ;;  %7494 = vst [vmem:[#allocation6_spill] sm:$0xff] %v5027_v31  ;;  %v289_v35 = vsel %vm97_vm0, %v5027_v31, 0.0 }
 0x12c   :  { %v5019_v27 = vpop.f32.mrf.mxu0 }
 0x12d   :  { %v268_v28 = vsel %vm97_vm0, %v5019_v27, 0.0  ;;  %v5033_v34 = vpop.f32.mrf.mxu1 }
 0x12e   :  { %269 = vadd.xlane.f32.xlu2 %v268_v28  ;;  %7496 = vst [vmem:[#allocation8_spill] sm:$0xff] %v5033_v34  ;;  %v292_v38 = vsel %vm97_vm0, %v5033_v34, 0.0 }
 0x134   :  { %v5023_v29 = vpop.f32.mrf.mxu0 }
 0x135   :  { %7493 = vst [vmem:[#allocation5_spill] sm:$0xff] %v5023_v29  ;;  %v271_v30 = vsel %vm97_vm0, %v5023_v29, 0.0  ;;  %v5045_v40 = vpop.f32.mrf.mxu1 }
 0x136   :  { %272 = vadd.xlane.f32.xlu2 %v271_v30  ;;  %7499 = vst [vmem:[#allocation11_spill] sm:$0xff] %v5045_v40  ;;  %v295_v43 = vsel %vm97_vm0, %v5045_v40, 0.0 }
 0x13c   :  { %v5029_v32 = vpop.f32.mrf.mxu0 }
 0x13d   :  { %7495 = vst [vmem:[#allocation7_spill] sm:$0xff] %v5029_v32  ;;  %v274_v33 = vsel %vm97_vm0, %v5029_v32, 0.0  ;;  %v5052_v44 = vpop.f32.mrf.mxu1 }
 0x13e   :  { %275 = vadd.xlane.f32.xlu2 %v274_v33  ;;  %7500 = vst [vmem:[#allocation12_spill] sm:$0xff] %v5052_v44  ;;  %v298_v46 = vsel %vm97_vm0, %v5052_v44, 0.0 }
 0x144   :  { %v5037_v36 = vpop.f32.mrf.mxu0 }
 0x145   :  { %7497 = vst [vmem:[#allocation9_spill] sm:$0xff] %v5037_v36  ;;  %v277_v37 = vsel %vm97_vm0, %v5037_v36, 0.0  ;;  %v5058_v48 = vpop.f32.mrf.mxu1 }
 0x146   :  { %290 = vadd.xlane.f32.xlu2 %v289_v35  ;;  %278 = vadd.xlane.f32.xlu0 %v277_v37  ;;  %7501 = vst [vmem:[#allocation13_spill] sm:$0xff] %v5058_v48  ;;  %v301_v49 = vsel %vm97_vm0, %v5058_v48, 0.0 }
 0x14c   :  { %v5043_v39 = vpop.f32.mrf.mxu0 }
 0x14d   :  { %7498 = vst [vmem:[#allocation10_spill] sm:$0xff] %v5043_v39  ;;  %v280_v41 = vsel %vm97_vm0, %v5043_v39, 0.0 }
 0x14e   :  { %293 = vadd.xlane.f32.xlu2 %v292_v38  ;;  %281 = vadd.xlane.f32.xlu1 %v280_v41 }
 0x154   :  { %v5062_v50 = vpop.f32.mrf.mxu0 }
 0x155   :  { %7502 = vst [vmem:[#allocation14_spill] sm:$0xff] %v5062_v50  ;;  %v283_v51 = vsel %vm97_vm0, %v5062_v50, 0.0 }
 0x156   :  { %296 = vadd.xlane.f32.xlu2 %v295_v43 }
 0x15e   :  { %299 = vadd.xlane.f32.xlu2 %v298_v46 }
 0x162   :  { %v5066_v52 = vpop.f32.mrf.mxu2 }
 0x163   :  { %7503 = vst [vmem:[#allocation15_spill] sm:$0xff] %v5066_v52  ;;  %v286_v53 = vsel %vm97_vm0, %v5066_v52, 0.0 }
 0x166   :  { %302 = vadd.xlane.f32.xlu2 %v301_v49 }
 0x16e   :  { %284 = vadd.xlane.f32.xlu2 %v283_v51 }
 0x176   :  { %287 = vadd.xlane.f32.xlu2 %v286_v53 }
 0x199   :  { %v267_v61 = vpop.xlane.xlu2 %266 }
 0x19a   :  { %v320_v62 = vmul.f32 %v5070_v60, %v267_v61 }
 0x19c   :  { %v5074_v63 = vsub.f32 %v5015_v25, %v320_v62 }
 0x19e   :  { %v352_v0 = vmul.f32 %v5074_v63, %v5074_v63 }
 0x1a0   :  { %v368_v1 = vsel %vm97_vm0, %v352_v0, 0.0 }
 0x1a1   :  { %v270_v2 = vpop.xlane.xlu2 %269  ;;  %369 = vadd.xlane.f32.xlu2 %v368_v1 }
 0x1a2   :  { %v321_v3 = vmul.f32 %v5070_v60, %v270_v2 }
 0x1a4   :  { %v5081_v4 = vsub.f32 %v5019_v27, %v321_v3 }
 0x1a6   :  { %v353_v5 = vmul.f32 %v5081_v4, %v5081_v4 }
 0x1a8   :  { %v371_v6 = vsel %vm97_vm0, %v353_v5, 0.0 }
 0x1a9   :  { %v273_v7 = vpop.xlane.xlu2 %272  ;;  %372 = vadd.xlane.f32.xlu2 %v371_v6 }
 0x1aa   :  { %v322_v8 = vmul.f32 %v5070_v60, %v273_v7 }
 0x1ac   :  { %v5088_v9 = vsub.f32 %v5023_v29, %v322_v8 }
 0x1ae   :  { %v354_v10 = vmul.f32 %v5088_v9, %v5088_v9 }
 0x1b0   :  { %v374_v11 = vsel %vm97_vm0, %v354_v10, 0.0 }
 0x1b1   :  { %v276_v12 = vpop.xlane.xlu2 %275  ;;  %375 = vadd.xlane.f32.xlu2 %v374_v11  ;;  %v5156_v11 = vpop.f32.mrf.mxu1 }
 0x1b2   :  { %v323_v13 = vmul.f32 %v5070_v60, %v276_v12  ;;  %7505 = vst [vmem:[#allocation17_spill] sm:$0xff] %v5156_v11  ;;  %v304_v12 = vsel %vm97_vm0, %v5156_v11, 0.0 }
 0x1b4   :  { %v5095_v14 = vsub.f32 %v5029_v32, %v323_v13 }
 0x1b6   :  { %v355_v15 = vmul.f32 %v5095_v14, %v5095_v14 }
 0x1b8   :  { %v377_v16 = vsel %vm97_vm0, %v355_v15, 0.0 }
 0x1b9   :  { %v291_v17 = vpop.xlane.xlu2 %290  ;;  %v279_v18 = vpop.xlane.xlu0 %278  ;;  %378 = vadd.xlane.f32.xlu2 %v377_v16 }
 0x1ba   :  { %v328_v19 = vmul.f32 %v5070_v60, %v291_v17  ;;  %v324_v20 = vmul.f32 %v5070_v60, %v279_v18  ;;  %v5160_v13 = vpop.f32.mrf.mxu1  ;;  %v5164_v16 = vpop.f32.mrf.mxu2 }
 0x1bb   :  { %7506 = vst [vmem:[#allocation18_spill] sm:$0xff] %v5160_v13  ;;  %v307_v15 = vsel %vm97_vm0, %v5160_v13, 0.0  ;;  %v310_v18 = vsel %vm97_vm0, %v5164_v16, 0.0 }
 0x1bc   :  { %v5103_v21 = vsub.f32 %v5027_v31, %v328_v19  ;;  %v5106_v22 = vsub.f32 %v5037_v36, %v324_v20  ;;  %7507 = vst [vmem:[#allocation19_spill] sm:$0xff] %v5164_v16  ;;  %v661_v20 = vld [vmem:[%s7471_s1 + $0x18] sm:$0xff] }
 0x1bd   :  { %726 = vmatpush.msra.mxu2 %v661_v20 }
 0x1be   :  { %v360_v23 = vmul.f32 %v5103_v21, %v5103_v21  ;;  %v356_v24 = vmul.f32 %v5106_v22, %v5106_v22 }
 0x1c0   :  { %v392_v26 = vsel %vm97_vm0, %v360_v23, 0.0  ;;  %v380_v28 = vsel %vm97_vm0, %v356_v24, 0.0  ;;  %v660_v23 = vld [vmem:[%s7471_s1 + $0x10] sm:$0xff] }
 0x1c1   :  { %v294_v30 = vpop.xlane.xlu2 %293  ;;  %393 = vadd.xlane.f32.xlu1 %v392_v26  ;;  %v282_v33 = vpop.xlane.xlu1 %281  ;;  %381 = vadd.xlane.f32.xlu2 %v380_v28  ;;  %v659_v26 = vld [vmem:[%s7471_s1 + $0x8] sm:$0xff]  ;;  %v658_v28 = vld [vmem:[%s7471_s1] sm:$0xff] }
 0x1c2   :  { %v329_v35 = vmul.f32 %v5070_v60, %v294_v30  ;;  %v325_v37 = vmul.f32 %v5070_v60, %v282_v33  ;;  %727 = vmatpush.msra.mxu2 %v660_v23 }
 0x1c4   :  { %v5117_v38 = vsub.f32 %v5033_v34, %v329_v35  ;;  %v5120_v41 = vsub.f32 %v5043_v39, %v325_v37  ;;  %728 = vmatpush.msra.mxu2 %v659_v26 }
 0x1c6   :  { %v361_v42 = vmul.f32 %v5117_v38, %v5117_v38  ;;  %v357_v43 = vmul.f32 %v5120_v41, %v5120_v41  ;;  %729 = vmatpush.msra.mxu2 %v658_v28 }
 0x1c8   :  { %v395_v45 = vsel %vm97_vm0, %v361_v42, 0.0  ;;  %v383_v46 = vsel %vm97_vm0, %v357_v43, 0.0 }
 0x1c9   :  { %v297_v47 = vpop.xlane.xlu2 %296  ;;  %396 = vadd.xlane.f32.xlu1 %v395_v45  ;;  %384 = vadd.xlane.f32.xlu2 %v383_v46 }
 0x1ca   :  { %v330_v49 = vmul.f32 %v5070_v60, %v297_v47 }
 0x1cc   :  { %v5130_v51 = vsub.f32 %v5045_v40, %v330_v49 }
 0x1ce   :  { %v362_v53 = vmul.f32 %v5130_v51, %v5130_v51 }
 0x1d0   :  { %v398_v54 = vsel %vm97_vm0, %v362_v53, 0.0 }
 0x1d1   :  { %v300_v55 = vpop.xlane.xlu2 %299  ;;  %399 = vadd.xlane.f32.xlu1 %v398_v54 }
 0x1d2   :  { %v331_v17 = vmul.f32 %v5070_v60, %v300_v55 }
 0x1d4   :  { %v5170_v19 = vsub.f32 %v5052_v44, %v331_v17 }
 0x1d6   :  { %v363_v24 = vmul.f32 %v5170_v19, %v5170_v19 }
 0x1d8   :  { %v401_v30 = vsel %vm97_vm0, %v363_v24, 0.0 }
 0x1d9   :  { %v303_v56 = vpop.xlane.xlu2 %302 }
 0x1da   :  { %v332_v57 = vmul.f32 %v5070_v60, %v303_v56  ;;  %v24_v56 = vld [vmem:[%s7474_s4] sm:$0xff] }
 0x1dc   :  { %v5137_v58 = vsub.f32 %v5058_v48, %v332_v57 }
 0x1de   :  { %v364_v59 = vmul.f32 %v5137_v58, %v5137_v58 }
 0x1e0   :  { %v404_v61 = vsel %vm97_vm0, %v364_v59, 0.0 }
 0x1e1   :  { %405 = vadd.xlane.f32.xlu0 %v404_v61  ;;  %v285_v62 = vpop.xlane.xlu2 %284 }
 0x1e2   :  { %v326_v0 = vmul.f32 %v5070_v60, %v285_v62 }
 0x1e4   :  { %v5144_v1 = vsub.f32 %v5062_v50, %v326_v0 }
 0x1e6   :  { %v358_v2 = vmul.f32 %v5144_v1, %v5144_v1 }
 0x1e8   :  { %v386_v3 = vsel %vm97_vm0, %v358_v2, 0.0  ;;  %v5193_v2 = vperm.slane %v24_v56, 0 }
 0x1e9   :  { %387 = vadd.xlane.f32.xlu2 %v386_v3  ;;  %v288_v5 = vpop.xlane.xlu2 %287 }
 0x1ea   :  { %v327_v6 = vmul.f32 %v5070_v60, %v288_v5 }
 0x1ec   :  { %v5151_v7 = vsub.f32 %v5066_v52, %v327_v6 }
 0x1ee   :  { %v359_v8 = vmul.f32 %v5151_v7, %v5151_v7 }
 0x1f0   :  { %v389_v10 = vsel %vm97_vm0, %v359_v8, 0.0  ;;  %v5196_v8 = vperm.slane %v24_v56, 1 }
 0x1f1   :  { %390 = vadd.xlane.f32.xlu2 %v389_v10 }
 0x1f9   :  { %305 = vadd.xlane.f32.xlu2 %v304_v12 }
 0x201   :  { %308 = vadd.xlane.f32.xlu2 %v307_v15 }
 0x209   :  { %311 = vadd.xlane.f32.xlu2 %v310_v18 }
 0x211   :  { %402 = vadd.xlane.f32.xlu2 %v401_v30 }
 0x214   :  { %v370_v33 = vpop.xlane.xlu2 %369 }
 0x215   :  { %v416_v35 = vmul.f32 %v370_v33, %v5070_v60 }
 0x217   :  { %v432_v37 = vadd.f32 1e-05, %v416_v35 }
 0x219   :  { %4505 = vrsqrt.f32 %v432_v37  ;;  %vm454_vm3 = vweird.f32 %v432_v37 }
 0x21c   :  { %v373_v42 = vpop.xlane.xlu2 %372 }
 0x21d   :  { %v417_v43 = vmul.f32 %v373_v42, %v5070_v60 }
 0x21f   :  { %v4506_v45 = vpop.eup %4505  ;;  %v433_v46 = vadd.f32 1e-05, %v417_v43 }
 0x220   :  { %v449_v47 = vmul.f32 %v4506_v45, %v432_v37  ;;  %vm455_vm2 = vweird.f32 %v4506_v45 }
 0x221   :  { %4507 = vrsqrt.f32 %v433_v46  ;;  %vm456_vm4 = vmor %vm454_vm3, %vm455_vm2  ;;  %vm464_vm6 = vweird.f32 %v433_v46 }
 0x222   :  { %v450_v49 = vmul.f32 %v4506_v45, %v449_v47 }
 0x224   :  { %v451_v53 = vmul.f32 0.5, %v450_v49  ;;  %v376_v54 = vpop.xlane.xlu2 %375 }
 0x225   :  { %v418_v55 = vmul.f32 %v376_v54, %v5070_v60 }
 0x226   :  { %v452_v57 = vsub.f32 1.5, %v451_v53 }
 0x227   :  { %v4508_v59 = vpop.eup %4507  ;;  %v434_v61 = vadd.f32 1e-05, %v418_v55 }
 0x228   :  { %v453_v62 = vmul.f32 %v4506_v45, %v452_v57  ;;  %v459_v0 = vmul.f32 %v4508_v59, %v433_v46  ;;  %vm465_vm5 = vweird.f32 %v4508_v59 }
 0x229   :  { %4509 = vrsqrt.f32 %v434_v61  ;;  %vm466_vm7 = vmor %vm464_vm6, %vm465_vm5  ;;  %vm474_vm9 = vweird.f32 %v434_v61 }
 0x22a   :  { %v457_v3 = vsel %vm456_vm4, %v4506_v45, %v453_v62  ;;  %v460_v5 = vmul.f32 %v4508_v59, %v459_v0 }
 0x22b   :  { %v608_v6 = vmul.f32 %v457_v3, %v5074_v63 }
 0x22c   :  { %v461_v10 = vmul.f32 0.5, %v460_v5  ;;  %v379_v12 = vpop.xlane.xlu2 %378 }
 0x22d   :  { %v625_v15 = vmul.f32 %v5193_v2, %v608_v6  ;;  %v419_v17 = vmul.f32 %v379_v12, %v5070_v60 }
 0x22e   :  { %v462_v18 = vsub.f32 1.5, %v461_v10 }
 0x22f   :  { %v4510_v20 = vpop.eup %4509  ;;  %v435_v23 = vadd.f32 1e-05, %v419_v17  ;;  %v642_v24 = vadd.f32 %v5196_v8, %v625_v15 }
 0x230   :  { %v463_v26 = vmul.f32 %v4508_v59, %v462_v18  ;;  %v469_v28 = vmul.f32 %v4510_v20, %v434_v61  ;;  %vm475_vm8 = vweird.f32 %v4510_v20 }
 0x231   :  { %4511 = vrsqrt.f32 %v435_v23  ;;  %4207 = vmatmul.msk.f32.vlgmr.msra.gmra.mxu2 %vm97_vm0, %v642_v24  ;;  %vm476_vm10 = vmor %vm474_vm9, %vm475_vm8  ;;  %vm484_vm12 = vweird.f32 %v435_v23 }
 0x232   :  { %v470_v63 = vmul.f32 %v4510_v20, %v469_v28  ;;  %v467_v30 = vsel %vm466_vm7, %v4508_v59, %v463_v26 }
 0x233   :  { %v609_v33 = vmul.f32 %v467_v30, %v5081_v4 }
 0x234   :  { %v471_v35 = vmul.f32 0.5, %v470_v63  ;;  %v382_v37 = vpop.xlane.xlu2 %381 }
 0x235   :  { %v420_v42 = vmul.f32 %v382_v37, %v5070_v60  ;;  %v626_v43 = vmul.f32 %v5193_v2, %v609_v33 }
 0x236   :  { %v472_v45 = vsub.f32 1.5, %v471_v35 }
 0x237   :  { %v4512_v47 = vpop.eup %4511  ;;  %v436_v49 = vadd.f32 1e-05, %v420_v42  ;;  %v643_v46 = vadd.f32 %v5196_v8, %v626_v43  ;;  %v394_v43 = vpop.xlane.xlu1 %393 }
 0x238   :  { %v473_v53 = vmul.f32 %v4510_v20, %v472_v45  ;;  %v479_v54 = vmul.f32 %v4512_v47, %v435_v23  ;;  %vm485_vm11 = vweird.f32 %v4512_v47 }
 0x239   :  { %4208 = vmatmul.msk.f32.gmra.mxu2 %vm97_vm0, %v643_v46  ;;  %4513 = vrsqrt.f32 %v436_v49  ;;  %vm486_vm13 = vmor %vm484_vm12, %vm485_vm11  ;;  %vm494_vm15 = vweird.f32 %v436_v49 }
 0x23a   :  { %v480_v55 = vmul.f32 %v4512_v47, %v479_v54  ;;  %v477_v4 = vsel %vm476_vm10, %v4510_v20, %v473_v53  ;;  %v424_v53 = vmul.f32 %v394_v43, %v5070_v60 }
 0x23b   :  { %v610_v56 = vmul.f32 %v477_v4, %v5088_v9 }
 0x23c   :  { %v481_v57 = vmul.f32 0.5, %v480_v55  ;;  %v385_v59 = vpop.xlane.xlu2 %384  ;;  %v5224_v55 = vadd.f32 1e-05, %v424_v53 }
 0x23d   :  { %v421_v62 = vmul.f32 %v385_v59, %v5070_v60  ;;  %v627_v0 = vmul.f32 %v5193_v2, %v610_v56 }
 0x23e   :  { %v482_v3 = vsub.f32 1.5, %v481_v57  ;;  %vm534_vm12 = vweird.f32 %v5224_v55 }
 0x23f   :  { %v437_v5 = vadd.f32 1e-05, %v421_v62  ;;  %v644_v61 = vadd.f32 %v5196_v8, %v627_v0  ;;  %v4514_v6 = vpop.eup %4513  ;;  %v397_v4 = vpop.xlane.xlu1 %396 }
 0x240   :  { %v483_v10 = vmul.f32 %v4512_v47, %v482_v3  ;;  %v489_v12 = vmul.f32 %v4514_v6, %v436_v49  ;;  %vm495_vm14 = vweird.f32 %v4514_v6  ;;  %v425_v59 = vmul.f32 %v397_v4, %v5070_v60 }
 0x241   :  { %4209 = vmatmul.msk.f32.gmra.mxu2 %vm97_vm0, %v644_v61  ;;  %4515 = vrsqrt.f32 %v437_v5  ;;  %vm496_vm1 = vmor %vm494_vm15, %vm495_vm14  ;;  %vm504_vm3 = vweird.f32 %v437_v5 }
 0x242   :  { %v487_v9 = vsel %vm486_vm13, %v4512_v47, %v483_v10  ;;  %v490_v15 = vmul.f32 %v4514_v6, %v489_v12  ;;  %4517 = vrsqrt.f32 %v5224_v55 }
 0x243   :  { %v611_v17 = vmul.f32 %v487_v9, %v5095_v14 }
 0x244   :  { %v491_v18 = vmul.f32 0.5, %v490_v15 }
 0x245   :  { %v628_v20 = vmul.f32 %v5193_v2, %v611_v17 }
 0x246   :  { %v492_v24 = vsub.f32 1.5, %v491_v18 }
 0x247   :  { %v645_v26 = vadd.f32 %v5196_v8, %v628_v20  ;;  %v4516_v28 = vpop.eup %4515  ;;  %v400_v3 = vpop.xlane.xlu1 %399 }
 0x248   :  { %v493_v63 = vmul.f32 %v4514_v6, %v492_v24  ;;  %v499_v23 = vmul.f32 %v4516_v28, %v437_v5  ;;  %vm505_vm2 = vweird.f32 %v4516_v28  ;;  %v5232_v0 = vpop.eup %4517  ;;  %v426_v12 = vmul.f32 %v400_v3, %v5070_v60 }
 0x249   :  { %4210 = vmatmul.msk.f32.gmra.mxu2 %vm97_vm0, %v645_v26  ;;  %vm506_vm4 = vmor %vm504_vm3, %vm505_vm2  ;;  %v529_v10 = vmul.f32 %v5232_v0, %v5224_v55  ;;  %vm535_vm8 = vweird.f32 %v5232_v0 }
 0x24a   :  { %v500_v30 = vmul.f32 %v4516_v28, %v499_v23  ;;  %v497_v33 = vsel %vm496_vm1, %v4514_v6, %v493_v63  ;;  %v5240_v20 = vadd.f32 1e-05, %v426_v12  ;;  %vm536_vm13 = vmor %vm534_vm12, %vm535_vm8 }
 0x24b   :  { %v612_v35 = vmul.f32 %v497_v33, %v5106_v22  ;;  %v530_v18 = vmul.f32 %v5232_v0, %v529_v10 }
 0x24c   :  { %v501_v37 = vmul.f32 0.5, %v500_v30  ;;  %vm554_vm3 = vweird.f32 %v5240_v20 }
 0x24d   :  { %v629_v14 = vmul.f32 %v5193_v2, %v612_v35  ;;  %v531_v33 = vmul.f32 0.5, %v530_v18 }
 0x24e   :  { %v502_v42 = vsub.f32 1.5, %v501_v37 }
 0x24f   :  { %v646_v45 = vadd.f32 %v5196_v8, %v629_v14 }
 0x250   :  { %v503_v47 = vmul.f32 %v4516_v28, %v502_v42 }
 0x251   :  { %4211 = vmatmul.msk.f32.gmra.mxu2 %vm97_vm0, %v646_v45 }
 0x252   :  { %v507_v49 = vsel %vm506_vm4, %v4516_v28, %v503_v47 }
 0x253   :  { %v613_v46 = vmul.f32 %v507_v49, %v5120_v41  ;;  %v5230_v41 = vadd.f32 1e-05, %v425_v59  ;;  %v532_v49 = vsub.f32 1.5, %v531_v33 }
 0x255   :  { %v630_v22 = vmul.f32 %v5193_v2, %v613_v46  ;;  %vm544_vm15 = vweird.f32 %v5230_v41 }
 0x257   :  { %v647_v54 = vadd.f32 %v5196_v8, %v630_v22 }
 0x259   :  { %4212 = vmatmul.msk.f32.gmra.mxu2 %vm97_vm0, %v647_v54  ;;  %v406_v54 = vpop.xlane.xlu0 %405 }
 0x25c   :  { %v388_v56 = vpop.xlane.xlu2 %387 }
 0x25d   :  { %v422_v57 = vmul.f32 %v388_v56, %v5070_v60 }
 0x25f   :  { %v438_v62 = vadd.f32 1e-05, %v422_v57 }
 0x261   :  { %4519 = vrsqrt.f32 %v438_v62  ;;  %vm514_vm6 = vweird.f32 %v438_v62 }
 0x262   :  { %4521 = vrsqrt.f32 %v5230_v41 }
 0x264   :  { %v391_v5 = vpop.xlane.xlu2 %390 }
 0x265   :  { %v423_v61 = vmul.f32 %v391_v5, %v5070_v60  ;;  %v533_v5 = vmul.f32 %v5232_v0, %v532_v49 }
 0x267   :  { %v4520_v6 = vpop.eup %4519  ;;  %v439_v9 = vadd.f32 1e-05, %v423_v61 }
 0x268   :  { %v509_v15 = vmul.f32 %v4520_v6, %v438_v62  ;;  %v5242_v28 = vpop.eup %4521  ;;  %vm515_vm5 = vweird.f32 %v4520_v6 }
 0x269   :  { %4523 = vrsqrt.f32 %v439_v9  ;;  %v539_v37 = vmul.f32 %v5242_v28, %v5230_v41  ;;  %vm516_vm7 = vmor %vm514_vm6, %vm515_vm5  ;;  %vm524_vm10 = vweird.f32 %v439_v9  ;;  %vm545_vm14 = vweird.f32 %v5242_v28 }
 0x26a   :  { %v510_v17 = vmul.f32 %v4520_v6, %v509_v15  ;;  %4525 = vrsqrt.f32 %v5240_v20  ;;  %vm546_vm1 = vmor %vm544_vm15, %vm545_vm14 }
 0x26b   :  { %v540_v22 = vmul.f32 %v5242_v28, %v539_v37  ;;  %v537_v37 = vsel %vm536_vm13, %v5232_v0, %v533_v5 }
 0x26c   :  { %v511_v24 = vmul.f32 0.5, %v510_v17  ;;  %v306_v26 = vpop.xlane.xlu2 %305 }
 0x26d   :  { %v333_v63 = vmul.f32 %v5070_v60, %v306_v26  ;;  %v541_v10 = vmul.f32 0.5, %v540_v22 }
 0x26e   :  { %v512_v23 = vsub.f32 1.5, %v511_v24 }
 0x26f   :  { %v4524_v30 = vpop.eup %4523  ;;  %v5247_v35 = vsub.f32 %v5156_v11, %v333_v63 }
 0x270   :  { %v513_v14 = vmul.f32 %v4520_v6, %v512_v23  ;;  %v519_v42 = vmul.f32 %v4524_v30, %v439_v9  ;;  %v5256_v57 = vpop.eup %4525  ;;  %vm525_vm9 = vweird.f32 %v4524_v30  ;;  %v542_v23 = vsub.f32 1.5, %v541_v10 }
 0x271   :  { %v365_v43 = vmul.f32 %v5247_v35, %v5247_v35  ;;  %v549_v12 = vmul.f32 %v5256_v57, %v5240_v20  ;;  %vm526_vm11 = vmor %vm524_vm10, %vm525_vm9  ;;  %vm555_vm2 = vweird.f32 %v5256_v57 }
 0x272   :  { %v520_v45 = vmul.f32 %v4524_v30, %v519_v42  ;;  %v517_v47 = vsel %vm516_vm7, %v4520_v6, %v513_v14  ;;  %vm556_vm4 = vmor %vm554_vm3, %vm555_vm2 }
 0x273   :  { %v407_v46 = vsel %vm97_vm0, %v365_v43, 0.0  ;;  %v614_v53 = vmul.f32 %v517_v47, %v5144_v1  ;;  %v428_v1 = vmul.f32 %v406_v54, %v5070_v60  ;;  %v550_v9 = vmul.f32 %v5256_v57, %v549_v12 }
 0x274   :  { %v521_v4 = vmul.f32 0.5, %v520_v45  ;;  %408 = vadd.xlane.f32.xlu1 %v407_v46  ;;  %v309_v56 = vpop.xlane.xlu2 %308  ;;  %v543_v43 = vmul.f32 %v5242_v28, %v542_v23 }
 0x275   :  { %v334_v59 = vmul.f32 %v5070_v60, %v309_v56  ;;  %v631_v62 = vmul.f32 %v5193_v2, %v614_v53  ;;  %v5275_v24 = vadd.f32 1e-05, %v428_v1  ;;  %v551_v45 = vmul.f32 0.5, %v550_v9 }
 0x276   :  { %v522_v3 = vsub.f32 1.5, %v521_v4  ;;  %v547_v53 = vsel %vm546_vm1, %v5242_v28, %v543_v43 }
 0x277   :  { %v5264_v61 = vsub.f32 %v5160_v13, %v334_v59  ;;  %v648_v6 = vadd.f32 %v5196_v8, %v631_v62  ;;  %4527 = vrsqrt.f32 %v5275_v24  ;;  %v552_v46 = vsub.f32 1.5, %v551_v45 }
 0x278   :  { %v523_v15 = vmul.f32 %v4524_v30, %v522_v3  ;;  %v617_v59 = vmul.f32 %v547_v53, %v5117_v38  ;;  %vm574_vm9 = vweird.f32 %v5275_v24 }
 0x279   :  { %4213 = vmatmul.msk.f32.gmra.mxu2 %vm97_vm0, %v648_v6  ;;  %v366_v17 = vmul.f32 %v5264_v61, %v5264_v61  ;;  %v553_v41 = vmul.f32 %v5256_v57, %v552_v46 }
 0x27a   :  { %v527_v18 = vsel %vm526_vm11, %v4524_v30, %v523_v15  ;;  %v634_v28 = vmul.f32 %v5193_v2, %v617_v59 }
 0x27b   :  { %v410_v26 = vsel %vm97_vm0, %v366_v17, 0.0  ;;  %v615_v63 = vmul.f32 %v527_v18, %v5151_v7  ;;  %v616_v7 = vmul.f32 %v537_v37, %v5103_v21  ;;  %v557_v5 = vsel %vm556_vm4, %v5256_v57, %v553_v41 }
 0x27c   :  { %411 = vadd.xlane.f32.xlu2 %v410_v26  ;;  %v312_v33 = vpop.xlane.xlu2 %311  ;;  %v651_v38 = vadd.f32 %v5196_v8, %v634_v28  ;;  %v618_v6 = vmul.f32 %v557_v5, %v5130_v51 }
 0x27d   :  { %v335_v14 = vmul.f32 %v5070_v60, %v312_v33  ;;  %v632_v55 = vmul.f32 %v5193_v2, %v615_v63  ;;  %v633_v49 = vmul.f32 %v5193_v2, %v616_v7  ;;  %v4528_v22 = vpop.eup %4527 }
 0x27e   :  { %v569_v62 = vmul.f32 %v4528_v22, %v5275_v24  ;;  %v635_v17 = vmul.f32 %v5193_v2, %v618_v6  ;;  %vm575_vm6 = vweird.f32 %v4528_v22 }
 0x27f   :  { %v5285_v30 = vsub.f32 %v5164_v16, %v335_v14  ;;  %v649_v42 = vadd.f32 %v5196_v8, %v632_v55  ;;  %v650_v56 = vadd.f32 %v5196_v8, %v633_v49  ;;  %vm576_vm10 = vmor %vm574_vm9, %vm575_vm6 }
 0x280   :  { %v570_v3 = vmul.f32 %v4528_v22, %v569_v62  ;;  %v652_v63 = vadd.f32 %v5196_v8, %v635_v17 }
 0x281   :  { %4214 = vmatmul.msk.f32.gmra.mxu2 %vm97_vm0, %v649_v42  ;;  %v367_v0 = vmul.f32 %v5285_v30, %v5285_v30 }
 0x282   :  { %v571_v10 = vmul.f32 0.5, %v570_v3 }
 0x283   :  { %v413_v47 = vsel %vm97_vm0, %v367_v0, 0.0 }
 0x284   :  { %414 = vadd.xlane.f32.xlu0 %v413_v47  ;;  %v403_v21 = vpop.xlane.xlu2 %402  ;;  %v572_v18 = vsub.f32 1.5, %v571_v10  ;;  %v5330_v47 = vld [vmem:[%s7472_s2] ss:$0 sm:$0xff] }
 0x285   :  { %v427_v54 = vmul.f32 %v403_v21, %v5070_v60 }
 0x286   :  { %v573_v23 = vmul.f32 %v4528_v22, %v572_v18 }
 0x287   :  { %v443_v4 = vadd.f32 1e-05, %v427_v54 }
 0x288   :  { %v577_v33 = vsel %vm576_vm10, %v4528_v22, %v573_v23 }
 0x289   :  { %4529 = vrsqrt.f32 %v443_v4  ;;  %4215 = vmatmul.msk.f32.gmra.mxu2 %vm97_vm0, %v650_v56  ;;  %vm564_vm7 = vweird.f32 %v443_v4  ;;  %v620_v55 = vmul.f32 %v577_v33, %v5137_v58 }
 0x28b   :  { %v637_v42 = vmul.f32 %v5193_v2, %v620_v55 }
 0x28d   :  { %v654_v7 = vadd.f32 %v5196_v8, %v637_v42 }
 0x28f   :  { %v4530_v1 = vpop.eup %4529 }
 0x290   :  { %v559_v12 = vmul.f32 %v4530_v1, %v443_v4  ;;  %vm565_vm5 = vweird.f32 %v4530_v1 }
 0x291   :  { %4216 = vmatmul.msk.f32.gmra.mxu2 %vm97_vm0, %v651_v38  ;;  %vm566_vm8 = vmor %vm564_vm7, %vm565_vm5  ;;  %vm1060_vm5 = vcmask 523264  }
 0x292   :  { %v560_v15 = vmul.f32 %v4530_v1, %v559_v12 }
 0x294   :  { %v561_v20 = vmul.f32 0.5, %v560_v15 }
 0x296   :  { %v562_v26 = vsub.f32 1.5, %v561_v20 }
 0x298   :  { %v563_v57 = vmul.f32 %v4530_v1, %v562_v26 }
 0x299   :  { %4217 = vmatmul.msk.f32.gmra.mxu2 %vm97_vm0, %v652_v63 }
 0x29a   :  { %v567_v51 = vsel %vm566_vm8, %v4530_v1, %v563_v57 }
 0x29b   :  { %v619_v9 = vmul.f32 %v567_v51, %v5170_v19 }
 0x29d   :  { %v636_v37 = vmul.f32 %v5193_v2, %v619_v9 }
 0x29f   :  { %v653_v14 = vadd.f32 %v5196_v8, %v636_v37 }
 0x2a1   :  { %4218 = vmatmul.msk.f32.gmra.mxu2 %vm97_vm0, %v653_v14 }
 0x2a9   :  { %4219 = vmatmul.msk.f32.gmra.mxu2 %vm97_vm0, %v654_v7 }
 0x2b4   :  { %v5323_v24 = vpop.f32.mrf.mxu2 }
 0x2bc   :  { %v734_v43 = vpop.f32.mrf.mxu2 }
 0x2bd   :  { %v5346_v4 = vadd.f32 %v5330_v47, %v734_v43 }
 0x2c4   :  { %v5325_v45 = vpop.f32.mrf.mxu2 }
 0x2cc   :  { %v740_v19 = vpop.f32.mrf.mxu2 }
 0x2d4   :  { %v743_v0 = vpop.f32.mrf.mxu2 }
 0x2d5   :  { %v5333_v49 = vadd.f32 %v5330_v47, %v743_v0 }
 0x2dc   :  { %v746_v58 = vpop.f32.mrf.mxu2 }
 0x2dd   :  { %v5336_v46 = vadd.f32 %v5330_v47, %v746_v58 }
 0x2df   :  { %829 = vrot.lane.b32.xlu0 %v5336_v46, %s4926_s7  ;;  %v4467_v21 = vpack.i.bf16 %v5333_v49, %v5336_v46 }
 0x2e7   :  { %v409_v53 = vpop.xlane.xlu1 %408  ;;  %827 = vrot.lane.b32.xlu0 %v5333_v49, %s4926_s7 }
 0x2e8   :  { %v429_v22 = vmul.f32 %v409_v53, %v5070_v60 }
 0x2ea   :  { %v445_v54 = vadd.f32 1e-05, %v429_v22 }
 0x2ec   :  { %4531 = vrsqrt.f32 %v445_v54  ;;  %vm584_vm12 = vweird.f32 %v445_v54 }
 0x2ef   :  { %v412_v56 = vpop.xlane.xlu2 %411  ;;  %821 = vrot.lane.b32.xlu0 %v5346_v4, %s4926_s7 }
 0x2f0   :  { %v430_v59 = vmul.f32 %v412_v56, %v5070_v60 }
 0x2f2   :  { %v4532_v41 = vpop.eup %4531  ;;  %v446_v62 = vadd.f32 1e-05, %v430_v59 }
 0x2f3   :  { %v579_v28 = vmul.f32 %v4532_v41, %v445_v54  ;;  %vm585_vm11 = vweird.f32 %v4532_v41 }
 0x2f4   :  { %4533 = vrsqrt.f32 %v446_v62  ;;  %vm586_vm13 = vmor %vm584_vm12, %vm585_vm11  ;;  %vm594_vm15 = vweird.f32 %v446_v62 }
 0x2f5   :  { %v580_v3 = vmul.f32 %v4532_v41, %v579_v28 }
 0x2f7   :  { %v581_v5 = vmul.f32 0.5, %v580_v3  ;;  %v415_v1 = vpop.xlane.xlu0 %414 }
 0x2f8   :  { %v431_v38 = vmul.f32 %v415_v1, %v5070_v60 }
 0x2f9   :  { %v582_v6 = vsub.f32 1.5, %v581_v5 }
 0x2fa   :  { %v4534_v10 = vpop.eup %4533  ;;  %v447_v12 = vadd.f32 1e-05, %v431_v38 }
 0x2fb   :  { %v583_v15 = vmul.f32 %v4532_v41, %v582_v6  ;;  %v589_v17 = vmul.f32 %v4534_v10, %v446_v62  ;;  %vm595_vm14 = vweird.f32 %v4534_v10 }
 0x2fc   :  { %4535 = vrsqrt.f32 %v447_v12  ;;  %v749_v18 = vpop.f32.mrf.mxu2  ;;  %vm596_vm1 = vmor %vm594_vm15, %vm595_vm14  ;;  %vm604_vm3 = vweird.f32 %v447_v12 }
 0x2fd   :  { %v590_v20 = vmul.f32 %v4534_v10, %v589_v17  ;;  %v5353_v26 = vadd.f32 %v5330_v47, %v749_v18  ;;  %v587_v63 = vsel %vm586_vm13, %v4532_v41, %v583_v15  ;;  %v5383_v41 = vadd.f32 %v5330_v47, %v5325_v45 }
 0x2fe   :  { %v621_v23 = vmul.f32 %v587_v63, %v5247_v35  ;;  %v5362_v35 = vadd.f32 %v5330_v47, %v740_v19 }
 0x2ff   :  { %v591_v57 = vmul.f32 0.5, %v590_v20  ;;  %831 = vrot.lane.b32.xlu2 %v5353_v26, %s4926_s7 }
 0x300   :  { %v638_v51 = vmul.f32 %v5193_v2, %v621_v23 }
 0x301   :  { %v592_v9 = vsub.f32 1.5, %v591_v57 }
 0x302   :  { %v4536_v33 = vpop.eup %4535  ;;  %v655_v37 = vadd.f32 %v5196_v8, %v638_v51  ;;  %v5418_v51 = vld [vmem:[%s7475_s5 + $0x20] sm:$0xff] }
 0x303   :  { %v593_v14 = vmul.f32 %v4534_v10, %v592_v9  ;;  %v599_v55 = vmul.f32 %v4536_v33, %v447_v12  ;;  %vm605_vm2 = vweird.f32 %v4536_v33 }
 0x304   :  { %v752_v42 = vpop.f32.mrf.mxu2  ;;  %4220 = vmatmul.msk.f32.gmra.mxu2 %vm97_vm0, %v655_v37  ;;  %vm606_vm4 = vmor %vm604_vm3, %vm605_vm2 }
 0x305   :  { %v600_v7 = vmul.f32 %v4536_v33, %v599_v55  ;;  %v5365_v43 = vadd.f32 %v5330_v47, %v752_v42  ;;  %v597_v0 = vsel %vm596_vm1, %v4534_v10, %v593_v14  ;;  %v5438_v42 = vld [vmem:[%s7475_s5 + $0x28] sm:$0xff] }
 0x306   :  { %v622_v58 = vmul.f32 %v597_v0, %v5264_v61  ;;  %v5379_v61 = vadd.f32 %v5330_v47, %v5323_v24 }
 0x307   :  { %v601_v53 = vmul.f32 0.5, %v600_v7  ;;  %833 = vrot.lane.b32.xlu1 %v5365_v43, %s4926_s7  ;;  %825 = vrot.lane.b32.xlu2 %v5362_v35, %s4926_s7  ;;  %v4462_v22 = vpack.i.bf16 %v5353_v26, %v5365_v43  ;;  %v780_v7 = vmul.f32 %v5346_v4, %v5438_v42 }
 0x308   :  { %v639_v19 = vmul.f32 %v5193_v2, %v622_v58  ;;  %v779_v37 = vmul.f32 %v5379_v61, %v5418_v51 }
 0x309   :  { %v602_v54 = vsub.f32 1.5, %v601_v53 }
 0x30a   :  { %v656_v56 = vadd.f32 %v5196_v8, %v639_v19 }
 0x30b   :  { %v603_v59 = vmul.f32 %v4536_v33, %v602_v54 }
 0x30c   :  { %4221 = vmatmul.msk.f32.gmra.mxu2 %vm97_vm0, %v656_v56  ;;  %v755_v24 = vpop.f32.mrf.mxu2  ;;  %v5476_v56 = vld [vmem:[%s7475_s5 + $0x38] sm:$0xff] }
 0x30d   :  { %v607_v62 = vsel %vm606_vm4, %v4536_v33, %v603_v59  ;;  %v5443_v0 = vadd.f32 %v5330_v47, %v755_v24  ;;  %v782_v59 = vmul.f32 %v5362_v35, %v5476_v56 }
 0x30e   :  { %v623_v28 = vmul.f32 %v607_v62, %v5285_v30 }
 0x30f   :  { %823 = vrot.lane.b32.xlu1 %v5383_v41, %s4926_s7  ;;  %819 = vrot.lane.b32.xlu2 %v5379_v61, %s4926_s7 }
 0x310   :  { %v640_v3 = vmul.f32 %v5193_v2, %v623_v28 }
 0x312   :  { %v657_v5 = vadd.f32 %v5196_v8, %v640_v3  ;;  %v4477_v3 = vpack.i.bf16 %v5379_v61, %v5346_v4 }
 0x314   :  { %4222 = vmatmul.msk.f32.gmra.mxu2 %vm97_vm0, %v657_v5  ;;  %v758_v1 = vpop.f32.mrf.mxu2  ;;  %v5501_v5 = vld [vmem:[%s7475_s5 + $0x48] sm:$0xff] }
 0x315   :  { %v5464_v54 = vadd.f32 %v5330_v47, %v758_v1  ;;  %v784_v24 = vmul.f32 %v5336_v46, %v5501_v5 }
 0x31c   :  { %v761_v38 = vpop.f32.mrf.mxu2 }
 0x31d   :  { %v5408_v23 = vadd.f32 %v5330_v47, %v761_v38  ;;  %v5512_v38 = vld [vmem:[%s7475_s5 + $0x50] sm:$0xff] }
 0x324   :  { %v764_v45 = vpop.f32.mrf.mxu2 }
 0x325   :  { %v5424_v14 = vadd.f32 %v5330_v47, %v764_v45  ;;  %v785_v45 = vmul.f32 %v5353_v26, %v5512_v38 }
 0x327   :  { %v4487_v53 = vpack.i.bf16 %v5408_v23, %v5424_v14 }
 0x32c   :  { %v767_v12 = vpop.f32.mrf.mxu2 }
 0x32d   :  { %v5446_v58 = vadd.f32 %v5330_v47, %v767_v12 }
 0x351   :  { %v830_v30 = vpop.permute.xlu0 %829 }
 0x359   :  { %v832_v10 = vpop.permute.xlu2 %831  ;;  %v828_v15 = vpop.permute.xlu0 %827 }
 0x361   :  { %v826_v17 = vpop.permute.xlu2 %825  ;;  %v822_v57 = vpop.permute.xlu0 %821 }
 0x369   :  { %v820_v9 = vpop.permute.xlu2 %819 }
 0x379   :  { %v834_v6 = vpop.permute.xlu1 %833 }
 0x37a   :  { %4223 = vmatpush.xpose.msk.msra.mxu3 %vm97_vm0, %v834_v6  ;;  %v5520_v6 = vld [vmem:[%s7475_s5 + $0x58] sm:$0xff] }
 0x37e   :  { %4224 = vmatpush.xpose.msk.msra.mxu3 %vm97_vm0, %v832_v10  ;;  %v5528_v10 = vld [vmem:[%s7475_s5 + $0x60] sm:$0xff] }
 0x37f   :  { %v787_v12 = vmul.f32 %v5379_v61, %v5528_v10 }
 0x381   :  { %v824_v18 = vpop.permute.xlu1 %823 }
 0x382   :  { %4225 = vmatpush.xpose.msk.msra.mxu3 %vm97_vm0, %v830_v30  ;;  %v786_v30 = vmul.f32 %v5365_v43, %v5520_v6 }
 0x386   :  { %4226 = vmatpush.xpose.msk.msra.mxu3 %vm97_vm0, %v828_v15  ;;  %v5536_v15 = vld [vmem:[%s7475_s5 + $0x68] sm:$0xff] }
 0x387   :  { %v770_v2 = vpop.f32.mrf.mxu2 }
 0x388   :  { %v5398_v8 = vadd.f32 %v5330_v47, %v770_v2  ;;  %v788_v2 = vmul.f32 %v5346_v4, %v5536_v15 }
 0x38a   :  { %4227 = vmatpush.xpose.msk.msra.mxu3 %vm97_vm0, %v826_v17  ;;  %1756 = vrot.lane.b32.xlu2 %v5398_v8, %s4926_s7  ;;  %v4482_v1 = vpack.i.bf16 %v5446_v58, %v5398_v8 }
 0x38e   :  { %4228 = vmatpush.xpose.msk.msra.mxu3 %vm97_vm0, %v824_v18  ;;  %v5544_v18 = vld [vmem:[%s7475_s5 + $0x70] sm:$0xff] }
 0x38f   :  { %v773_v20 = vpop.f32.mrf.mxu2 }
 0x390   :  { %v5405_v63 = vadd.f32 %v5330_v47, %v773_v20  ;;  %v789_v20 = vmul.f32 %v5383_v41, %v5544_v18 }
 0x392   :  { %1758 = vrot.lane.b32.xlu0 %v5405_v63, %s4926_s7  ;;  %4229 = vmatpush.xpose.msk.msra.mxu3 %vm97_vm0, %v822_v57  ;;  %v5552_v57 = vld [vmem:[%s7475_s5 + $0x78] sm:$0xff] }
 0x393   :  { %1750 = vrot.lane.b32.xlu2 %v5408_v23, %s4926_s7 }
 0x396   :  { %4230 = vmatpush.xpose.msk.msra.mxu3 %vm97_vm0, %v820_v9 }
 0x397   :  { %v776_v33 = vpop.f32.mrf.mxu2 }
 0x398   :  { %v5427_v55 = vadd.f32 %v5330_v47, %v776_v33  ;;  %v4472_v47 = vpack.i.bf16 %v5383_v41, %v5362_v35  ;;  %v790_v33 = vmul.f32 %v5362_v35, %v5552_v57 }
 0x399   :  { %4231 = vmatmul.msk.f32.vlgmr.msra.gmra.mxu3 %vm97_vm0, %v779_v37  ;;  %v5560_v37 = vld [vmem:[%s7475_s5 + $0x80] sm:$0xff] }
 0x39a   :  { %1760 = vrot.lane.b32.xlu1 %v5427_v55, %s4926_s7  ;;  %1752 = vrot.lane.b32.xlu0 %v5424_v14, %s4926_s7  ;;  %v4492_v62 = vpack.i.bf16 %v5405_v63, %v5427_v55 }
 0x39b   :  { %4463 = vrot.lane.b32.xlu2 %v4462_v22, %s4927_s9  ;;  %v5459_v22 = vld [vmem:[%s7475_s5 + $0x30] sm:$0xff] }
 0x39c   :  { %v781_v19 = vmul.f32 %v5383_v41, %v5459_v22  ;;  %v1708_v13 = vmul.f32 %v5408_v23, %v5459_v22  ;;  %v1709_v22 = vmul.f32 %v5424_v14, %v5476_v56 }
 0x3a1   :  { %4232 = vmatmul.msk.f32.gmra.mxu3 %vm97_vm0, %v780_v7 }
 0x3a2   :  { %1754 = vrot.lane.b32.xlu1 %v5446_v58, %s4926_s7  ;;  %1746 = vrot.lane.b32.xlu0 %v5443_v0, %s4926_s7 }
 0x3a3   :  { %4488 = vrot.lane.b32.xlu2 %v4487_v53, %s4927_s9 }
 0x3a9   :  { %4233 = vmatmul.msk.f32.gmra.mxu3 %vm97_vm0, %v781_v19  ;;  %v791_v19 = vmul.f32 %v5333_v49, %v5560_v37 }
 0x3aa   :  { %1748 = vrot.lane.b32.xlu1 %v5464_v54, %s4926_s7  ;;  %4468 = vrot.lane.b32.xlu0 %v4467_v21, %s4927_s9  ;;  %v5490_v21 = vld [vmem:[%s7475_s5 + $0x40] sm:$0xff] }
 0x3ab   :  { %v783_v28 = vmul.f32 %v5333_v49, %v5490_v21  ;;  %v1710_v56 = vmul.f32 %v5446_v58, %v5490_v21  ;;  %v1711_v21 = vmul.f32 %v5398_v8, %v5501_v5  ;;  %v1712_v5 = vmul.f32 %v5405_v63, %v5512_v38 }
 0x3ac   :  { %v1713_v38 = vmul.f32 %v5427_v55, %v5520_v6 }
 0x3b1   :  { %4234 = vmatmul.msk.f32.gmra.mxu3 %vm97_vm0, %v782_v59 }
 0x3b2   :  { %4473 = vrot.lane.b32.xlu1 %v4472_v47, %s4927_s9  ;;  %4493 = vrot.lane.b32.xlu0 %v4492_v62, %s4927_s9  ;;  %v5568_v47 = vld [vmem:[%s7475_s5 + $0x88] sm:$0xff] }
 0x3b3   :  { %v792_v62 = vmul.f32 %v5336_v46, %v5568_v47 }
 0x3b9   :  { %4235 = vmatmul.msk.f32.gmra.mxu3 %vm97_vm0, %v783_v28 }
 0x3ba   :  { %4478 = vrot.lane.b32.xlu1 %v4477_v3, %s4927_s9  ;;  %v5576_v3 = vld [vmem:[%s7475_s5 + $0x90] sm:$0xff] }
 0x3c1   :  { %4236 = vmatmul.msk.f32.gmra.mxu3 %vm97_vm0, %v784_v24  ;;  %v793_v24 = vmul.f32 %v5353_v26, %v5576_v3 }
 0x3c2   :  { %4483 = vrot.lane.b32.xlu1 %v4482_v1, %s4927_s9 }
 0x3c9   :  { %4237 = vmatmul.msk.f32.gmra.mxu3 %vm97_vm0, %v785_v45 }
 0x3d1   :  { %4238 = vmatmul.msk.f32.gmra.mxu3 %vm97_vm0, %v786_v30  ;;  %v5584_v30 = vld [vmem:[%s7475_s5 + $0x98] sm:$0xff] }
 0x3d9   :  { %4239 = vmatmul.msk.f32.gmra.mxu3 %vm97_vm0, %v787_v12  ;;  %v794_v12 = vmul.f32 %v5365_v43, %v5584_v30 }
 0x3e1   :  { %4240 = vmatmul.msk.f32.gmra.mxu3 %vm97_vm0, %v788_v2 }
 0x3e4   :  { %v1757_v17 = vpop.permute.xlu2 %1756 }
 0x3e9   :  { %4241 = vmatmul.msk.f32.gmra.mxu3 %vm97_vm0, %v789_v20 }
 0x3ed   :  { %v1751_v9 = vpop.permute.xlu2 %1750 }
 0x3f1   :  { %4242 = vmatmul.msk.f32.gmra.mxu3 %vm97_vm0, %v790_v33  ;;  %v5594_v33 = vld [vmem:[%s7475_s5 + $0xa0] sm:$0xff] }
 0x3f5   :  { %v4464_v7 = vpop.permute.xlu2 %4463 }
 0x3f6   :  { %v4465_v53 = vunpack.i.l.bf16 %v4464_v7  ;;  %v4466_v59 = vunpack.i.h.bf16 %v4464_v7  ;;  %v795_v7 = vmul.f32 %v5379_v61, %v5594_v33 }
 0x3f8   :  { %1541 = vmatpush.msrb.mxu0 %v4465_v53 }
 0x3f9   :  { %4243 = vmatmul.msk.f32.gmra.mxu3 %vm97_vm0, %v791_v19 }
 0x3fa   :  { %1542 = vmatpush.msrb.mxu0 %v4466_v59  ;;  %v5604_v59 = vld [vmem:[%s7475_s5 + $0xa8] sm:$0xff] }
 0x401   :  { %4244 = vmatmul.msk.f32.gmra.mxu3 %vm97_vm0, %v792_v62 }
 0x404   :  { %v1759_v28 = vpop.permute.xlu0 %1758 }
 0x409   :  { %4245 = vmatmul.msk.f32.gmra.mxu3 %vm97_vm0, %v793_v24  ;;  %v796_v24 = vmul.f32 %v5346_v4, %v5604_v59 }
 0x40c   :  { %v1761_v1 = vpop.permute.xlu1 %1760  ;;  %v1753_v45 = vpop.permute.xlu0 %1752 }
 0x40d   :  { %4295 = vmatpush.xpose.msk.msrb.mxu1 %vm97_vm0, %v1761_v1 }
 0x411   :  { %4246 = vmatmul.msk.f32.gmra.mxu3 %vm97_vm0, %v794_v12  ;;  %4296 = vmatpush.xpose.msk.msrb.mxu1 %vm97_vm0, %v1759_v28 }
 0x414   :  { %v1755_v2 = vpop.permute.xlu1 %1754  ;;  %v1747_v20 = vpop.permute.xlu0 %1746 }
 0x415   :  { %4297 = vmatpush.xpose.msk.msrb.mxu1 %vm97_vm0, %v1757_v17 }
 0x419   :  { %4247 = vmatmul.msk.f32.gmra.mxu3 %vm97_vm0, %v795_v7  ;;  %4298 = vmatpush.xpose.msk.msrb.mxu1 %vm97_vm0, %v1755_v2 }
 0x41c   :  { %v1749_v53 = vpop.permute.xlu1 %1748  ;;  %v4469_v19 = vpop.permute.xlu0 %4468 }
 0x41d   :  { %v5606_v62 = vpop.f32.mrf.mxu3  ;;  %4299 = vmatpush.xpose.msk.msrb.mxu1 %vm97_vm0, %v1753_v45  ;;  %v4470_v17 = vunpack.i.l.bf16 %v4469_v19  ;;  %v4471_v1 = vunpack.i.h.bf16 %v4469_v19  ;;  %v5618_v45 = vld [vmem:[%s7475_s5 + $0xb0] sm:$0xff] }
 0x41e   :  { %v1061_v28 = vsel %vm1060_vm5, %v5606_v62, -inf }
 0x41f   :  { %1062 = vmax.xlane.f32.xlu2 %v1061_v28  ;;  %1543 = vmatpush.msrb.mxu0 %v4470_v17 }
 0x421   :  { %4248 = vmatmul.msk.f32.gmra.mxu3 %vm97_vm0, %v796_v24  ;;  %1544 = vmatpush.msrb.mxu0 %v4471_v1 }
 0x422   :  { %4300 = vmatpush.xpose.msk.msrb.mxu1 %vm97_vm0, %v1751_v9  ;;  %v797_v9 = vmul.f32 %v5383_v41, %v5618_v45 }
 0x424   :  { %v4474_v12 = vpop.permute.xlu1 %4473  ;;  %v4494_v2 = vpop.permute.xlu0 %4493 }
 0x425   :  { %v4495_v7 = vunpack.i.l.bf16 %v4494_v2  ;;  %v5620_v16 = vpop.f32.mrf.mxu3  ;;  %v4475_v17 = vunpack.i.l.bf16 %v4474_v12  ;;  %v4476_v28 = vunpack.i.h.bf16 %v4474_v12  ;;  %v4496_v24 = vunpack.i.h.bf16 %v4494_v2 }
 0x426   :  { %4301 = vmatpush.xpose.msk.msrb.mxu1 %vm97_vm0, %v1749_v53  ;;  %v1064_v19 = vsel %vm1060_vm5, %v5620_v16, -inf  ;;  %v1706_v53 = vmul.f32 %v5443_v0, %v5418_v51 }
 0x427   :  { %1065 = vmax.xlane.f32.xlu1 %v1064_v19  ;;  %1545 = vmatpush.msrb.mxu0 %v4475_v17  ;;  %v5634_v17 = vld [vmem:[%s7475_s5 + $0xb8] sm:$0xff] }
 0x428   :  { %2467 = vmatpush.msrb.mxu2 %v4495_v7  ;;  %v1707_v7 = vmul.f32 %v5464_v54, %v5438_v42 }
 0x429   :  { %4249 = vmatmul.msk.f32.gmra.mxu3 %vm97_vm0, %v797_v9  ;;  %1546 = vmatpush.msrb.mxu0 %v4476_v28  ;;  %v5649_v28 = vld [vmem:[%s7475_s5 + $0xc0] sm:$0xff] }
 0x42a   :  { %4302 = vmatpush.xpose.msk.msrb.mxu1 %vm97_vm0, %v1747_v20  ;;  %2468 = vmatpush.msrb.mxu2 %v4496_v24  ;;  %v798_v20 = vmul.f32 %v5362_v35, %v5634_v17  ;;  %v799_v42 = vmul.f32 %v5333_v49, %v5649_v28 }
 0x42c   :  { %v4479_v1 = vpop.permute.xlu1 %4478 }
 0x42d   :  { %v5636_v19 = vpop.f32.mrf.mxu3  ;;  %4303 = vmatmul.msk.f32.vlgmr.msrb.gmra.mxu1 %vm97_vm0, %v1706_v53  ;;  %v4480_v12 = vunpack.i.l.bf16 %v4479_v1  ;;  %v4481_v51 = vunpack.i.h.bf16 %v4479_v1 }
 0x42e   :  { %v1067_v2 = vsel %vm1060_vm5, %v5636_v19, -inf }
 0x42f   :  { %1068 = vmax.xlane.f32.xlu0 %v1067_v2  ;;  %1547 = vmatpush.msrb.mxu0 %v4480_v12  ;;  %v4489_v12 = vpop.permute.xlu2 %4488 }
 0x431   :  { %4250 = vmatmul.msk.f32.gmra.mxu3 %vm97_vm0, %v798_v20  ;;  %1548 = vmatpush.msrb.mxu0 %v4481_v51  ;;  %v4490_v20 = vunpack.i.l.bf16 %v4489_v12  ;;  %v4491_v51 = vunpack.i.h.bf16 %v4489_v12 }
 0x434   :  { %v4484_v9 = vpop.permute.xlu1 %4483 }
 0x435   :  { %v4485_v24 = vunpack.i.l.bf16 %v4484_v9  ;;  %v5651_v53 = vpop.f32.mrf.mxu3  ;;  %4304 = vmatmul.msk.f32.gmra.mxu1 %vm97_vm0, %v1707_v7  ;;  %v4486_v2 = vunpack.i.h.bf16 %v4484_v9  ;;  %v5664_v7 = vld [vmem:[%s7475_s5 + $0xc8] sm:$0xff] }
 0x436   :  { %v1070_v1 = vsel %vm1060_vm5, %v5651_v53, -inf  ;;  %v800_v12 = vmul.f32 %v5336_v46, %v5664_v7 }
 0x437   :  { %1071 = vmax.xlane.f32.xlu2 %v1070_v1  ;;  %2469 = vmatpush.msrb.mxu2 %v4485_v24  ;;  %v5679_v1 = vld [vmem:[%s7475_s5 + $0xd0] sm:$0xff] }
 0x439   :  { %4251 = vmatmul.msk.f32.gmra.mxu3 %vm97_vm0, %v799_v42  ;;  %2470 = vmatpush.msrb.mxu2 %v4486_v2  ;;  %v801_v42 = vmul.f32 %v5353_v26, %v5679_v1 }
 0x43b   :  { %2471 = vmatpush.msrb.mxu2 %v4490_v20  ;;  %v5694_v20 = vld [vmem:[%s7475_s5 + $0xd8] sm:$0xff] }
 0x43d   :  { %v5666_v9 = vpop.f32.mrf.mxu3  ;;  %4305 = vmatmul.msk.f32.gmra.mxu1 %vm97_vm0, %v1708_v13  ;;  %2472 = vmatpush.msrb.mxu2 %v4491_v51 }
 0x43e   :  { %v1073_v24 = vsel %vm1060_vm5, %v5666_v9, -inf }
 0x43f   :  { %1074 = vmax.xlane.f32.xlu1 %v1073_v24 }
 0x441   :  { %4252 = vmatmul.msk.f32.gmra.mxu3 %vm97_vm0, %v800_v12  ;;  %v802_v12 = vmul.f32 %v5365_v43, %v5694_v20 }
 0x445   :  { %v5681_v2 = vpop.f32.mrf.mxu3  ;;  %4306 = vmatmul.msk.f32.gmra.mxu1 %vm97_vm0, %v1709_v22  ;;  %v5709_v22 = vld [vmem:[%s7475_s5 + $0xe0] sm:$0xff] }
 0x446   :  { %v1076_v13 = vsel %vm1060_vm5, %v5681_v2, -inf }
 0x447   :  { %1077 = vmax.xlane.f32.xlu0 %v1076_v13 }
 0x449   :  { %4253 = vmatmul.msk.f32.gmra.mxu3 %vm97_vm0, %v801_v42 }
 0x44d   :  { %v5696_v51 = vpop.f32.mrf.mxu3  ;;  %4307 = vmatmul.msk.f32.gmra.mxu1 %vm97_vm0, %v1710_v56  ;;  %v803_v56 = vmul.f32 %v5379_v61, %v5709_v22 }
 0x44e   :  { %v1079_v24 = vsel %vm1060_vm5, %v5696_v51, -inf }
 0x44f   :  { %1080 = vmax.xlane.f32.xlu1 %v1079_v24  ;;  %v5724_v24 = vld [vmem:[%s7475_s5 + $0xe8] sm:$0xff] }
 0x450   :  { %v804_v61 = vmul.f32 %v5346_v4, %v5724_v24  ;;  %v1714_v4 = vmul.f32 %v5443_v0, %v5528_v10 }
 0x451   :  { %4254 = vmatmul.msk.f32.gmra.mxu3 %vm97_vm0, %v802_v12 }
 0x455   :  { %v5711_v13 = vpop.f32.mrf.mxu3  ;;  %4308 = vmatmul.msk.f32.gmra.mxu1 %vm97_vm0, %v1711_v21 }
 0x456   :  { %v1082_v42 = vsel %vm1060_vm5, %v5711_v13, -inf }
 0x457   :  { %1083 = vmax.xlane.f32.xlu2 %v1082_v42  ;;  %v5739_v42 = vld [vmem:[%s7475_s5 + $0xf0] sm:$0xff] }
 0x458   :  { %v1732_v48 = vmul.f32 %v5408_v23, %v5739_v42 }
 0x459   :  { %4255 = vmatmul.msk.f32.gmra.mxu3 %vm97_vm0, %v803_v56  ;;  %v805_v56 = vmul.f32 %v5383_v41, %v5739_v42  ;;  %v1715_v41 = vmul.f32 %v5464_v54, %v5536_v15 }
 0x45d   :  { %v5726_v12 = vpop.f32.mrf.mxu3  ;;  %4309 = vmatmul.msk.f32.gmra.mxu1 %vm97_vm0, %v1712_v5  ;;  %v5750_v5 = vld [vmem:[%s7475_s5 + $0xf8] sm:$0xff] }
 0x45e   :  { %v1085_v21 = vsel %vm1060_vm5, %v5726_v12, -inf  ;;  %v806_v6 = vmul.f32 %v5362_v35, %v5750_v5  ;;  %v1716_v35 = vmul.f32 %v5408_v23, %v5544_v18 }
 0x45f   :  { %1086 = vmax.xlane.f32.xlu2 %v1085_v21  ;;  %v5761_v21 = vld [vmem:[%s7475_s5 + $0x100] sm:$0xff] }
 0x460   :  { %v807_v10 = vmul.f32 %v5333_v49, %v5761_v21  ;;  %v1717_v49 = vmul.f32 %v5424_v14, %v5552_v57 }
 0x461   :  { %4256 = vmatmul.msk.f32.gmra.mxu3 %vm97_vm0, %v804_v61  ;;  %v5772_v61 = vld [vmem:[%s7475_s5 + $0x108] sm:$0xff] }
 0x462   :  { %v808_v15 = vmul.f32 %v5336_v46, %v5772_v61  ;;  %v1718_v46 = vmul.f32 %v5446_v58, %v5560_v37  ;;  %v1720_v37 = vmul.f32 %v5405_v63, %v5576_v3 }
 0x465   :  { %4310 = vmatmul.msk.f32.gmra.mxu1 %vm97_vm0, %v1713_v38  ;;  %v5783_v38 = vld [vmem:[%s7475_s5 + $0x110] sm:$0xff] }
 0x466   :  { %v809_v18 = vmul.f32 %v5353_v26, %v5783_v38  ;;  %v1719_v26 = vmul.f32 %v5398_v8, %v5568_v47 }
 0x469   :  { %4257 = vmatmul.msk.f32.gmra.mxu3 %vm97_vm0, %v805_v56  ;;  %v5794_v56 = vld [vmem:[%s7475_s5 + $0x118] sm:$0xff] }
 0x46a   :  { %v810_v57 = vmul.f32 %v5365_v43, %v5794_v56 }
 0x46d   :  { %4311 = vmatmul.msk.f32.gmra.mxu1 %vm97_vm0, %v1714_v4  ;;  %v5806_v4 = vpop.f32.mrf.mxu3 }
 0x471   :  { %4258 = vmatmul.msk.f32.gmra.mxu3 %vm97_vm0, %v806_v6  ;;  %v1721_v6 = vmul.f32 %v5427_v55, %v5584_v30  ;;  %v1723_v30 = vmul.f32 %v5464_v54, %v5604_v59 }
 0x475   :  { %4312 = vmatmul.msk.f32.gmra.mxu1 %vm97_vm0, %v1715_v41  ;;  %v5811_v43 = vpop.f32.mrf.mxu3 }
 0x479   :  { %4259 = vmatmul.msk.f32.gmra.mxu3 %vm97_vm0, %v807_v10  ;;  %v1722_v10 = vmul.f32 %v5443_v0, %v5594_v33  ;;  %v1724_v33 = vmul.f32 %v5408_v23, %v5618_v45 }
 0x47d   :  { %4313 = vmatmul.msk.f32.gmra.mxu1 %vm97_vm0, %v1716_v35  ;;  %v5820_v3 = vpop.f32.mrf.mxu3 }
 0x481   :  { %4260 = vmatmul.msk.f32.gmra.mxu3 %vm97_vm0, %v808_v15 }
 0x485   :  { %4314 = vmatmul.msk.f32.gmra.mxu1 %vm97_vm0, %v1717_v49 }
 0x489   :  { %4261 = vmatmul.msk.f32.gmra.mxu3 %vm97_vm0, %v809_v18 }
 0x48d   :  { %4315 = vmatmul.msk.f32.gmra.mxu1 %vm97_vm0, %v1718_v46  ;;  %v1088_v46 = vsel %vm1060_vm5, %v5806_v4, -inf }
 0x491   :  { %4262 = vmatmul.msk.f32.gmra.mxu3 %vm97_vm0, %v810_v57  ;;  %v5837_v57 = vpop.f32.mrf.mxu3 }
 0x495   :  { %4316 = vmatmul.msk.f32.gmra.mxu1 %vm97_vm0, %v1719_v26  ;;  %v1725_v26 = vmul.f32 %v5424_v14, %v5634_v17 }
 0x49d   :  { %4317 = vmatmul.msk.f32.gmra.mxu1 %vm97_vm0, %v1720_v37  ;;  %v1091_v37 = vsel %vm1060_vm5, %v5811_v43, -inf }
 0x4a5   :  { %4318 = vmatmul.msk.f32.gmra.mxu1 %vm97_vm0, %v1721_v6  ;;  %v5849_v6 = vpop.f32.mrf.mxu3 }
 0x4aa   :  { %v5813_v41 = vpop.f32.mrf.mxu1 }
 0x4ab   :  { %v1987_v47 = vsel %vm1060_vm5, %v5813_v41, -inf }
 0x4ac   :  { %1988 = vmax.xlane.f32.xlu0 %v1987_v47  ;;  %v1063_v47 = vpop.xlane.xlu2 %1062 }
 0x4ad   :  { %4319 = vmatmul.msk.f32.gmra.mxu1 %vm97_vm0, %v1722_v10 }
 0x4b2   :  { %v5822_v35 = vpop.f32.mrf.mxu1 }
 0x4b3   :  { %v1990_v15 = vsel %vm1060_vm5, %v5822_v35, -inf }
 0x4b4   :  { %1991 = vmax.xlane.f32.xlu0 %v1990_v15  ;;  %v1094_v15 = vsel %vm1060_vm5, %v5820_v3, -inf }
 0x4b5   :  { %4320 = vmatmul.msk.f32.gmra.mxu1 %vm97_vm0, %v1723_v30  ;;  %v1726_v30 = vmul.f32 %v5446_v58, %v5649_v28  ;;  %v1727_v28 = vmul.f32 %v5398_v8, %v5664_v7 }
 0x4ba   :  { %v5829_v49 = vpop.f32.mrf.mxu1 }
 0x4bb   :  { %v1993_v18 = vsel %vm1060_vm5, %v5829_v49, -inf }
 0x4bc   :  { %1994 = vmax.xlane.f32.xlu2 %v1993_v18  ;;  %1089 = vmax.xlane.f32.xlu0 %v1088_v46  ;;  %v5860_v18 = vpop.f32.mrf.mxu3  ;;  %v1072_v46 = vpop.xlane.xlu2 %1071 }
 0x4bd   :  { %4321 = vmatmul.msk.f32.gmra.mxu1 %vm97_vm0, %v1724_v33  ;;  %v1069_v33 = vpop.xlane.xlu0 %1068 }
 0x4c2   :  { %v5840_v59 = vpop.f32.mrf.mxu1 }
 0x4c3   :  { %v1996_v45 = vsel %vm1060_vm5, %v5840_v59, -inf }
 0x4c4   :  { %1997 = vmax.xlane.f32.xlu0 %v1996_v45  ;;  %1092 = vmax.xlane.f32.xlu2 %v1091_v37  ;;  %v1160_v37 = vsub.f32 %v5651_v53, %v1072_v46  ;;  %v1728_v53 = vmul.f32 %v5405_v63, %v5679_v1 }
 0x4c5   :  { %4322 = vmatmul.msk.f32.gmra.mxu1 %vm97_vm0, %v1725_v26  ;;  %v1159_v26 = vsub.f32 %v5636_v19, %v1069_v33  ;;  %v1157_v19 = vsub.f32 %v5606_v62, %v1063_v47  ;;  %v5874_v33 = vpop.f32.mrf.mxu3  ;;  %v1103_v62 = vsel %vm1060_vm5, %v5860_v18, -inf }
 0x4c7   :  { %v1189_v47 = vmul.f32 1.442695, %v1157_v19 }
 0x4ca   :  { %v5851_v10 = vpop.f32.mrf.mxu1 }
 0x4cb   :  { %v1999_v17 = vsel %vm1060_vm5, %v5851_v10, -inf }
 0x4cc   :  { %2000 = vmax.xlane.f32.xlu0 %v1999_v17  ;;  %1095 = vmax.xlane.f32.xlu2 %v1094_v15  ;;  %v1097_v17 = vsel %vm1060_vm5, %v5837_v57, -inf  ;;  %v1195_v15 = vmul.f32 1.442695, %v1160_v37 }
 0x4cd   :  { %4323 = vmatmul.msk.f32.gmra.mxu1 %vm97_vm0, %v1726_v30  ;;  %v1193_v30 = vmul.f32 1.442695, %v1159_v26  ;;  %v1066_v26 = vpop.xlane.xlu1 %1065  ;;  %v5900_v19 = vpop.f32.mrf.mxu3 }
 0x4ce   :  { %v1158_v37 = vsub.f32 %v5620_v16, %v1066_v26  ;;  %v1730_v26 = vmul.f32 %v5443_v0, %v5709_v22  ;;  %v4497_v22 = vpack.i.bf16 %v5443_v0, %v5464_v54 }
 0x4cf   :  { %4537 = vpow2.f32 %v1193_v30  ;;  %v1729_v30 = vmul.f32 %v5427_v55, %v5694_v20 }
 0x4d0   :  { %4539 = vpow2.f32 %v1195_v15  ;;  %v1191_v16 = vmul.f32 1.442695, %v1158_v37 }
 0x4d1   :  { %4541 = vpow2.f32 %v1189_v47  ;;  %v1109_v47 = vsel %vm1060_vm5, %v5900_v19, -inf }
 0x4d2   :  { %v5863_v45 = vpop.f32.mrf.mxu1  ;;  %4543 = vpow2.f32 %v1191_v16  ;;  %v1731_v16 = vmul.f32 %v5464_v54, %v5724_v24 }
 0x4d3   :  { %v2002_v11 = vsel %vm1060_vm5, %v5863_v45, -inf }
 0x4d4   :  { %2003 = vmax.xlane.f32.xlu0 %v2002_v11  ;;  %1098 = vmax.xlane.f32.xlu2 %v1097_v17  ;;  %v1100_v11 = vsel %vm1060_vm5, %v5849_v6, -inf }
 0x4d5   :  { %4324 = vmatmul.msk.f32.gmra.mxu1 %vm97_vm0, %v1727_v28  ;;  %v5887_v28 = vpop.eup %4537  ;;  %v1075_v23 = vpop.xlane.xlu1 %1074 }
 0x4d6   :  { %v5889_v1 = vpop.eup %4539 }
 0x4da   :  { %v5876_v7 = vpop.f32.mrf.mxu1 }
 0x4db   :  { %v2005_v46 = vsel %vm1060_vm5, %v5876_v7, -inf }
 0x4dc   :  { %2006 = vmax.xlane.f32.xlu1 %v2005_v46  ;;  %1101 = vmax.xlane.f32.xlu2 %v1100_v11  ;;  %v1262_v46 = vsel %vm1060_vm5, %v5889_v1, 0.0  ;;  %v5905_v11 = vpop.eup %4541 }
 0x4dd   :  { %1104 = vmax.xlane.f32.xlu0 %v1103_v62  ;;  %4325 = vmatmul.msk.f32.gmra.mxu1 %vm97_vm0, %v1728_v53  ;;  %v1259_v53 = vsel %vm1060_vm5, %v5887_v28, 0.0  ;;  %v1253_v62 = vsel %vm1060_vm5, %v5905_v11, 0.0  ;;  %v5918_v37 = vpop.eup %4543 }
 0x4e2   :  { %v5892_v17 = vpop.f32.mrf.mxu1 }
 0x4e3   :  { %v2008_v15 = vsel %vm1060_vm5, %v5892_v17, -inf }
 0x4e4   :  { %2009 = vmax.xlane.f32.xlu1 %v2008_v15  ;;  %1260 = vadd.xlane.f32.xlu2 %v1259_v53  ;;  %v1256_v53 = vsel %vm1060_vm5, %v5918_v37, 0.0 }
 0x4e5   :  { %1263 = vadd.xlane.f32.xlu0 %v1262_v46  ;;  %4326 = vmatmul.msk.f32.gmra.mxu1 %vm97_vm0, %v1729_v30  ;;  %v5916_v30 = vpop.f32.mrf.mxu3 }
 0x4e6   :  { %v1112_v46 = vsel %vm1060_vm5, %v5916_v30, -inf }
 0x4ea   :  { %v5907_v20 = vpop.f32.mrf.mxu1 }
 0x4ec   :  { %1254 = vadd.xlane.f32.xlu1 %v1253_v62  ;;  %1110 = vmax.xlane.f32.xlu2 %v1109_v47 }
 0x4ed   :  { %4327 = vmatmul.msk.f32.gmra.mxu1 %vm97_vm0, %v1730_v26  ;;  %v5931_v62 = vpop.f32.mrf.mxu3  ;;  %v2011_v26 = vsel %vm1060_vm5, %v5907_v20, -inf }
 0x4f2   :  { %v5920_v15 = vpop.f32.mrf.mxu1 }
 0x4f3   :  { %v2014_v0 = vsel %vm1060_vm5, %v5920_v15, -inf }
 0x4f4   :  { %1257 = vadd.xlane.f32.xlu1 %v1256_v53  ;;  %1113 = vmax.xlane.f32.xlu2 %v1112_v46  ;;  %v1733_v46 = vmul.f32 %v5424_v14, %v5750_v5  ;;  %v1115_v5 = vsel %vm1060_vm5, %v5931_v62, -inf }
 0x4f5   :  { %4328 = vmatmul.msk.f32.gmra.mxu1 %vm97_vm0, %v1731_v16  ;;  %v5941_v24 = vpop.f32.mrf.mxu3 }
 0x4f9   :  { %4498 = vrot.lane.b32.xlu0 %v4497_v22, %s4927_s9  ;;  %v1118_v22 = vsel %vm1060_vm5, %v5941_v24, -inf }
 0x4fa   :  { %v5934_v47 = vpop.f32.mrf.mxu1 }
 0x4fb   :  { %v2017_v16 = vsel %vm1060_vm5, %v5934_v47, -inf }
 0x4fc   :  { %2012 = vmax.xlane.f32.xlu1 %v2011_v26  ;;  %v1734_v26 = vmul.f32 %v5446_v58, %v5761_v21  ;;  %v1078_v58 = vpop.xlane.xlu0 %1077 }
 0x4fd   :  { %4329 = vmatmul.msk.f32.gmra.mxu1 %vm97_vm0, %v1732_v48  ;;  %v1161_v48 = vsub.f32 %v5666_v9, %v1075_v23  ;;  %v5961_v44 = vpop.f32.mrf.mxu3  ;;  %v1162_v23 = vsub.f32 %v5681_v2, %v1078_v58  ;;  %v1737_v58 = vmul.f32 %v5427_v55, %v5794_v56 }
 0x4ff   :  { %v1197_v14 = vmul.f32 1.442695, %v1161_v48 }
 0x501   :  { %4545 = vpow2.f32 %v1197_v14 }
 0x502   :  { %v5943_v53 = vpop.f32.mrf.mxu1 }
 0x503   :  { %v2020_v54 = vsel %vm1060_vm5, %v5943_v53, -inf }
 0x504   :  { %2015 = vmax.xlane.f32.xlu1 %v2014_v0  ;;  %2021 = vmax.xlane.f32.xlu2 %v2020_v54  ;;  %v1735_v0 = vmul.f32 %v5398_v8, %v5772_v61  ;;  %v1084_v54 = vpop.xlane.xlu2 %1083  ;;  %v1736_v61 = vmul.f32 %v5405_v63, %v5783_v38 }
 0x505   :  { %4330 = vmatmul.msk.f32.gmra.mxu1 %vm97_vm0, %v1733_v46  ;;  %v5971_v21 = vpop.f32.mrf.mxu3  ;;  %v1164_v48 = vsub.f32 %v5711_v13, %v1084_v54  ;;  %v1081_v54 = vpop.xlane.xlu1 %1080 }
 0x507   :  { %v5973_v46 = vpop.eup %4545  ;;  %v1203_v14 = vmul.f32 1.442695, %v1164_v48 }
 0x50a   :  { %v5953_v42 = vpop.f32.mrf.mxu1 }
 0x50b   :  { %v2023_v55 = vsel %vm1060_vm5, %v5953_v42, -inf }
 0x50c   :  { %2018 = vmax.xlane.f32.xlu1 %v2017_v16  ;;  %1119 = vmax.xlane.f32.xlu2 %v1118_v22  ;;  %v1265_v22 = vsel %vm1060_vm5, %v5973_v46, 0.0  ;;  %v1087_v48 = vpop.xlane.xlu2 %1086 }
 0x50d   :  { %4331 = vmatmul.msk.f32.gmra.mxu1 %vm97_vm0, %v1734_v26  ;;  %v1199_v26 = vmul.f32 1.442695, %v1162_v23 }
 0x50f   :  { %4547 = vpow2.f32 %v1199_v26  ;;  %v1165_v26 = vsub.f32 %v5726_v12, %v1087_v48 }
 0x510   :  { %4549 = vpow2.f32 %v1203_v14 }
 0x512   :  { %v5964_v9 = vpop.f32.mrf.mxu1 }
 0x513   :  { %v2026_v63 = vsel %vm1060_vm5, %v5964_v9, -inf }
 0x514   :  { %1116 = vmax.xlane.f32.xlu1 %v1115_v5  ;;  %v5986_v5 = vpop.f32.mrf.mxu3 }
 0x515   :  { %4332 = vmatmul.msk.f32.gmra.mxu1 %vm97_vm0, %v1735_v0  ;;  %v1106_v0 = vsel %vm1060_vm5, %v5874_v33, -inf  ;;  %v1127_v38 = vsel %vm1060_vm5, %v5986_v5, -inf }
 0x51a   :  { %v5977_v16 = vpop.f32.mrf.mxu1 }
 0x51b   :  { %v2029_v8 = vsel %vm1060_vm5, %v5977_v16, -inf }
 0x51c   :  { %1266 = vadd.xlane.f32.xlu1 %v1265_v22  ;;  %2030 = vmax.xlane.f32.xlu2 %v2029_v8 }
 0x51d   :  { %4333 = vmatmul.msk.f32.gmra.mxu1 %vm97_vm0, %v1736_v61  ;;  %v1163_v61 = vsub.f32 %v5696_v51, %v1081_v54 }
 0x51f   :  { %v1989_v2 = vpop.xlane.xlu0 %1988 }
 0x520   :  { %v2083_v13 = vsub.f32 %v5813_v41, %v1989_v2  ;;  %v5998_v41 = vpop.eup %4547  ;;  %v1201_v2 = vmul.f32 1.442695, %v1163_v61 }
 0x521   :  { %v6000_v8 = vpop.eup %4549  ;;  %v1268_v56 = vsel %vm1060_vm5, %v5998_v41, 0.0 }
 0x522   :  { %v2115_v23 = vmul.f32 1.442695, %v2083_v13  ;;  %v1274_v14 = vsel %vm1060_vm5, %v6000_v8, 0.0  ;;  %v1205_v13 = vmul.f32 1.442695, %v1165_v26 }
 0x523   :  { %1107 = vmax.xlane.f32.xlu0 %v1106_v0 }
 0x524   :  { %2027 = vmax.xlane.f32.xlu1 %v2026_v63  ;;  %1128 = vmax.xlane.f32.xlu2 %v1127_v38  ;;  %4551 = vpow2.f32 %v2115_v23  ;;  %v1121_v38 = vsel %vm1060_vm5, %v5961_v44, -inf  ;;  %v6019_v23 = vpop.f32.mrf.mxu1 }
 0x525   :  { %4334 = vmatmul.msk.f32.gmra.mxu1 %vm97_vm0, %v1737_v58  ;;  %4553 = vpow2.f32 %v1201_v2  ;;  %v1124_v58 = vsel %vm1060_vm5, %v5971_v21, -inf  ;;  %v2032_v2 = vsel %vm1060_vm5, %v6019_v23, -inf }
 0x526   :  { %4555 = vpow2.f32 %v1205_v13 }
 0x527   :  { %v1992_v22 = vpop.xlane.xlu0 %1991 }
 0x52a   :  { %v6010_v51 = vpop.eup %4551 }
 0x52b   :  { %2024 = vmax.xlane.f32.xlu0 %v2023_v55  ;;  %v2179_v54 = vsel %vm1060_vm5, %v6010_v51, 0.0  ;;  %v6021_v61 = vpop.eup %4553 }
 0x52c   :  { %1269 = vadd.xlane.f32.xlu1 %v1268_v56  ;;  %1275 = vadd.xlane.f32.xlu2 %v1274_v14  ;;  %v2084_v56 = vsub.f32 %v5822_v35, %v1992_v22  ;;  %v1271_v13 = vsel %vm1060_vm5, %v6021_v61, 0.0 }
 0x52f   :  { %v1995_v0 = vpop.xlane.xlu2 %1994  ;;  %v1090_v63 = vpop.xlane.xlu0 %1089 }
 0x530   :  { %v1166_v12 = vsub.f32 %v5806_v4, %v1090_v63  ;;  %v6023_v4 = vpop.eup %4555 }
 0x531   :  { %v1277_v63 = vsel %vm1060_vm5, %v6023_v4, 0.0 }
 0x532   :  { %v1207_v48 = vmul.f32 1.442695, %v1166_v12  ;;  %v2117_v12 = vmul.f32 1.442695, %v2084_v56 }
 0x533   :  { %1122 = vmax.xlane.f32.xlu0 %v1121_v38  ;;  %v6033_v38 = vpop.f32.mrf.mxu3 }
 0x534   :  { %1125 = vmax.xlane.f32.xlu1 %v1124_v58  ;;  %2180 = vadd.xlane.f32.xlu2 %v2179_v54  ;;  %4557 = vpow2.f32 %v1207_v48  ;;  %v1130_v56 = vsel %vm1060_vm5, %v6033_v38, -inf }
 0x535   :  { %4559 = vpow2.f32 %v2117_v12 }
 0x537   :  { %v1998_v26 = vpop.xlane.xlu0 %1997  ;;  %v1093_v55 = vpop.xlane.xlu2 %1092 }
 0x538   :  { %v1167_v14 = vsub.f32 %v5811_v43, %v1093_v55  ;;  %v6037_v43 = vpop.f32.mrf.mxu1  ;;  %v2085_v55 = vsub.f32 %v5829_v49, %v1995_v0 }
 0x53a   :  { %v1209_v58 = vmul.f32 1.442695, %v1167_v14  ;;  %v6035_v54 = vpop.eup %4557  ;;  %v2035_v14 = vsel %vm1060_vm5, %v6037_v43, -inf }
 0x53b   :  { %2033 = vmax.xlane.f32.xlu0 %v2032_v2  ;;  %v6048_v49 = vpop.eup %4559 }
 0x53c   :  { %1272 = vadd.xlane.f32.xlu1 %v1271_v13  ;;  %1278 = vadd.xlane.f32.xlu2 %v1277_v63  ;;  %4561 = vpow2.f32 %v1209_v58  ;;  %v1280_v63 = vsel %vm1060_vm5, %v6035_v54, 0.0 }
 0x53f   :  { %v2001_v35 = vpop.xlane.xlu0 %2000  ;;  %v1096_v22 = vpop.xlane.xlu2 %1095 }
 0x540   :  { %v2087_v48 = vsub.f32 %v5851_v10, %v2001_v35  ;;  %v1168_v13 = vsub.f32 %v5820_v3, %v1096_v22  ;;  %v2119_v10 = vmul.f32 1.442695, %v2085_v55  ;;  %v2086_v22 = vsub.f32 %v5840_v59, %v1998_v26  ;;  %v6064_v59 = vpop.f32.mrf.mxu1 }
 0x542   :  { %v2123_v2 = vmul.f32 1.442695, %v2087_v48  ;;  %v1211_v12 = vmul.f32 1.442695, %v1168_v13  ;;  %v6050_v58 = vpop.eup %4561 }
 0x543   :  { %1131 = vmax.xlane.f32.xlu0 %v1130_v56  ;;  %v1283_v55 = vsel %vm1060_vm5, %v6050_v58, 0.0 }
 0x544   :  { %4563 = vpow2.f32 %v2123_v2  ;;  %2036 = vmax.xlane.f32.xlu1 %v2035_v14  ;;  %1281 = vadd.xlane.f32.xlu2 %v1280_v63  ;;  %v2182_v2 = vsel %vm1060_vm5, %v6048_v49, 0.0 }
 0x545   :  { %4565 = vpow2.f32 %v2119_v10 }
 0x546   :  { %4567 = vpow2.f32 %v1211_v12 }
 0x547   :  { %v1099_v0 = vpop.xlane.xlu2 %1098  ;;  %v2004_v56 = vpop.xlane.xlu0 %2003 }
 0x548   :  { %v1169_v3 = vsub.f32 %v5837_v57, %v1099_v0  ;;  %v2121_v57 = vmul.f32 1.442695, %v2086_v22  ;;  %v2088_v40 = vsub.f32 %v5863_v45, %v2004_v56 }
 0x54a   :  { %v6053_v35 = vpop.eup %4563  ;;  %v1213_v48 = vmul.f32 1.442695, %v1169_v3 }
 0x54b   :  { %v2191_v13 = vsel %vm1060_vm5, %v6053_v35, 0.0  ;;  %v6062_v14 = vpop.eup %4565 }
 0x54c   :  { %2183 = vadd.xlane.f32.xlu1 %v2182_v2  ;;  %1284 = vadd.xlane.f32.xlu2 %v1283_v55  ;;  %4569 = vpow2.f32 %v1213_v48  ;;  %v6066_v63 = vpop.eup %4567  ;;  %v2185_v0 = vsel %vm1060_vm5, %v6062_v14, 0.0 }
 0x54d   :  { %2192 = vadd.xlane.f32.xlu0 %v2191_v13  ;;  %4571 = vpow2.f32 %v2121_v57  ;;  %v1286_v3 = vsel %vm1060_vm5, %v6066_v63, 0.0 }
 0x54f   :  { %v2007_v26 = vpop.xlane.xlu1 %2006  ;;  %v1102_v2 = vpop.xlane.xlu2 %1101 }
 0x550   :  { %v2089_v10 = vsub.f32 %v5876_v7, %v2007_v26  ;;  %v1105_v55 = vpop.xlane.xlu0 %1104  ;;  %v6080_v26 = vpop.f32.mrf.mxu1 }
 0x552   :  { %v6069_v12 = vpop.eup %4569  ;;  %v2127_v48 = vmul.f32 1.442695, %v2089_v10  ;;  %v2038_v10 = vsel %vm1060_vm5, %v6064_v59, -inf }
 0x553   :  { %v1289_v22 = vsel %vm1060_vm5, %v6069_v12, 0.0  ;;  %v6077_v57 = vpop.eup %4571 }
 0x554   :  { %2186 = vadd.xlane.f32.xlu1 %v2185_v0  ;;  %1287 = vadd.xlane.f32.xlu2 %v1286_v3  ;;  %4573 = vpow2.f32 %v2127_v48  ;;  %v1171_v0 = vsub.f32 %v5860_v18, %v1105_v55  ;;  %v2188_v34 = vsel %vm1060_vm5, %v6077_v57, 0.0  ;;  %v6092_v18 = vpop.f32.mrf.mxu3 }
 0x555   :  { %1290 = vadd.xlane.f32.xlu0 %v1289_v22  ;;  %v2125_v22 = vmul.f32 1.442695, %v2088_v40 }
 0x557   :  { %v2010_v13 = vpop.xlane.xlu1 %2009  ;;  %v1261_v48 = vpop.xlane.xlu2 %1260 }
 0x558   :  { %v2090_v7 = vsub.f32 %v5892_v17, %v2010_v13  ;;  %v2041_v17 = vsel %vm1060_vm5, %v6080_v26, -inf  ;;  %v1217_v13 = vmul.f32 1.442695, %v1171_v0  ;;  %v1133_v0 = vsel %vm1060_vm5, %v6092_v18, -inf }
 0x55a   :  { %v2129_v3 = vmul.f32 1.442695, %v2090_v7  ;;  %v6090_v56 = vpop.eup %4573  ;;  %v1170_v7 = vsub.f32 %v5849_v6, %v1102_v2 }
 0x55c   :  { %4575 = vpow2.f32 %v2129_v3  ;;  %2189 = vadd.xlane.f32.xlu1 %v2188_v34  ;;  %2039 = vmax.xlane.f32.xlu2 %v2038_v10  ;;  %v1264_v34 = vpop.xlane.xlu0 %1263  ;;  %v2197_v3 = vsel %vm1060_vm5, %v6090_v56, 0.0 }
 0x55d   :  { %2042 = vmax.xlane.f32.xlu0 %v2041_v17  ;;  %v1215_v17 = vmul.f32 1.442695, %v1170_v7 }
 0x55f   :  { %v1255_v45 = vpop.xlane.xlu1 %1254 }
 0x560   :  { %4577 = vrcp.f32 %v1255_v45 }
 0x561   :  { %4579 = vpow2.f32 %v2125_v22 }
 0x562   :  { %v6094_v55 = vpop.eup %4575  ;;  %4581 = vpow2.f32 %v1217_v13  ;;  %v1111_v13 = vpop.xlane.xlu2 %1110 }
 0x563   :  { %v2200_v40 = vsel %vm1060_vm5, %v6094_v55, 0.0 }
 0x564   :  { %2198 = vadd.xlane.f32.xlu2 %v2197_v3  ;;  %1134 = vmax.xlane.f32.xlu1 %v1133_v0 }
 0x565   :  { %2201 = vadd.xlane.f32.xlu0 %v2200_v40 }
 0x566   :  { %v4578_v10 = vpop.eup %4577 }
 0x567   :  { %v6103_v22 = vpop.eup %4579  ;;  %v1258_v45 = vpop.xlane.xlu1 %1257  ;;  %v1381_v6 = vmul.f32 %v4578_v10, %v5905_v11 }
 0x568   :  { %v6106_v2 = vpop.eup %4581  ;;  %4583 = vrcp.f32 %v1258_v45  ;;  %v2194_v40 = vsel %vm1060_vm5, %v6103_v22, 0.0 }
 0x569   :  { %4263 = vmatmul.msk.f32.vlgmr.msrb.gmra.mxu0 %vm1060_vm5, %v1381_v6  ;;  %4585 = vpow2.f32 %v1215_v17  ;;  %v1295_v3 = vsel %vm1060_vm5, %v6106_v2, 0.0  ;;  %v6116_v17 = vpop.f32.mrf.mxu3 }
 0x56a   :  { %4587 = vrcp.f32 %v1261_v48  ;;  %v1136_v48 = vsel %vm1060_vm5, %v6116_v17, -inf }
 0x56b   :  { %v4499_v31 = vpop.permute.xlu0 %4498  ;;  %4589 = vrcp.f32 %v1264_v34 }
 0x56c   :  { %v4500_v7 = vunpack.i.l.bf16 %v4499_v31  ;;  %1296 = vadd.xlane.f32.xlu2 %v1295_v3  ;;  %2195 = vadd.xlane.f32.xlu1 %v2194_v40  ;;  %v4501_v11 = vunpack.i.h.bf16 %v4499_v31  ;;  %v1114_v40 = vpop.xlane.xlu2 %1113 }
 0x56e   :  { %v4584_v0 = vpop.eup %4583  ;;  %2473 = vmatpush.msrb.mxu2 %v4500_v7 }
 0x56f   :  { %v2013_v10 = vpop.xlane.xlu1 %2012  ;;  %v1382_v45 = vmul.f32 %v4584_v0, %v5918_v37  ;;  %v6114_v6 = vpop.eup %4585 }
 0x570   :  { %2474 = vmatpush.msrb.mxu2 %v4501_v11  ;;  %v2091_v52 = vsub.f32 %v5907_v20, %v2013_v10  ;;  %v1292_v3 = vsel %vm1060_vm5, %v6114_v6, 0.0  ;;  %v4588_v31 = vpop.eup %4587  ;;  %v6125_v11 = vpop.f32.mrf.mxu1  ;;  %v1173_v20 = vsub.f32 %v5900_v19, %v1111_v13  ;;  %v1174_v10 = vsub.f32 %v5916_v30, %v1114_v40 }
 0x571   :  { %4264 = vmatmul.msk.f32.gmra.mxu0 %vm1060_vm5, %v1382_v45  ;;  %v1383_v0 = vmul.f32 %v4588_v31, %v5887_v28  ;;  %v4590_v34 = vpop.eup %4589  ;;  %v6145_v40 = vpop.f32.mrf.mxu3 }
 0x572   :  { %v2131_v37 = vmul.f32 1.442695, %v2091_v52  ;;  %v1221_v52 = vmul.f32 1.442695, %v1173_v20 }
 0x574   :  { %1293 = vadd.xlane.f32.xlu1 %v1292_v3  ;;  %1137 = vmax.xlane.f32.xlu2 %v1136_v48  ;;  %4591 = vpow2.f32 %v2131_v37  ;;  %v2044_v3 = vsel %vm1060_vm5, %v6125_v11, -inf  ;;  %v1223_v48 = vmul.f32 1.442695, %v1174_v10 }
 0x577   :  { %v2016_v7 = vpop.xlane.xlu1 %2015  ;;  %v2022_v28 = vpop.xlane.xlu2 %2021 }
 0x578   :  { %v2092_v45 = vsub.f32 %v5920_v15, %v2016_v7  ;;  %v1384_v15 = vmul.f32 %v4590_v34, %v5889_v1 }
 0x579   :  { %4265 = vmatmul.msk.f32.gmra.mxu0 %vm1060_vm5, %v1383_v0 }
 0x57a   :  { %v2133_v50 = vmul.f32 1.442695, %v2092_v45  ;;  %v6136_v19 = vpop.eup %4591  ;;  %v2094_v45 = vsub.f32 %v5943_v53, %v2022_v28 }
 0x57b   :  { %v2203_v13 = vsel %vm1060_vm5, %v6136_v19, 0.0 }
 0x57c   :  { %4593 = vpow2.f32 %v2133_v50  ;;  %2045 = vmax.xlane.f32.xlu1 %v2044_v3  ;;  %v2137_v3 = vmul.f32 1.442695, %v2094_v45 }
 0x57d   :  { %4595 = vpow2.f32 %v1221_v52 }
 0x57e   :  { %4597 = vpow2.f32 %v1223_v48  ;;  %v6158_v48 = vpop.f32.mrf.mxu3 }
 0x57f   :  { %v6133_v31 = vpop.xlane.xlu1 %2018  ;;  %v1120_v1 = vpop.xlane.xlu2 %1119  ;;  %v1142_v28 = vsel %vm1060_vm5, %v6158_v48, -inf }
 0x581   :  { %4266 = vmatmul.msk.f32.gmra.mxu0 %vm1060_vm5, %v1384_v15  ;;  %v6160_v15 = vpop.f32.mrf.mxu1 }
 0x582   :  { %v6139_v30 = vpop.eup %4593  ;;  %v2047_v53 = vsel %vm1060_vm5, %v6160_v15, -inf }
 0x583   :  { %v2206_v50 = vsel %vm1060_vm5, %v6139_v30, 0.0  ;;  %v6147_v37 = vpop.eup %4595 }
 0x584   :  { %2204 = vadd.xlane.f32.xlu1 %v2203_v13  ;;  %2207 = vadd.xlane.f32.xlu2 %v2206_v50  ;;  %v6151_v0 = vpop.eup %4597  ;;  %v1301_v20 = vsel %vm1060_vm5, %v6147_v37, 0.0  ;;  %v1176_v13 = vsub.f32 %v5941_v24, %v1120_v1 }
 0x585   :  { %v1304_v10 = vsel %vm1060_vm5, %v6151_v0, 0.0 }
 0x586   :  { %v1227_v45 = vmul.f32 1.442695, %v1176_v13 }
 0x587   :  { %v6149_v7 = vpop.xlane.xlu1 %1116 }
 0x589   :  { %v6176_v13 = vpop.f32.mrf.mxu1 }
 0x58c   :  { %1302 = vadd.xlane.f32.xlu1 %v1301_v20  ;;  %1305 = vadd.xlane.f32.xlu2 %v1304_v10 }
 0x58f   :  { %v1267_v34 = vpop.xlane.xlu1 %1266  ;;  %v2031_v52 = vpop.xlane.xlu2 %2030 }
 0x590   :  { %4599 = vrcp.f32 %v1267_v34 }
 0x591   :  { %4601 = vpow2.f32 %v2137_v3 }
 0x592   :  { %4603 = vpow2.f32 %v1227_v45 }
 0x594   :  { %2048 = vmax.xlane.f32.xlu2 %v2047_v53  ;;  %1143 = vmax.xlane.f32.xlu1 %v1142_v28 }
 0x596   :  { %v4600_v50 = vpop.eup %4599  ;;  %v1108_v20 = vpop.xlane.xlu0 %1107 }
 0x597   :  { %v1172_v10 = vsub.f32 %v5874_v33, %v1108_v20  ;;  %v6168_v60 = vpop.xlane.xlu1 %2027  ;;  %v1129_v39 = vpop.xlane.xlu2 %1128  ;;  %v1385_v3 = vmul.f32 %v4600_v50, %v5973_v46  ;;  %v2093_v50 = vsub.f32 %v5934_v47, %v6133_v31 }
 0x598   :  { %v6171_v34 = vpop.eup %4601  ;;  %v6194_v31 = vpop.f32.mrf.mxu1 }
 0x599   :  { %v1219_v24 = vmul.f32 1.442695, %v1172_v10  ;;  %4267 = vmatmul.msk.f32.gmra.mxu0 %vm1060_vm5, %v1385_v3  ;;  %v2212_v1 = vsel %vm1060_vm5, %v6171_v34, 0.0  ;;  %v6179_v36 = vpop.eup %4603  ;;  %v2097_v10 = vsub.f32 %v5977_v16, %v2031_v52 }
 0x59b   :  { %4605 = vpow2.f32 %v1219_v24  ;;  %v2135_v24 = vmul.f32 1.442695, %v2093_v50 }
 0x59c   :  { %2213 = vadd.xlane.f32.xlu1 %v2212_v1 }
 0x59e   :  { %v2025_v53 = vpop.xlane.xlu0 %2024 }
 0x59f   :  { %v2095_v33 = vsub.f32 %v5953_v42, %v2025_v53  ;;  %v1270_v28 = vpop.xlane.xlu1 %1269  ;;  %v1276_v20 = vpop.xlane.xlu2 %1275  ;;  %v1310_v42 = vsel %vm1060_vm5, %v6179_v36, 0.0  ;;  %v2143_v53 = vmul.f32 1.442695, %v2097_v10  ;;  %v2053_v10 = vsel %vm1060_vm5, %v6194_v31, -inf }
 0x5a0   :  { %4607 = vrcp.f32 %v1270_v28 }
 0x5a1   :  { %v6181_v46 = vpop.eup %4605  ;;  %v2139_v45 = vmul.f32 1.442695, %v2095_v33  ;;  %v1175_v33 = vsub.f32 %v5931_v62, %v6149_v7 }
 0x5a2   :  { %v1298_v3 = vsel %vm1060_vm5, %v6181_v46, 0.0 }
 0x5a3   :  { %4609 = vpow2.f32 %v2139_v45  ;;  %1299 = vadd.xlane.f32.xlu0 %v1298_v3  ;;  %v6208_v3 = vpop.f32.mrf.mxu3 }
 0x5a4   :  { %1311 = vadd.xlane.f32.xlu1 %v1310_v42 }
 0x5a6   :  { %v4608_v1 = vpop.eup %4607  ;;  %v1123_v28 = vpop.xlane.xlu0 %1122 }
 0x5a7   :  { %v1177_v32 = vsub.f32 %v5961_v44, %v1123_v28  ;;  %v6191_v29 = vpop.xlane.xlu1 %1125  ;;  %v2181_v47 = vpop.xlane.xlu2 %2180  ;;  %v1386_v16 = vmul.f32 %v4608_v1, %v5998_v41  ;;  %v1179_v44 = vsub.f32 %v5986_v5, %v1129_v39  ;;  %v1139_v41 = vsel %vm1060_vm5, %v6145_v40, -inf }
 0x5a8   :  { %4611 = vrcp.f32 %v2181_v47 }
 0x5a9   :  { %v6196_v52 = vpop.eup %4609  ;;  %4613 = vpow2.f32 %v2135_v24  ;;  %v1229_v50 = vmul.f32 1.442695, %v1177_v32  ;;  %4268 = vmatmul.msk.f32.gmra.mxu0 %vm1060_vm5, %v1386_v16  ;;  %v1225_v32 = vmul.f32 1.442695, %v1175_v33  ;;  %v1233_v7 = vmul.f32 1.442695, %v1179_v44 }
 0x5aa   :  { %4615 = vpow2.f32 %v2143_v53  ;;  %v2215_v45 = vsel %vm1060_vm5, %v6196_v52, 0.0 }
 0x5ab   :  { %4617 = vpow2.f32 %v1229_v50  ;;  %2216 = vadd.xlane.f32.xlu2 %v2215_v45  ;;  %1140 = vmax.xlane.f32.xlu0 %v1139_v41  ;;  %v6225_v45 = vpop.f32.mrf.mxu3 }
 0x5ac   :  { %2054 = vmax.xlane.f32.xlu1 %v2053_v10  ;;  %v2096_v10 = vsub.f32 %v5964_v9, %v6168_v60 }
 0x5ae   :  { %v4612_v62 = vpop.eup %4611  ;;  %v2034_v42 = vpop.xlane.xlu0 %2033 }
 0x5af   :  { %v6210_v39 = vpop.eup %4613  ;;  %v2307_v5 = vmul.f32 %v4612_v62, %v6010_v51  ;;  %v1273_v24 = vpop.xlane.xlu1 %1272  ;;  %v2098_v47 = vsub.f32 %v6019_v23, %v2034_v42 }
 0x5b0   :  { %v1279_v1 = vpop.xlane.xlu2 %1278  ;;  %v6213_v53 = vpop.eup %4615  ;;  %4619 = vrcp.f32 %v1273_v24  ;;  %v2209_v33 = vsel %vm1060_vm5, %v6210_v39, 0.0  ;;  %v1145_v24 = vsel %vm1060_vm5, %v6208_v3, -inf }
 0x5b1   :  { %v6215_v28 = vpop.eup %4617  ;;  %4621 = vpow2.f32 %v1225_v32  ;;  %4335 = vmatmul.msk.f32.vlgmr.msrb.gmra.mxu2 %vm1060_vm5, %v2307_v5  ;;  %v2221_v51 = vsel %vm1060_vm5, %v6213_v53, 0.0  ;;  %v2145_v50 = vmul.f32 1.442695, %v2098_v47  ;;  %v2141_v47 = vmul.f32 1.442695, %v2096_v10 }
 0x5b2   :  { %4623 = vpow2.f32 %v1233_v7  ;;  %v1313_v16 = vsel %vm1060_vm5, %v6215_v28, 0.0 }
 0x5b3   :  { %1314 = vadd.xlane.f32.xlu2 %v1313_v16  ;;  %2210 = vadd.xlane.f32.xlu0 %v2209_v33  ;;  %4625 = vrcp.f32 %v1276_v20 }
 0x5b4   :  { %2222 = vadd.xlane.f32.xlu1 %v2221_v51  ;;  %4627 = vpow2.f32 %v2145_v50  ;;  %v6247_v50 = vpop.f32.mrf.mxu3 }
 0x5b5   :  { %4629 = vrcp.f32 %v1279_v1  ;;  %v2050_v1 = vsel %vm1060_vm5, %v6176_v13, -inf }
 0x5b6   :  { %v4620_v44 = vpop.eup %4619  ;;  %v1132_v23 = vpop.xlane.xlu0 %1131  ;;  %4631 = vpow2.f32 %v2141_v47 }
 0x5b7   :  { %v6227_v41 = vpop.eup %4621  ;;  %v6231_v32 = vpop.xlane.xlu1 %2036  ;;  %v1387_v7 = vmul.f32 %v4620_v44, %v6021_v61  ;;  %v1180_v5 = vsub.f32 %v6033_v38, %v1132_v23  ;;  %v1178_v23 = vsub.f32 %v5971_v21, %v6191_v29 }
 0x5b8   :  { %v1282_v62 = vpop.xlane.xlu2 %1281  ;;  %v6234_v42 = vpop.eup %4623  ;;  %v1307_v20 = vsel %vm1060_vm5, %v6227_v41, 0.0 }
 0x5b9   :  { %4269 = vmatmul.msk.f32.gmra.mxu0 %vm1060_vm5, %v1387_v7  ;;  %v1319_v60 = vsel %vm1060_vm5, %v6234_v42, 0.0  ;;  %v4626_v9 = vpop.eup %4625  ;;  %v1235_v61 = vmul.f32 1.442695, %v1180_v5 }
 0x5ba   :  { %v6244_v16 = vpop.eup %4627  ;;  %v1388_v51 = vmul.f32 %v4626_v9, %v6000_v8  ;;  %v1151_v8 = vsel %vm1060_vm5, %v6247_v50, -inf }
 0x5bb   :  { %1308 = vadd.xlane.f32.xlu0 %v1307_v20  ;;  %1146 = vmax.xlane.f32.xlu2 %v1145_v24  ;;  %v2224_v10 = vsel %vm1060_vm5, %v6244_v16, 0.0  ;;  %v4630_v7 = vpop.eup %4629  ;;  %v1231_v20 = vmul.f32 1.442695, %v1178_v23 }
 0x5bc   :  { %1320 = vadd.xlane.f32.xlu1 %v1319_v60  ;;  %v6258_v5 = vpop.eup %4631  ;;  %v1389_v60 = vmul.f32 %v4630_v7, %v6023_v4  ;;  %v6270_v4 = vpop.f32.mrf.mxu1 }
 0x5bf   :  { %v2184_v38 = vpop.xlane.xlu1 %2183 }
 0x5c0   :  { %v1285_v33 = vpop.xlane.xlu2 %1284  ;;  %4633 = vrcp.f32 %v2184_v38  ;;  %v2193_v44 = vpop.xlane.xlu0 %2192  ;;  %v2218_v38 = vsel %vm1060_vm5, %v6258_v5, 0.0 }
 0x5c1   :  { %4635 = vpow2.f32 %v1235_v61  ;;  %4270 = vmatmul.msk.f32.gmra.mxu0 %vm1060_vm5, %v1388_v51 }
 0x5c2   :  { %4637 = vrcp.f32 %v1282_v62 }
 0x5c3   :  { %2051 = vmax.xlane.f32.xlu0 %v2050_v1  ;;  %2225 = vadd.xlane.f32.xlu2 %v2224_v10 }
 0x5c4   :  { %1152 = vmax.xlane.f32.xlu1 %v1151_v8 }
 0x5c6   :  { %v4634_v29 = vpop.eup %4633 }
 0x5c7   :  { %v6260_v21 = vpop.eup %4635  ;;  %v2187_v24 = vpop.xlane.xlu1 %2186  ;;  %v2308_v9 = vmul.f32 %v4634_v29, %v6048_v49 }
 0x5c8   :  { %v1288_v47 = vpop.xlane.xlu2 %1287  ;;  %4639 = vrcp.f32 %v2187_v24  ;;  %v1291_v61 = vpop.xlane.xlu0 %1290  ;;  %v1322_v62 = vsel %vm1060_vm5, %v6260_v21, 0.0 }
 0x5c9   :  { %4641 = vpow2.f32 %v1231_v20  ;;  %4271 = vmatmul.msk.f32.gmra.mxu0 %vm1060_vm5, %v1389_v60  ;;  %4336 = vmatmul.msk.f32.gmra.mxu2 %vm1060_vm5, %v2308_v9  ;;  %v4638_v51 = vpop.eup %4637  ;;  %v2099_v20 = vsub.f32 %v6037_v43, %v6231_v32 }
 0x5ca   :  { %4643 = vrcp.f32 %v1285_v33  ;;  %v1390_v8 = vmul.f32 %v4638_v51, %v6035_v54  ;;  %v2056_v54 = vsel %vm1060_vm5, %v6270_v4, -inf }
 0x5cb   :  { %2219 = vadd.xlane.f32.xlu0 %v2218_v38  ;;  %1323 = vadd.xlane.f32.xlu2 %v1322_v62 }
 0x5ce   :  { %v4640_v23 = vpop.eup %4639 }
 0x5cf   :  { %v6272_v49 = vpop.eup %4641  ;;  %v2190_v1 = vpop.xlane.xlu1 %2189  ;;  %v2309_v7 = vmul.f32 %v4640_v23, %v6062_v14  ;;  %v2147_v14 = vmul.f32 1.442695, %v2099_v20 }
 0x5d0   :  { %v2040_v10 = vpop.xlane.xlu2 %2039  ;;  %4645 = vrcp.f32 %v2190_v1  ;;  %v2043_v24 = vpop.xlane.xlu0 %2042  ;;  %v1316_v9 = vsel %vm1060_vm5, %v6272_v49, 0.0 }
 0x5d1   :  { %v2100_v29 = vsub.f32 %v6064_v59, %v2040_v10  ;;  %v2101_v60 = vsub.f32 %v6080_v26, %v2043_v24  ;;  %4272 = vmatmul.msk.f32.gmra.mxu0 %vm1060_vm5, %v1390_v8  ;;  %4337 = vmatmul.msk.f32.gmra.mxu2 %vm1060_vm5, %v2309_v7  ;;  %v4644_v43 = vpop.eup %4643  ;;  %v6286_v26 = vpop.f32.mrf.mxu3  ;;  %v1148_v10 = vsel %vm1060_vm5, %v6225_v45, -inf }
 0x5d2   :  { %v1391_v51 = vmul.f32 %v4644_v43, %v6050_v58 }
 0x5d3   :  { %v2149_v33 = vmul.f32 1.442695, %v2100_v29  ;;  %1317 = vadd.xlane.f32.xlu0 %v1316_v9  ;;  %2057 = vmax.xlane.f32.xlu2 %v2056_v54  ;;  %v2151_v59 = vmul.f32 1.442695, %v2101_v60  ;;  %v6307_v9 = vpop.f32.mrf.mxu1 }
 0x5d5   :  { %4647 = vpow2.f32 %v2149_v33 }
 0x5d6   :  { %4649 = vrcp.f32 %v2193_v44  ;;  %v4646_v32 = vpop.eup %4645 }
 0x5d7   :  { %4651 = vrcp.f32 %v1288_v47  ;;  %v1135_v62 = vpop.xlane.xlu1 %1134  ;;  %v2310_v23 = vmul.f32 %v4646_v32, %v6077_v57  ;;  %v1154_v47 = vsel %vm1060_vm5, %v6286_v26, -inf }
 0x5d8   :  { %v2199_v38 = vpop.xlane.xlu2 %2198  ;;  %4653 = vpow2.f32 %v2147_v14  ;;  %v1181_v1 = vsub.f32 %v6092_v18, %v1135_v62 }
 0x5d9   :  { %4655 = vpow2.f32 %v2151_v59  ;;  %4273 = vmatmul.msk.f32.gmra.mxu0 %vm1060_vm5, %v1391_v51  ;;  %4338 = vmatmul.msk.f32.gmra.mxu2 %vm1060_vm5, %v2310_v23 }
 0x5da   :  { %v1237_v18 = vmul.f32 1.442695, %v1181_v1  ;;  %4657 = vrcp.f32 %v1291_v61 }
 0x5db   :  { %v6293_v44 = vpop.eup %4647  ;;  %1149 = vmax.xlane.f32.xlu0 %v1148_v10  ;;  %1155 = vmax.xlane.f32.xlu2 %v1154_v47  ;;  %v6324_v10 = vpop.f32.mrf.mxu1 }
 0x5dc   :  { %v4650_v8 = vpop.eup %4649  ;;  %v2230_v58 = vsel %vm1060_vm5, %v6293_v44, 0.0  ;;  %4659 = vpow2.f32 %v1237_v18 }
 0x5dd   :  { %v4652_v57 = vpop.eup %4651  ;;  %2231 = vadd.xlane.f32.xlu1 %v2230_v58  ;;  %v2311_v33 = vmul.f32 %v4650_v8, %v6053_v35 }
 0x5de   :  { %v6301_v7 = vpop.eup %4653  ;;  %v1392_v60 = vmul.f32 %v4652_v57, %v6066_v63 }
 0x5df   :  { %v6303_v20 = vpop.eup %4655  ;;  %v2196_v24 = vpop.xlane.xlu1 %2195  ;;  %v2227_v54 = vsel %vm1060_vm5, %v6301_v7, 0.0 }
 0x5e0   :  { %v1297_v29 = vpop.xlane.xlu2 %1296  ;;  %4661 = vrcp.f32 %v2196_v24  ;;  %v2233_v61 = vsel %vm1060_vm5, %v6303_v20, 0.0  ;;  %v4658_v43 = vpop.eup %4657  ;;  %v2059_v24 = vsel %vm1060_vm5, %v6307_v9, -inf }
 0x5e1   :  { %4274 = vmatmul.msk.f32.gmra.mxu0 %vm1060_vm5, %v1392_v60  ;;  %4339 = vmatmul.msk.f32.gmra.mxu2 %vm1060_vm5, %v2311_v33  ;;  %4663 = vrcp.f32 %v2199_v38  ;;  %v1393_v32 = vmul.f32 %v4658_v43, %v6069_v12  ;;  %v2202_v38 = vpop.xlane.xlu0 %2201 }
 0x5e2   :  { %v6315_v63 = vpop.eup %4659 }
 0x5e3   :  { %2228 = vadd.xlane.f32.xlu0 %v2227_v54  ;;  %2234 = vadd.xlane.f32.xlu2 %v2233_v61  ;;  %v1325_v1 = vsel %vm1060_vm5, %v6315_v63, 0.0 }
 0x5e6   :  { %v4662_v35 = vpop.eup %4661 }
 0x5e7   :  { %v1294_v14 = vpop.xlane.xlu1 %1293  ;;  %v2312_v51 = vmul.f32 %v4662_v35, %v6103_v22  ;;  %v4664_v47 = vpop.eup %4663  ;;  %v2062_v35 = vsel %vm1060_vm5, %v6324_v10, -inf }
 0x5e8   :  { %v1138_v59 = vpop.xlane.xlu2 %1137  ;;  %4665 = vrcp.f32 %v1294_v14  ;;  %v2313_v58 = vmul.f32 %v4664_v47, %v6090_v56 }
 0x5e9   :  { %v1182_v62 = vsub.f32 %v6116_v17, %v1138_v59  ;;  %4275 = vmatmul.msk.f32.gmra.mxu0 %vm1060_vm5, %v1393_v32  ;;  %4340 = vmatmul.msk.f32.gmra.mxu2 %vm1060_vm5, %v2312_v51 }
 0x5eb   :  { %v1239_v23 = vmul.f32 1.442695, %v1182_v62  ;;  %1326 = vadd.xlane.f32.xlu0 %v1325_v1 }
 0x5ed   :  { %4667 = vpow2.f32 %v1239_v23 }
 0x5ee   :  { %v4666_v12 = vpop.eup %4665  ;;  %4669 = vrcp.f32 %v1297_v29 }
 0x5ef   :  { %4671 = vrcp.f32 %v2202_v38  ;;  %v2046_v17 = vpop.xlane.xlu1 %2045  ;;  %v1394_v22 = vmul.f32 %v4666_v12, %v6114_v6 }
 0x5f0   :  { %v2102_v8 = vsub.f32 %v6125_v11, %v2046_v17  ;;  %v6337_v11 = vpop.f32.mrf.mxu1 }
 0x5f1   :  { %4276 = vmatmul.msk.f32.gmra.mxu0 %vm1060_vm5, %v1394_v22  ;;  %4341 = vmatmul.msk.f32.gmra.mxu2 %vm1060_vm5, %v2313_v58  ;;  %v2065_v62 = vsel %vm1060_vm5, %v6337_v11, -inf  ;;  %v6362_v22 = vpop.f32.mrf.mxu0 }
 0x5f2   :  { %v2153_v18 = vmul.f32 1.442695, %v2102_v8 }
 0x5f3   :  { %v6330_v57 = vpop.eup %4667  ;;  %2060 = vmax.xlane.f32.xlu0 %v2059_v24 }
 0x5f4   :  { %v1328_v29 = vsel %vm1060_vm5, %v6330_v57, 0.0  ;;  %v4670_v60 = vpop.eup %4669  ;;  %4673 = vpow2.f32 %v2153_v18 }
 0x5f5   :  { %1329 = vadd.xlane.f32.xlu1 %v1328_v29  ;;  %v4672_v6 = vpop.eup %4671  ;;  %v1395_v54 = vmul.f32 %v4670_v60, %v6106_v2 }
 0x5f6   :  { %v2314_v61 = vmul.f32 %v4672_v6, %v6094_v55 }
 0x5f7   :  { %v2205_v56 = vpop.xlane.xlu1 %2204  ;;  %v2208_v33 = vpop.xlane.xlu2 %2207 }
 0x5f8   :  { %4675 = vrcp.f32 %v2205_v56  ;;  %v6349_v32 = vpop.f32.mrf.mxu1 }
 0x5f9   :  { %4277 = vmatmul.msk.f32.gmra.mxu0 %vm1060_vm5, %v1395_v54  ;;  %4342 = vmatmul.msk.f32.gmra.mxu2 %vm1060_vm5, %v2314_v61  ;;  %4677 = vrcp.f32 %v2208_v33  ;;  %v6372_v29 = vpop.f32.mrf.mxu0 }
 0x5fa   :  { %v6342_v43 = vpop.eup %4673 }
 0x5fb   :  { %2063 = vmax.xlane.f32.xlu0 %v2062_v35  ;;  %v2236_v14 = vsel %vm1060_vm5, %v6342_v43, 0.0 }
 0x5fc   :  { %2237 = vadd.xlane.f32.xlu2 %v2236_v14 }
 0x5fe   :  { %v4676_v59 = vpop.eup %4675 }
 0x5ff   :  { %v1306_v2 = vpop.xlane.xlu2 %1305  ;;  %v2315_v55 = vmul.f32 %v4676_v59, %v6136_v19  ;;  %v4678_v51 = vpop.eup %4677  ;;  %v2068_v19 = vsel %vm1060_vm5, %v6349_v32, -inf }
 0x600   :  { %v1303_v23 = vpop.xlane.xlu1 %1302  ;;  %v2316_v47 = vmul.f32 %v4678_v51, %v6139_v30  ;;  %v6357_v12 = vpop.f32.mrf.mxu1 }
 0x601   :  { %4343 = vmatmul.msk.f32.gmra.mxu2 %vm1060_vm5, %v2315_v55 }
 0x603   :  { %2066 = vmax.xlane.f32.xlu0 %v2065_v62 }
 0x607   :  { %v2049_v1 = vpop.xlane.xlu2 %2048 }
 0x608   :  { %v2103_v38 = vsub.f32 %v6160_v15, %v2049_v1  ;;  %v1144_v8 = vpop.xlane.xlu1 %1143  ;;  %v2071_v15 = vsel %vm1060_vm5, %v6357_v12, -inf  ;;  %v6368_v18 = vpop.f32.mrf.mxu1 }
 0x609   :  { %4344 = vmatmul.msk.f32.gmra.mxu2 %vm1060_vm5, %v2316_v47  ;;  %v2074_v60 = vsel %vm1060_vm5, %v6368_v18, -inf  ;;  %v1184_v59 = vsub.f32 %v6158_v48, %v1144_v8  ;;  %v6384_v1 = vpop.f32.mrf.mxu0 }
 0x60a   :  { %v2155_v17 = vmul.f32 1.442695, %v2103_v38 }
 0x60b   :  { %2069 = vmax.xlane.f32.xlu0 %v2068_v19 }
 0x60c   :  { %4679 = vpow2.f32 %v2155_v17 }
 0x610   :  { %v2214_v6 = vpop.xlane.xlu1 %2213  ;;  %v6376_v33 = vpop.f32.mrf.mxu1 }
 0x611   :  { %v2077_v62 = vsel %vm1060_vm5, %v6376_v33, -inf }
 0x612   :  { %v6364_v58 = vpop.eup %4679 }
 0x613   :  { %2072 = vmax.xlane.f32.xlu0 %v2071_v15  ;;  %v2239_v30 = vsel %vm1060_vm5, %v6364_v58, 0.0  ;;  %v6396_v15 = vpop.f32.mrf.mxu0 }
 0x614   :  { %2240 = vadd.xlane.f32.xlu2 %v2239_v30 }
 0x616   :  { %v1300_v24 = vpop.xlane.xlu0 %1299 }
 0x617   :  { %4681 = vrcp.f32 %v1300_v24 }
 0x618   :  { %4683 = vrcp.f32 %v1303_v23  ;;  %v1243_v23 = vmul.f32 1.442695, %v1184_v59  ;;  %v1312_v38 = vpop.xlane.xlu1 %1311  ;;  %v6387_v17 = vpop.f32.mrf.mxu1 }
 0x619   :  { %v2080_v19 = vsel %vm1060_vm5, %v6387_v17, -inf }
 0x61b   :  { %2075 = vmax.xlane.f32.xlu0 %v2074_v60 }
 0x61d   :  { %v4682_v56 = vpop.eup %4681 }
 0x61e   :  { %v2217_v54 = vpop.xlane.xlu2 %2216  ;;  %v1141_v61 = vpop.xlane.xlu0 %1140  ;;  %v1396_v35 = vmul.f32 %v4682_v56, %v6181_v46 }
 0x61f   :  { %v1183_v14 = vsub.f32 %v6145_v40, %v1141_v61  ;;  %v4684_v51 = vpop.eup %4683 }
 0x620   :  { %4278 = vmatmul.msk.f32.gmra.mxu0 %vm1060_vm5, %v1396_v35  ;;  %v1397_v40 = vmul.f32 %v4684_v51, %v6147_v37  ;;  %v2631_v37 = vld [vmem:[%s7473_s3 + $0x18] sm:$0xff]  ;;  %v2055_v59 = vpop.xlane.xlu1 %2054  ;;  %v6410_v51 = vpop.f32.mrf.mxu0 }
 0x621   :  { %v1241_v55 = vmul.f32 1.442695, %v1183_v14  ;;  %2693 = vmatpush.msrb.mxu3 %v2631_v37 }
 0x623   :  { %4685 = vpow2.f32 %v1241_v55  ;;  %2078 = vmax.xlane.f32.xlu0 %v2077_v62 }
 0x624   :  { %4687 = vrcp.f32 %v1306_v2 }
 0x626   :  { %v1315_v47 = vpop.xlane.xlu2 %1314  ;;  %v2211_v46 = vpop.xlane.xlu0 %2210 }
 0x627   :  { %4689 = vrcp.f32 %v2211_v46 }
 0x628   :  { %4279 = vmatmul.msk.f32.gmra.mxu0 %vm1060_vm5, %v1397_v40  ;;  %4691 = vpow2.f32 %v1243_v23  ;;  %v2223_v37 = vpop.xlane.xlu1 %2222 }
 0x629   :  { %v6390_v48 = vpop.eup %4685  ;;  %4693 = vrcp.f32 %v2214_v6 }
 0x62a   :  { %v1331_v2 = vsel %vm1060_vm5, %v6390_v48, 0.0  ;;  %v4688_v8 = vpop.eup %4687 }
 0x62b   :  { %2081 = vmax.xlane.f32.xlu0 %v2080_v19  ;;  %1332 = vadd.xlane.f32.xlu1 %v1331_v2  ;;  %v1398_v56 = vmul.f32 %v4688_v8, %v6151_v0  ;;  %v2105_v2 = vsub.f32 %v6194_v31, %v2055_v59 }
 0x62d   :  { %v4690_v30 = vpop.eup %4689 }
 0x62e   :  { %v1309_v24 = vpop.xlane.xlu0 %1308  ;;  %v1147_v60 = vpop.xlane.xlu2 %1146  ;;  %v2317_v14 = vmul.f32 %v4690_v30, %v6210_v39 }
 0x62f   :  { %v6402_v61 = vpop.eup %4691  ;;  %4695 = vrcp.f32 %v1309_v24  ;;  %v1185_v35 = vsub.f32 %v6208_v3, %v1147_v60 }
 0x630   :  { %4280 = vmatmul.msk.f32.gmra.mxu0 %vm1060_vm5, %v1398_v56  ;;  %4345 = vmatmul.msk.f32.gmra.mxu2 %vm1060_vm5, %v2317_v14  ;;  %v1334_v6 = vsel %vm1060_vm5, %v6402_v61, 0.0  ;;  %v4694_v0 = vpop.eup %4693  ;;  %v1321_v14 = vpop.xlane.xlu1 %1320 }
 0x631   :  { %v1245_v55 = vmul.f32 1.442695, %v1185_v35  ;;  %v2318_v40 = vmul.f32 %v4694_v0, %v6171_v34  ;;  %v6422_v34 = vpop.f32.mrf.mxu0 }
 0x633   :  { %4697 = vpow2.f32 %v1245_v55  ;;  %1335 = vadd.xlane.f32.xlu1 %v1334_v6 }
 0x634   :  { %4699 = vrcp.f32 %v1312_v38 }
 0x635   :  { %v4696_v62 = vpop.eup %4695  ;;  %4701 = vrcp.f32 %v2217_v54 }
 0x636   :  { %v2052_v3 = vpop.xlane.xlu0 %2051  ;;  %v2226_v23 = vpop.xlane.xlu2 %2225  ;;  %v1399_v39 = vmul.f32 %v4696_v62, %v6227_v41 }
 0x637   :  { %v2104_v46 = vsub.f32 %v6176_v13, %v2052_v3  ;;  %v2159_v13 = vmul.f32 1.442695, %v2105_v2 }
 0x638   :  { %4281 = vmatmul.msk.f32.gmra.mxu0 %vm1060_vm5, %v1399_v39  ;;  %4346 = vmatmul.msk.f32.gmra.mxu2 %vm1060_vm5, %v2318_v40 }
 0x639   :  { %v6416_v19 = vpop.eup %4697  ;;  %v2157_v8 = vmul.f32 1.442695, %v2104_v46  ;;  %v6432_v55 = vpop.f32.mrf.mxu0 }
 0x63a   :  { %v1337_v54 = vsel %vm1060_vm5, %v6416_v19, 0.0  ;;  %v4700_v38 = vpop.eup %4699 }
 0x63b   :  { %4703 = vpow2.f32 %v2157_v8  ;;  %1338 = vadd.xlane.f32.xlu1 %v1337_v54  ;;  %v4702_v41 = vpop.eup %4701  ;;  %v1400_v60 = vmul.f32 %v4700_v38, %v6179_v36 }
 0x63c   :  { %4705 = vrcp.f32 %v1315_v47  ;;  %v2319_v31 = vmul.f32 %v4702_v41, %v6196_v52 }
 0x63e   :  { %v2220_v30 = vpop.xlane.xlu0 %2219  ;;  %v1324_v24 = vpop.xlane.xlu2 %1323 }
 0x63f   :  { %4707 = vrcp.f32 %v2220_v30 }
 0x640   :  { %4282 = vmatmul.msk.f32.gmra.mxu0 %vm1060_vm5, %v1400_v60  ;;  %4709 = vpow2.f32 %v2159_v13  ;;  %4347 = vmatmul.msk.f32.gmra.mxu2 %vm1060_vm5, %v2319_v31 }
 0x641   :  { %v6427_v56 = vpop.eup %4703  ;;  %4711 = vrcp.f32 %v2223_v37  ;;  %v6444_v37 = vpop.f32.mrf.mxu0 }
 0x642   :  { %v2242_v35 = vsel %vm1060_vm5, %v6427_v56, 0.0  ;;  %v4706_v47 = vpop.eup %4705 }
 0x643   :  { %2243 = vadd.xlane.f32.xlu2 %v2242_v35  ;;  %v1401_v52 = vmul.f32 %v4706_v47, %v6215_v28  ;;  %v1153_v28 = vpop.xlane.xlu1 %1152 }
 0x644   :  { %v1187_v41 = vsub.f32 %v6247_v50, %v1153_v28 }
 0x645   :  { %v4708_v59 = vpop.eup %4707 }
 0x646   :  { %v1318_v36 = vpop.xlane.xlu0 %1317  ;;  %v2058_v6 = vpop.xlane.xlu2 %2057  ;;  %v2320_v0 = vmul.f32 %v4708_v59, %v6258_v5  ;;  %v1249_v60 = vmul.f32 1.442695, %v1187_v41 }
 0x647   :  { %v6436_v62 = vpop.eup %4709  ;;  %4713 = vrcp.f32 %v1318_v36  ;;  %v2106_v3 = vsub.f32 %v6270_v4, %v2058_v6 }
 0x648   :  { %4283 = vmatmul.msk.f32.gmra.mxu0 %vm1060_vm5, %v1401_v52  ;;  %4348 = vmatmul.msk.f32.gmra.mxu2 %vm1060_vm5, %v2320_v0  ;;  %v2245_v46 = vsel %vm1060_vm5, %v6436_v62, 0.0  ;;  %v4712_v40 = vpop.eup %4711 }
 0x649   :  { %v2161_v39 = vmul.f32 1.442695, %v2106_v3  ;;  %v2321_v54 = vmul.f32 %v4712_v40, %v6213_v53  ;;  %v6460_v47 = vpop.f32.mrf.mxu0 }
 0x64b   :  { %4715 = vpow2.f32 %v2161_v39  ;;  %2246 = vadd.xlane.f32.xlu2 %v2245_v46 }
 0x64c   :  { %4717 = vrcp.f32 %v1321_v14 }
 0x64d   :  { %v4714_v2 = vpop.eup %4713  ;;  %4719 = vrcp.f32 %v2226_v23 }
 0x64e   :  { %v1150_v5 = vpop.xlane.xlu0 %1149  ;;  %v1402_v8 = vmul.f32 %v4714_v2, %v6272_v49 }
 0x64f   :  { %v1186_v4 = vsub.f32 %v6225_v45, %v1150_v5  ;;  %v1156_v45 = vpop.xlane.xlu2 %1155 }
 0x650   :  { %4284 = vmatmul.msk.f32.gmra.mxu0 %vm1060_vm5, %v1402_v8  ;;  %4349 = vmatmul.msk.f32.gmra.mxu2 %vm1060_vm5, %v2321_v54  ;;  %v1188_v14 = vsub.f32 %v6286_v26, %v1156_v45  ;;  %v2232_v36 = vpop.xlane.xlu1 %2231  ;;  %v2630_v45 = vld [vmem:[%s7473_s3 + $0x10] sm:$0xff] }
 0x651   :  { %v6449_v38 = vpop.eup %4715  ;;  %v1247_v13 = vmul.f32 1.442695, %v1186_v4  ;;  %v6474_v39 = vpop.f32.mrf.mxu0  ;;  %2694 = vmatpush.msrb.mxu3 %v2630_v45 }
 0x652   :  { %v2248_v23 = vsel %vm1060_vm5, %v6449_v38, 0.0  ;;  %v4718_v30 = vpop.eup %4717  ;;  %v1251_v6 = vmul.f32 1.442695, %v1188_v14 }
 0x653   :  { %4721 = vpow2.f32 %v1247_v13  ;;  %2249 = vadd.xlane.f32.xlu2 %v2248_v23  ;;  %v4720_v49 = vpop.eup %4719  ;;  %v1403_v31 = vmul.f32 %v4718_v30, %v6234_v42 }
 0x654   :  { %4723 = vrcp.f32 %v1324_v24  ;;  %v2322_v35 = vmul.f32 %v4720_v49, %v6244_v16 }
 0x656   :  { %v2229_v53 = vpop.xlane.xlu0 %2228 }
 0x657   :  { %4725 = vrcp.f32 %v2229_v53  ;;  %v2235_v46 = vpop.xlane.xlu2 %2234 }
 0x658   :  { %4285 = vmatmul.msk.f32.gmra.mxu0 %vm1060_vm5, %v1403_v31  ;;  %4727 = vpow2.f32 %v1249_v60  ;;  %4350 = vmatmul.msk.f32.gmra.mxu2 %vm1060_vm5, %v2322_v35 }
 0x659   :  { %v6458_v50 = vpop.eup %4721  ;;  %4729 = vrcp.f32 %v2232_v36 }
 0x65a   :  { %v1340_v24 = vsel %vm1060_vm5, %v6458_v50, 0.0  ;;  %v4724_v59 = vpop.eup %4723 }
 0x65b   :  { %1341 = vadd.xlane.f32.xlu1 %v1340_v24  ;;  %v1404_v52 = vmul.f32 %v4724_v59, %v6260_v21 }
 0x65d   :  { %v4726_v42 = vpop.eup %4725 }
 0x65e   :  { %v1327_v16 = vpop.xlane.xlu0 %1326  ;;  %v2323_v0 = vmul.f32 %v4726_v42, %v6301_v7  ;;  %v6468_v3 = vpop.eup %4727 }
 0x65f   :  { %4731 = vrcp.f32 %v1327_v16  ;;  %v1343_v26 = vsel %vm1060_vm5, %v6468_v3, 0.0  ;;  %v4730_v40 = vpop.eup %4729 }
 0x660   :  { %4286 = vmatmul.msk.f32.gmra.mxu0 %vm1060_vm5, %v1404_v52  ;;  %4733 = vpow2.f32 %v1251_v6  ;;  %4351 = vmatmul.msk.f32.gmra.mxu2 %vm1060_vm5, %v2323_v0  ;;  %v2324_v8 = vmul.f32 %v4730_v40, %v6293_v44 }
 0x661   :  { %4735 = vrcp.f32 %v2235_v46 }
 0x663   :  { %1344 = vadd.xlane.f32.xlu1 %v1343_v26 }
 0x665   :  { %v4732_v2 = vpop.eup %4731 }
 0x666   :  { %v2061_v21 = vpop.xlane.xlu0 %2060  ;;  %v1405_v7 = vmul.f32 %v4732_v2, %v6315_v63  ;;  %v6477_v28 = vpop.eup %4733 }
 0x667   :  { %v2107_v5 = vsub.f32 %v6307_v9, %v2061_v21  ;;  %v1346_v41 = vsel %vm1060_vm5, %v6477_v28, 0.0  ;;  %v4736_v13 = vpop.eup %4735  ;;  %v6485_v63 = vpop.f32.mrf.mxu0 }
 0x668   :  { %v1330_v4 = vpop.xlane.xlu1 %1329  ;;  %4287 = vmatmul.msk.f32.gmra.mxu0 %vm1060_vm5, %v1405_v7  ;;  %4352 = vmatmul.msk.f32.gmra.mxu2 %vm1060_vm5, %v2324_v8  ;;  %v2325_v44 = vmul.f32 %v4736_v13, %v6303_v20 }
 0x669   :  { %4737 = vrcp.f32 %v1330_v4  ;;  %v2163_v54 = vmul.f32 1.442695, %v2107_v5  ;;  %v6522_v4 = vpop.f32.mrf.mxu2 }
 0x66b   :  { %4739 = vpow2.f32 %v2163_v54  ;;  %1347 = vadd.xlane.f32.xlu1 %v1346_v41 }
 0x66e   :  { %v2064_v30 = vpop.xlane.xlu0 %2063 }
 0x66f   :  { %v4738_v23 = vpop.eup %4737  ;;  %v2108_v9 = vsub.f32 %v6324_v10, %v2064_v30  ;;  %v2238_v49 = vpop.xlane.xlu2 %2237 }
 0x670   :  { %v1406_v60 = vmul.f32 %v4738_v23, %v6330_v57  ;;  %4741 = vrcp.f32 %v2238_v49  ;;  %4353 = vmatmul.msk.f32.gmra.mxu2 %vm1060_vm5, %v2325_v44  ;;  %v6499_v35 = vpop.f32.mrf.mxu0 }
 0x671   :  { %v6493_v53 = vpop.eup %4739  ;;  %v2165_v31 = vmul.f32 1.442695, %v2108_v9  ;;  %v6533_v44 = vpop.f32.mrf.mxu2 }
 0x672   :  { %4288 = vmatmul.msk.f32.gmra.mxu0 %vm1060_vm5, %v1406_v60  ;;  %v2251_v10 = vsel %vm1060_vm5, %v6493_v53, 0.0 }
 0x673   :  { %4743 = vpow2.f32 %v2165_v31  ;;  %2252 = vadd.xlane.f32.xlu2 %v2251_v10 }
 0x676   :  { %v4742_v20 = vpop.eup %4741  ;;  %v2067_v57 = vpop.xlane.xlu0 %2066 }
 0x677   :  { %v2109_v14 = vsub.f32 %v6337_v11, %v2067_v57  ;;  %v2326_v24 = vmul.f32 %v4742_v20, %v6342_v43 }
 0x678   :  { %v6511_v0 = vpop.f32.mrf.mxu0 }
 0x679   :  { %v6503_v59 = vpop.eup %4743  ;;  %v2167_v36 = vmul.f32 1.442695, %v2109_v14  ;;  %4354 = vmatmul.msk.f32.gmra.mxu2 %vm1060_vm5, %v2326_v24  ;;  %v6545_v14 = vpop.f32.mrf.mxu2 }
 0x67a   :  { %v2254_v42 = vsel %vm1060_vm5, %v6503_v59, 0.0 }
 0x67b   :  { %4745 = vpow2.f32 %v2167_v36  ;;  %2255 = vadd.xlane.f32.xlu1 %v2254_v42 }
 0x67e   :  { %v2070_v6 = vpop.xlane.xlu0 %2069 }
 0x67f   :  { %v2110_v16 = vsub.f32 %v6349_v32, %v2070_v6 }
 0x680   :  { %v6520_v7 = vpop.f32.mrf.mxu0 }
 0x681   :  { %v6509_v52 = vpop.eup %4745  ;;  %v2169_v11 = vmul.f32 1.442695, %v2110_v16 }
 0x682   :  { %v2257_v43 = vsel %vm1060_vm5, %v6509_v52, 0.0 }
 0x683   :  { %4747 = vpow2.f32 %v2169_v11  ;;  %2258 = vadd.xlane.f32.xlu2 %v2257_v43  ;;  %v6557_v43 = vpop.f32.mrf.mxu2 }
 0x686   :  { %v2073_v26 = vpop.xlane.xlu0 %2072 }
 0x687   :  { %v2111_v46 = vsub.f32 %v6357_v12, %v2073_v26  ;;  %v2241_v40 = vpop.xlane.xlu2 %2240 }
 0x688   :  { %4749 = vrcp.f32 %v2241_v40  ;;  %v6531_v30 = vpop.f32.mrf.mxu0 }
 0x689   :  { %v6516_v2 = vpop.eup %4747  ;;  %v2171_v21 = vmul.f32 1.442695, %v2111_v46 }
 0x68a   :  { %v2260_v32 = vsel %vm1060_vm5, %v6516_v2, 0.0 }
 0x68b   :  { %4751 = vpow2.f32 %v2171_v21  ;;  %2261 = vadd.xlane.f32.xlu0 %v2260_v32 }
 0x68e   :  { %v4750_v5 = vpop.eup %4749  ;;  %v2076_v8 = vpop.xlane.xlu0 %2075 }
 0x68f   :  { %v2112_v54 = vsub.f32 %v6368_v18, %v2076_v8  ;;  %v2327_v12 = vmul.f32 %v4750_v5, %v6364_v58  ;;  %v6566_v5 = vpop.f32.mrf.mxu2 }
 0x691   :  { %v6526_v41 = vpop.eup %4751  ;;  %v2173_v13 = vmul.f32 1.442695, %v2112_v54  ;;  %4355 = vmatmul.msk.f32.gmra.mxu2 %vm1060_vm5, %v2327_v12 }
 0x692   :  { %v2263_v23 = vsel %vm1060_vm5, %v6526_v41, 0.0 }
 0x693   :  { %4753 = vpow2.f32 %v2173_v13  ;;  %2264 = vadd.xlane.f32.xlu1 %v2263_v23 }
 0x696   :  { %v2079_v9 = vpop.xlane.xlu0 %2078 }
 0x697   :  { %v2113_v49 = vsub.f32 %v6376_v33, %v2079_v9 }
 0x699   :  { %v6536_v18 = vpop.eup %4753  ;;  %v2175_v58 = vmul.f32 1.442695, %v2113_v49  ;;  %v6575_v49 = vpop.f32.mrf.mxu2 }
 0x69a   :  { %v2266_v60 = vsel %vm1060_vm5, %v6536_v18, 0.0 }
 0x69b   :  { %4755 = vpow2.f32 %v2175_v58  ;;  %2267 = vadd.xlane.f32.xlu2 %v2266_v60 }
 0x69d   :  { %v6540_v45 = vpop.f32.mrf.mxu0 }
 0x69e   :  { %v2082_v31 = vpop.xlane.xlu0 %2081  ;;  %v1333_v10 = vpop.xlane.xlu1 %1332 }
 0x69f   :  { %v2114_v20 = vsub.f32 %v6387_v17, %v2082_v31  ;;  %4757 = vrcp.f32 %v1333_v10  ;;  %v2628_v10 = vld [vmem:[%s7473_s3] sm:$0xff] }
 0x6a1   :  { %v6543_v57 = vpop.eup %4755  ;;  %v2177_v33 = vmul.f32 1.442695, %v2114_v20  ;;  %v6585_v20 = vpop.f32.mrf.mxu2 }
 0x6a2   :  { %v2269_v24 = vsel %vm1060_vm5, %v6543_v57, 0.0 }
 0x6a3   :  { %4759 = vpow2.f32 %v2177_v33  ;;  %2270 = vadd.xlane.f32.xlu0 %v2269_v24 }
 0x6a5   :  { %v4758_v36 = vpop.eup %4757  ;;  %v6549_v42 = vpop.f32.mrf.mxu0 }
 0x6a6   :  { %v1336_v6 = vpop.xlane.xlu1 %1335  ;;  %v1407_v16 = vmul.f32 %v4758_v36, %v6390_v48  ;;  %v2629_v48 = vld [vmem:[%s7473_s3 + $0x8] sm:$0xff] }
 0x6a7   :  { %4761 = vrcp.f32 %v1336_v6  ;;  %2695 = vmatpush.msrb.mxu3 %v2629_v48 }
 0x6a8   :  { %4289 = vmatmul.msk.f32.gmra.mxu0 %vm1060_vm5, %v1407_v16 }
 0x6a9   :  { %v6553_v17 = vpop.eup %4759  ;;  %2696 = vmatpush.msrb.mxu3 %v2628_v10 }
 0x6aa   :  { %v2272_v11 = vsel %vm1060_vm5, %v6553_v17, 0.0 }
 0x6ab   :  { %2273 = vadd.xlane.f32.xlu1 %v2272_v11 }
 0x6ad   :  { %v4762_v26 = vpop.eup %4761  ;;  %v6559_v46 = vpop.f32.mrf.mxu0 }
 0x6ae   :  { %v1339_v40 = vpop.xlane.xlu1 %1338  ;;  %v1408_v21 = vmul.f32 %v4762_v26, %v6402_v61 }
 0x6af   :  { %4763 = vrcp.f32 %v1339_v40  ;;  %v4889_v40 = vld [vmem:[%s7475_s5 + $0x60] sm:$0xff] }
 0x6b0   :  { %4290 = vmatmul.msk.f32.gmra.mxu0 %vm1060_vm5, %v1408_v21  ;;  %v6600_v21 = vperm.slane %v4889_v40, 0 }
 0x6b5   :  { %v4764_v32 = vpop.eup %4763  ;;  %v6568_v8 = vpop.f32.mrf.mxu0 }
 0x6b6   :  { %v2244_v54 = vpop.xlane.xlu2 %2243  ;;  %v1409_v12 = vmul.f32 %v4764_v32, %v6416_v19 }
 0x6b7   :  { %4765 = vrcp.f32 %v2244_v54  ;;  %v4890_v54 = vld [vmem:[%s7475_s5 + $0x20] sm:$0xff] }
 0x6b8   :  { %4291 = vmatmul.msk.f32.gmra.mxu0 %vm1060_vm5, %v1409_v12  ;;  %v6609_v12 = vperm.slane %v4890_v54, 0 }
 0x6ba   :  { %v1647_v10 = vmul.f32 %v6609_v12, %v6362_v22  ;;  %v1657_v22 = vmul.f32 %v6600_v21, %v6474_v39 }
 0x6bd   :  { %v4766_v61 = vpop.eup %4765  ;;  %v6572_v13 = vpop.f32.mrf.mxu0 }
 0x6be   :  { %v2247_v23 = vpop.xlane.xlu2 %2246  ;;  %v2328_v9 = vmul.f32 %v4766_v61, %v6427_v56 }
 0x6bf   :  { %4767 = vrcp.f32 %v2247_v23 }
 0x6c0   :  { %4356 = vmatmul.msk.f32.gmra.mxu2 %vm1060_vm5, %v2328_v9 }
 0x6c5   :  { %v4768_v58 = vpop.eup %4767  ;;  %v6578_v60 = vpop.f32.mrf.mxu0 }
 0x6c6   :  { %v2250_v31 = vpop.xlane.xlu2 %2249  ;;  %v2329_v19 = vmul.f32 %v4768_v58, %v6436_v62  ;;  %v6591_v62 = vpop.f32.mrf.mxu2  ;;  %v1656_v58 = vmul.f32 %v6600_v21, %v6460_v47 }
 0x6c7   :  { %4769 = vrcp.f32 %v2250_v31  ;;  %v4892_v31 = vld [vmem:[%s7475_s5 + $0xe0] sm:$0xff] }
 0x6c8   :  { %4357 = vmatmul.msk.f32.gmra.mxu2 %vm1060_vm5, %v2329_v19  ;;  %v6623_v19 = vperm.slane %v4892_v31, 0 }
 0x6cd   :  { %v4770_v56 = vpop.eup %4769  ;;  %v6587_v33 = vpop.f32.mrf.mxu0 }
 0x6ce   :  { %v1342_v24 = vpop.xlane.xlu1 %1341  ;;  %v2330_v36 = vmul.f32 %v4770_v56, %v6449_v38  ;;  %v6602_v48 = vpop.f32.mrf.mxu2 }
 0x6cf   :  { %4771 = vrcp.f32 %v1342_v24  ;;  %v1664_v24 = vadd.f32 %v1656_v58, %v1647_v10 }
 0x6d0   :  { %4358 = vmatmul.msk.f32.gmra.mxu2 %vm1060_vm5, %v2330_v36 }
 0x6d5   :  { %v4772_v6 = vpop.eup %4771  ;;  %v6593_v16 = vpop.f32.mrf.mxu0 }
 0x6d6   :  { %v1345_v11 = vpop.xlane.xlu1 %1344  ;;  %v1410_v26 = vmul.f32 %v4772_v6, %v6458_v50  ;;  %v4891_v50 = vld [vmem:[%s7475_s5 + $0xa0] sm:$0xff]  ;;  %v6631_v40 = vpop.f32.mrf.mxu2 }
 0x6d7   :  { %4773 = vrcp.f32 %v1345_v11  ;;  %v6614_v61 = vperm.slane %v4891_v50, 0 }
 0x6d8   :  { %4292 = vmatmul.msk.f32.gmra.mxu0 %vm1060_vm5, %v1410_v26 }
 0x6d9   :  { %v1673_v56 = vmul.f32 %v6614_v61, %v6549_v42  ;;  %v1648_v42 = vmul.f32 %v6609_v12, %v6372_v29  ;;  %v1674_v54 = vmul.f32 %v6614_v61, %v6559_v46 }
 0x6db   :  { %v1681_v6 = vadd.f32 %v1673_v56, %v1664_v24 }
 0x6dd   :  { %v4774_v38 = vpop.eup %4773  ;;  %v6604_v32 = vpop.f32.mrf.mxu0 }
 0x6de   :  { %v1348_v23 = vpop.xlane.xlu1 %1347  ;;  %v1411_v9 = vmul.f32 %v4774_v38, %v6468_v3  ;;  %v6642_v10 = vpop.f32.mrf.mxu2 }
 0x6df   :  { %4775 = vrcp.f32 %v1348_v23  ;;  %v1665_v23 = vadd.f32 %v1657_v22, %v1648_v42 }
 0x6e0   :  { %4293 = vmatmul.msk.f32.gmra.mxu0 %vm1060_vm5, %v1411_v9 }
 0x6e1   :  { %v1682_v31 = vadd.f32 %v1674_v54, %v1665_v23 }
 0x6e5   :  { %v4776_v3 = vpop.eup %4775  ;;  %v1622_v36 = vpop.f32.mrf.mxu0 }
 0x6e6   :  { %v1690_v47 = vmul.f32 %v6623_v19, %v1622_v36  ;;  %v2253_v11 = vpop.xlane.xlu2 %2252  ;;  %v1412_v26 = vmul.f32 %v4776_v3, %v6477_v28  ;;  %v6649_v3 = vpop.f32.mrf.mxu2 }
 0x6e7   :  { %4777 = vrcp.f32 %v2253_v11 }
 0x6e8   :  { %v1698_v38 = vadd.f32 %v1690_v47, %v1681_v6  ;;  %4294 = vmatmul.msk.f32.gmra.mxu0 %vm1060_vm5, %v1412_v26 }
 0x6ea   :  { %4367 = vmatmul.msk.f32.vlgmr.msrb.gmra.mxu3 %vm97_vm0, %v1698_v38 }
 0x6ed   :  { %v4778_v50 = vpop.eup %4777 }
 0x6ee   :  { %v2256_v28 = vpop.xlane.xlu1 %2255  ;;  %v2331_v58 = vmul.f32 %v4778_v50, %v6493_v53  ;;  %v6653_v47 = vpop.f32.mrf.mxu2 }
 0x6ef   :  { %v1625_v9 = vpop.f32.mrf.mxu0  ;;  %4779 = vrcp.f32 %v2256_v28 }
 0x6f0   :  { %v1691_v39 = vmul.f32 %v6623_v19, %v1625_v9  ;;  %4359 = vmatmul.msk.f32.gmra.mxu2 %vm1060_vm5, %v2331_v58 }
 0x6f2   :  { %v1699_v56 = vadd.f32 %v1691_v39, %v1682_v31  ;;  %v1675_v39 = vmul.f32 %v6614_v61, %v6568_v8  ;;  %v1676_v8 = vmul.f32 %v6614_v61, %v6572_v13 }
 0x6f4   :  { %4368 = vmatmul.msk.f32.gmra.mxu3 %vm97_vm0, %v1699_v56 }
 0x6f5   :  { %v4780_v29 = vpop.eup %4779 }
 0x6f6   :  { %v2259_v24 = vpop.xlane.xlu2 %2258  ;;  %v2332_v46 = vmul.f32 %v4780_v29, %v6503_v59  ;;  %v6657_v22 = vpop.f32.mrf.mxu2 }
 0x6f7   :  { %4781 = vrcp.f32 %v2259_v24 }
 0x6f8   :  { %4360 = vmatmul.msk.f32.gmra.mxu2 %vm1060_vm5, %v2332_v46 }
 0x6fd   :  { %v4782_v53 = vpop.eup %4781 }
 0x6fe   :  { %v2262_v36 = vpop.xlane.xlu0 %2261  ;;  %v2333_v6 = vmul.f32 %v4782_v53, %v6509_v52  ;;  %v6662_v28 = vpop.f32.mrf.mxu2 }
 0x6ff   :  { %4783 = vrcp.f32 %v2262_v36 }
 0x700   :  { %4361 = vmatmul.msk.f32.gmra.mxu2 %vm1060_vm5, %v2333_v6 }
 0x705   :  { %v4784_v11 = vpop.eup %4783 }
 0x706   :  { %v2265_v26 = vpop.xlane.xlu1 %2264  ;;  %v2334_v38 = vmul.f32 %v4784_v11, %v6516_v2  ;;  %v6669_v31 = vpop.f32.mrf.mxu2 }
 0x707   :  { %4785 = vrcp.f32 %v2265_v26 }
 0x708   :  { %4362 = vmatmul.msk.f32.gmra.mxu2 %vm1060_vm5, %v2334_v38 }
 0x70d   :  { %v4786_v59 = vpop.eup %4785 }
 0x70e   :  { %v2268_v42 = vpop.xlane.xlu2 %2267  ;;  %v2335_v54 = vmul.f32 %v4786_v59, %v6526_v41  ;;  %v1658_v41 = vmul.f32 %v6600_v21, %v6485_v63  ;;  %v1659_v63 = vmul.f32 %v6600_v21, %v6499_v35  ;;  %v2524_v6 = vpop.f32.mrf.mxu2  ;;  %v1660_v35 = vmul.f32 %v6600_v21, %v6511_v0 }
 0x70f   :  { %4787 = vrcp.f32 %v2268_v42  ;;  %v1651_v42 = vmul.f32 %v6609_v12, %v6410_v51  ;;  %v1661_v51 = vmul.f32 %v6600_v21, %v6520_v7  ;;  %v1653_v7 = vmul.f32 %v6609_v12, %v6432_v55 }
 0x710   :  { %4363 = vmatmul.msk.f32.gmra.mxu2 %vm1060_vm5, %v2335_v54  ;;  %v1680_v55 = vmul.f32 %v6614_v61, %v6604_v32 }
 0x711   :  { %v1668_v13 = vadd.f32 %v1660_v35, %v1651_v42  ;;  %v2580_v42 = vmul.f32 %v6602_v48, %v6600_v21  ;;  %v2581_v48 = vmul.f32 %v6631_v40, %v6600_v21 }
 0x715   :  { %v4788_v52 = vpop.eup %4787 }
 0x716   :  { %v2271_v50 = vpop.xlane.xlu0 %2270  ;;  %v2336_v23 = vmul.f32 %v4788_v52, %v6536_v18  ;;  %v1649_v18 = vmul.f32 %v6609_v12, %v6384_v1  ;;  %v1650_v1 = vmul.f32 %v6609_v12, %v6396_v15  ;;  %v1677_v15 = vmul.f32 %v6614_v61, %v6578_v60  ;;  %v2527_v54 = vpop.f32.mrf.mxu2 }
 0x717   :  { %4789 = vrcp.f32 %v2271_v50  ;;  %v1652_v60 = vmul.f32 %v6609_v12, %v6422_v34  ;;  %v1679_v34 = vmul.f32 %v6614_v61, %v6593_v16 }
 0x718   :  { %4364 = vmatmul.msk.f32.gmra.mxu2 %vm1060_vm5, %v2336_v23  ;;  %v1666_v56 = vadd.f32 %v1658_v41, %v1649_v18  ;;  %v1667_v11 = vadd.f32 %v1659_v63, %v1650_v1  ;;  %v1685_v50 = vadd.f32 %v1677_v15, %v1668_v13  ;;  %v1678_v41 = vmul.f32 %v6614_v61, %v6587_v33 }
 0x719   :  { %v1669_v18 = vadd.f32 %v1661_v51, %v1652_v60  ;;  %v1663_v1 = vmul.f32 %v6600_v21, %v6540_v45  ;;  %v6732_v45 = vld [vmem:[%s7474_s4] sm:$0xff]  ;;  %v2572_v13 = vmul.f32 %v6522_v4, %v6609_v12 }
 0x71a   :  { %v1683_v46 = vadd.f32 %v1675_v39, %v1666_v56  ;;  %v1684_v38 = vadd.f32 %v1676_v8, %v1667_v11 }
 0x71b   :  { %v1686_v56 = vadd.f32 %v1678_v41, %v1669_v18 }
 0x71d   :  { %v4790_v2 = vpop.eup %4789 }
 0x71e   :  { %v2274_v9 = vpop.xlane.xlu1 %2273  ;;  %v2337_v58 = vmul.f32 %v4790_v2, %v6543_v57 }
 0x71f   :  { %4791 = vrcp.f32 %v2274_v9  ;;  %v6695_v9 = vpop.f32.mrf.mxu2 }
 0x720   :  { %4365 = vmatmul.msk.f32.gmra.mxu2 %vm1060_vm5, %v2337_v58 }
 0x725   :  { %v4792_v29 = vpop.eup %4791  ;;  %v1628_v24 = vpop.f32.mrf.mxu0 }
 0x726   :  { %v1692_v57 = vmul.f32 %v6623_v19, %v1628_v24  ;;  %v2338_v53 = vmul.f32 %v4792_v29, %v6553_v17 }
 0x727   :  { %v6697_v0 = vpop.f32.mrf.mxu2 }
 0x728   :  { %v1700_v36 = vadd.f32 %v1692_v57, %v1683_v46  ;;  %4366 = vmatmul.msk.f32.gmra.mxu2 %vm1060_vm5, %v2338_v53  ;;  %v1662_v46 = vmul.f32 %v6600_v21, %v6531_v30  ;;  %v1654_v30 = vmul.f32 %v6609_v12, %v6444_v37  ;;  %v6735_v37 = vperm.slane %v6732_v45, 2 }
 0x72a   :  { %4369 = vmatmul.msk.f32.gmra.mxu3 %vm97_vm0, %v1700_v36  ;;  %v1670_v33 = vadd.f32 %v1662_v46, %v1653_v7  ;;  %v1671_v16 = vadd.f32 %v1663_v1, %v1654_v30  ;;  %v2583_v1 = vmul.f32 %v6649_v3, %v6600_v21  ;;  %v2576_v3 = vmul.f32 %v6566_v5, %v6609_v12 }
 0x72c   :  { %v1687_v63 = vadd.f32 %v1679_v34, %v1670_v33  ;;  %v2582_v34 = vmul.f32 %v6642_v10, %v6600_v21  ;;  %v2575_v10 = vmul.f32 %v6557_v43, %v6609_v12 }
 0x72d   :  { %v1631_v26 = vpop.f32.mrf.mxu0 }
 0x72e   :  { %v1693_v17 = vmul.f32 %v6623_v19, %v1631_v26 }
 0x72f   :  { %v6699_v58 = vpop.f32.mrf.mxu2 }
 0x730   :  { %v1701_v59 = vadd.f32 %v1693_v17, %v1684_v38  ;;  %v1688_v38 = vadd.f32 %v1680_v55, %v1671_v16  ;;  %v2600_v43 = vmul.f32 %v6699_v58, %v6614_v61 }
 0x732   :  { %4370 = vmatmul.msk.f32.gmra.mxu3 %vm97_vm0, %v1701_v59 }
 0x735   :  { %v1634_v52 = vpop.f32.mrf.mxu0 }
 0x736   :  { %v1694_v23 = vmul.f32 %v6623_v19, %v1634_v52  ;;  %v2596_v52 = vmul.f32 %v2524_v6, %v6614_v61  ;;  %v2597_v6 = vmul.f32 %v2527_v54, %v6614_v61  ;;  %v2574_v54 = vmul.f32 %v6545_v14, %v6609_v12 }
 0x737   :  { %v2599_v14 = vmul.f32 %v6697_v0, %v6614_v61 }
 0x738   :  { %v1702_v2 = vadd.f32 %v1694_v23, %v1685_v50  ;;  %v2588_v23 = vadd.f32 %v2580_v42, %v2572_v13  ;;  %v2590_v33 = vadd.f32 %v2582_v34, %v2574_v54  ;;  %v2585_v42 = vmul.f32 %v6657_v22, %v6600_v21 }
 0x739   :  { %v2578_v22 = vmul.f32 %v6585_v20, %v6609_v12 }
 0x73a   :  { %4371 = vmatmul.msk.f32.gmra.mxu3 %vm97_vm0, %v1702_v2  ;;  %v2604_v60 = vadd.f32 %v2596_v52, %v2588_v23 }
 0x743   :  { %v6708_v24 = vpop.f32.mrf.mxu2 }
 0x744   :  { %v2601_v5 = vmul.f32 %v6708_v24, %v6614_v61 }
 0x74b   :  { %v6720_v11 = vpop.f32.mrf.mxu2 }
 0x753   :  { %v6737_v59 = vpop.f32.mrf.mxu2 }
 0x754   :  { %v2603_v20 = vmul.f32 %v6737_v59, %v6614_v61 }
 0x755   :  { %v1637_v39 = vpop.f32.mrf.mxu0 }
 0x756   :  { %v1695_v29 = vmul.f32 %v6623_v19, %v1637_v39 }
 0x758   :  { %v1703_v57 = vadd.f32 %v1695_v29, %v1686_v56 }
 0x75a   :  { %4372 = vmatmul.msk.f32.gmra.mxu3 %vm97_vm0, %v1703_v57 }
 0x75d   :  { %v1640_v53 = vpop.f32.mrf.mxu0 }
 0x75e   :  { %v1696_v36 = vmul.f32 %v6623_v19, %v1640_v53 }
 0x760   :  { %v1704_v8 = vadd.f32 %v1696_v36, %v1687_v63 }
 0x762   :  { %4373 = vmatmul.msk.f32.gmra.mxu3 %vm97_vm0, %v1704_v8 }
 0x765   :  { %v1643_v26 = vpop.f32.mrf.mxu0 }
 0x766   :  { %v1697_v17 = vmul.f32 %v6623_v19, %v1643_v26  ;;  %v2584_v26 = vmul.f32 %v6653_v47, %v6600_v21  ;;  %v2577_v47 = vmul.f32 %v6575_v49, %v6609_v12  ;;  %v2602_v49 = vmul.f32 %v6720_v11, %v6614_v61 }
 0x768   :  { %v1705_v35 = vadd.f32 %v1697_v17, %v1688_v38  ;;  %v2592_v0 = vadd.f32 %v2584_v26, %v2576_v3  ;;  %v2593_v58 = vadd.f32 %v2585_v42, %v2577_v47  ;;  %v7514_v42 = vld [vmem:[#allocation15_spill] sm:$0xff] }
 0x76a   :  { %4374 = vmatmul.msk.f32.gmra.mxu3 %vm97_vm0, %v1705_v35  ;;  %v2608_v35 = vadd.f32 %v2600_v43, %v2592_v0  ;;  %v2609_v52 = vadd.f32 %v2601_v5, %v2593_v58 }
 0x76d   :  { %v2698_v32 = vpop.f32.mrf.mxu3 }
 0x76e   :  { %v2699_v15 = vadd.f32 %v2698_v32, %v6735_v37 }
 0x770   :  { %v6746_v50 = vadd.f32 %v2699_v15, %v5015_v25  ;;  %v2573_v25 = vmul.f32 %v6533_v44, %v6609_v12 }
 0x772   :  { %v2762_v2 = vsel %vm97_vm0, %v6746_v50, 0.0  ;;  %v2589_v29 = vadd.f32 %v2581_v48, %v2573_v25 }
 0x773   :  { %2763 = vadd.xlane.f32.xlu2 %v2762_v2  ;;  %v2548_v51 = vpop.f32.mrf.mxu2  ;;  %v2586_v2 = vmul.f32 %v6662_v28, %v6600_v21  ;;  %v2579_v28 = vmul.f32 %v6591_v62, %v6609_v12 }
 0x774   :  { %v2612_v41 = vmul.f32 %v2548_v51, %v6623_v19  ;;  %v2605_v40 = vadd.f32 %v2597_v6, %v2589_v29 }
 0x775   :  { %v2594_v24 = vadd.f32 %v2586_v2, %v2578_v22  ;;  %v7515_v2 = vld [vmem:[#allocation6_spill] sm:$0xff] }
 0x776   :  { %v2620_v18 = vadd.f32 %v2612_v41, %v2604_v60 }
 0x777   :  { %v2701_v39 = vpop.f32.mrf.mxu3  ;;  %v2610_v41 = vadd.f32 %v2602_v49, %v2594_v24 }
 0x778   :  { %v2702_v4 = vadd.f32 %v2701_v39, %v6735_v37  ;;  %4375 = vmatmul.msk.f32.gmra.mxu3 %vm97_vm0, %v2620_v18  ;;  %v2587_v18 = vmul.f32 %v6669_v31, %v6600_v21  ;;  %v7509_v31 = vld [vmem:[#allocation7_spill] sm:$0xff] }
 0x77a   :  { %v6759_v56 = vadd.f32 %v2702_v4, %v5019_v27  ;;  %v2598_v27 = vmul.f32 %v6695_v9, %v6614_v61  ;;  %v2591_v9 = vadd.f32 %v2583_v1, %v2575_v10  ;;  %v2595_v11 = vadd.f32 %v2587_v18, %v2579_v28 }
 0x77b   :  { %v2551_v46 = vpop.f32.mrf.mxu2 }
 0x77c   :  { %v2765_v57 = vsel %vm97_vm0, %v6759_v56, 0.0  ;;  %v2613_v7 = vmul.f32 %v2551_v46, %v6623_v19  ;;  %v2606_v63 = vadd.f32 %v2598_v27, %v2590_v33  ;;  %v2607_v55 = vadd.f32 %v2599_v14, %v2591_v9  ;;  %v7512_v9 = vld [vmem:[#allocation16_spill] sm:$0xff] }
 0x77d   :  { %2766 = vadd.xlane.f32.xlu0 %v2765_v57  ;;  %v2611_v25 = vadd.f32 %v2603_v20, %v2595_v11 }
 0x77e   :  { %v2621_v44 = vadd.f32 %v2613_v7, %v2605_v40  ;;  %v7508_v40 = vld [vmem:[#allocation5_spill] sm:$0xff] }
 0x780   :  { %4376 = vmatmul.msk.f32.gmra.mxu3 %vm97_vm0, %v2621_v44  ;;  %v7510_v44 = vld [vmem:[#allocation9_spill] sm:$0xff] }
 0x783   :  { %v2554_v53 = vpop.f32.mrf.mxu2 }
 0x784   :  { %v2614_v36 = vmul.f32 %v2554_v53, %v6623_v19 }
 0x786   :  { %v2622_v8 = vadd.f32 %v2614_v36, %v2606_v63  ;;  %v7511_v63 = vld [vmem:[#allocation10_spill] sm:$0xff] }
 0x788   :  { %4377 = vmatmul.msk.f32.gmra.mxu3 %vm97_vm0, %v2622_v8 }
 0x78b   :  { %v2557_v30 = vpop.f32.mrf.mxu2 }
 0x78c   :  { %v2615_v16 = vmul.f32 %v2557_v30, %v6623_v19 }
 0x78e   :  { %v2623_v38 = vadd.f32 %v2615_v16, %v2607_v55  ;;  %v7513_v55 = vld [vmem:[#allocation14_spill] sm:$0xff] }
 0x790   :  { %4378 = vmatmul.msk.f32.gmra.mxu3 %vm97_vm0, %v2623_v38 }
 0x793   :  { %v2560_v17 = vpop.f32.mrf.mxu2 }
 0x794   :  { %v2616_v32 = vmul.f32 %v2560_v17, %v6623_v19 }
 0x796   :  { %v2624_v15 = vadd.f32 %v2616_v32, %v2608_v35 }
 0x798   :  { %4379 = vmatmul.msk.f32.gmra.mxu3 %vm97_vm0, %v2624_v15 }
 0x79b   :  { %v2563_v13 = vpop.f32.mrf.mxu2 }
 0x79c   :  { %v2617_v23 = vmul.f32 %v2563_v13, %v6623_v19 }
 0x79e   :  { %v2625_v51 = vadd.f32 %v2617_v23, %v2609_v52 }
 0x7a0   :  { %4380 = vmatmul.msk.f32.gmra.mxu3 %vm97_vm0, %v2625_v51 }
 0x7a3   :  { %v2566_v60 = vpop.f32.mrf.mxu2 }
 0x7a4   :  { %v2618_v48 = vmul.f32 %v2566_v60, %v6623_v19 }
 0x7a6   :  { %v2626_v39 = vadd.f32 %v2618_v48, %v2610_v41 }
 0x7a8   :  { %4381 = vmatmul.msk.f32.gmra.mxu3 %vm97_vm0, %v2626_v39 }
 0x7ab   :  { %v2569_v4 = vpop.f32.mrf.mxu2 }
 0x7ac   :  { %v2619_v6 = vmul.f32 %v2569_v4, %v6623_v19  ;;  %v7516_v4 = vld [vmem:[#allocation8_spill] sm:$0xff] }
 0x7ad   :  { %v2704_v29 = vpop.f32.mrf.mxu3 }
 0x7ae   :  { %v2627_v46 = vadd.f32 %v2619_v6, %v2611_v25  ;;  %v2705_v57 = vadd.f32 %v2704_v29, %v6735_v37 }
 0x7b0   :  { %v6814_v21 = vadd.f32 %v2705_v57, %v7508_v40  ;;  %4382 = vmatmul.msk.f32.gmra.mxu3 %vm97_vm0, %v2627_v46 }
 0x7b2   :  { %v2768_v62 = vsel %vm97_vm0, %v6814_v21, 0.0 }
 0x7b3   :  { %2769 = vadd.xlane.f32.xlu1 %v2768_v62 }
 0x7b5   :  { %v2707_v12 = vpop.f32.mrf.mxu3 }
 0x7b6   :  { %v2708_v61 = vadd.f32 %v2707_v12, %v6735_v37 }
 0x7b8   :  { %v6821_v59 = vadd.f32 %v2708_v61, %v7509_v31  ;;  %v7517_v61 = vld [vmem:[#allocation11_spill] sm:$0xff] }
 0x7ba   :  { %v2771_v19 = vsel %vm97_vm0, %v6821_v59, 0.0 }
 0x7bb   :  { %2772 = vadd.xlane.f32.xlu2 %v2771_v19 }
 0x7bd   :  { %v2710_v7 = vpop.f32.mrf.mxu3 }
 0x7be   :  { %v2711_v34 = vadd.f32 %v2710_v7, %v6735_v37 }
 0x7c0   :  { %v6827_v54 = vadd.f32 %v2711_v34, %v7510_v44 }
 0x7c2   :  { %v2774_v27 = vsel %vm97_vm0, %v6827_v54, 0.0 }
 0x7c3   :  { %2775 = vadd.xlane.f32.xlu0 %v2774_v27 }
 0x7dd   :  { %v2713_v33 = vpop.f32.mrf.mxu3 }
 0x7de   :  { %v2714_v53 = vadd.f32 %v2713_v33, %v6735_v37 }
 0x7e0   :  { %v6833_v36 = vadd.f32 %v2714_v53, %v7511_v63  ;;  %v7518_v53 = vld [vmem:[#allocation12_spill] sm:$0xff] }
 0x7e2   :  { %v2777_v1 = vsel %vm97_vm0, %v6833_v36, 0.0 }
 0x7e3   :  { %2778 = vadd.xlane.f32.xlu1 %v2777_v1 }
 0x7e5   :  { %v2716_v8 = vpop.f32.mrf.mxu3 }
 0x7e6   :  { %v2717_v10 = vadd.f32 %v2716_v8, %v6735_v37  ;;  %v2764_v14 = vpop.xlane.xlu2 %2763 }
 0x7e7   :  { %v2810_v30 = vmul.f32 %v2764_v14, %v7512_v9  ;;  %v4386_v14 = vld [vmem:[%s7473_s3 + $0x38] sm:$0xff] }
 0x7e8   :  { %v6840_v16 = vadd.f32 %v2717_v10, %v7513_v55  ;;  %3214 = vmatpush.msra.mxu0 %v4386_v14 }
 0x7e9   :  { %v6843_v26 = vsub.f32 %v6746_v50, %v2810_v30 }
 0x7ea   :  { %v2780_v38 = vsel %vm97_vm0, %v6840_v16, 0.0 }
 0x7eb   :  { %2781 = vadd.xlane.f32.xlu0 %v2780_v38  ;;  %v2842_v3 = vmul.f32 %v6843_v26, %v6843_v26  ;;  %v4385_v38 = vld [vmem:[%s7473_s3 + $0x30] sm:$0xff] }
 0x7ec   :  { %3215 = vmatpush.msra.mxu0 %v4385_v38  ;;  %v6961_v38 = vperm.slane %v6732_v45, 3 }
 0x7ed   :  { %v2719_v43 = vpop.f32.mrf.mxu3  ;;  %v2858_v0 = vsel %vm97_vm0, %v2842_v3, 0.0 }
 0x7ee   :  { %v2720_v17 = vadd.f32 %v2719_v43, %v6735_v37  ;;  %2859 = vadd.xlane.f32.xlu2 %v2858_v0  ;;  %v4384_v43 = vld [vmem:[%s7473_s3 + $0x28] sm:$0xff] }
 0x7ef   :  { %3216 = vmatpush.msra.mxu0 %v4384_v43 }
 0x7f0   :  { %v2767_v35 = vpop.xlane.xlu0 %2766  ;;  %v6853_v15 = vadd.f32 %v2720_v17, %v7514_v42 }
 0x7f1   :  { %v2811_v32 = vmul.f32 %v2767_v35, %v7512_v9  ;;  %v4383_v35 = vld [vmem:[%s7473_s3 + $0x20] sm:$0xff] }
 0x7f2   :  { %v2783_v58 = vsel %vm97_vm0, %v6853_v15, 0.0  ;;  %3217 = vmatpush.msra.mxu0 %v4383_v35  ;;  %v6967_v35 = vperm.slane %v6732_v45, 4 }
 0x7f3   :  { %v6856_v47 = vsub.f32 %v6759_v56, %v2811_v32 }
 0x7f5   :  { %v2843_v5 = vmul.f32 %v6856_v47, %v6856_v47 }
 0x7f6   :  { %2784 = vadd.xlane.f32.xlu2 %v2783_v58 }
 0x7f7   :  { %v2861_v13 = vsel %vm97_vm0, %v2843_v5, 0.0  ;;  %v7519_v5 = vld [vmem:[#allocation13_spill] sm:$0xff] }
 0x7f8   :  { %2862 = vadd.xlane.f32.xlu1 %v2861_v13 }
 0x7fb   :  { %v2722_v52 = vpop.f32.mrf.mxu3 }
 0x7fc   :  { %v2723_v23 = vadd.f32 %v2722_v52, %v6735_v37 }
 0x7fe   :  { %v6865_v51 = vadd.f32 %v2723_v23, %v7515_v2 }
 0x800   :  { %v2786_v22 = vsel %vm97_vm0, %v6865_v51, 0.0 }
 0x801   :  { %2787 = vadd.xlane.f32.xlu1 %v2786_v22 }
 0x803   :  { %v2725_v49 = vpop.f32.mrf.mxu3 }
 0x804   :  { %v2726_v18 = vadd.f32 %v2725_v49, %v6735_v37 }
 0x806   :  { %v6879_v25 = vadd.f32 %v2726_v18, %v7516_v4  ;;  %v7520_v18 = vld [vmem:[#allocation17_spill] sm:$0xff] }
 0x808   :  { %v2789_v57 = vsel %vm97_vm0, %v6879_v25, 0.0 }
 0x80b   :  { %v2728_v11 = vpop.f32.mrf.mxu3 }
 0x80c   :  { %v2729_v46 = vadd.f32 %v2728_v11, %v6735_v37 }
 0x80e   :  { %v6892_v31 = vadd.f32 %v2729_v46, %v7517_v61 }
 0x810   :  { %v2792_v33 = vsel %vm97_vm0, %v6892_v31, 0.0 }
 0x813   :  { %v2731_v7 = vpop.f32.mrf.mxu3 }
 0x814   :  { %v2732_v44 = vadd.f32 %v2731_v7, %v6735_v37 }
 0x816   :  { %v6904_v63 = vadd.f32 %v2732_v44, %v7518_v53  ;;  %v7521_v53 = vld [vmem:[#allocation18_spill] sm:$0xff] }
 0x818   :  { %v2795_v1 = vsel %vm97_vm0, %v6904_v63, 0.0 }
 0x81b   :  { %v2734_v30 = vpop.f32.mrf.mxu3 }
 0x81c   :  { %v2735_v0 = vadd.f32 %v2734_v30, %v6735_v37 }
 0x81e   :  { %v6930_v58 = vadd.f32 %v2735_v0, %v7519_v5 }
 0x823   :  { %v2737_v23 = vpop.f32.mrf.mxu3 }
 0x826   :  { %v2770_v24 = vpop.xlane.xlu1 %2769 }
 0x827   :  { %v2812_v60 = vmul.f32 %v2770_v24, %v7512_v9  ;;  %v2738_v24 = vadd.f32 %v2737_v23, %v6735_v37 }
 0x829   :  { %v6871_v41 = vsub.f32 %v6814_v21, %v2812_v60  ;;  %v2798_v60 = vsel %vm97_vm0, %v6930_v58, 0.0 }
 0x82b   :  { %v2844_v48 = vmul.f32 %v6871_v41, %v6871_v41 }
 0x82d   :  { %v2864_v39 = vsel %vm97_vm0, %v2844_v48, 0.0 }
 0x82e   :  { %2865 = vadd.xlane.f32.xlu0 %v2864_v39  ;;  %v2773_v28 = vpop.xlane.xlu2 %2772  ;;  %v6943_v39 = vadd.f32 %v2738_v24, %v7520_v18 }
 0x82f   :  { %v2813_v20 = vmul.f32 %v2773_v28, %v7512_v9 }
 0x831   :  { %v6882_v6 = vsub.f32 %v6821_v59, %v2813_v20 }
 0x833   :  { %v2845_v29 = vmul.f32 %v6882_v6, %v6882_v6 }
 0x835   :  { %v2867_v40 = vsel %vm97_vm0, %v2845_v29, 0.0 }
 0x836   :  { %v2776_v62 = vpop.xlane.xlu0 %2775  ;;  %2790 = vadd.xlane.f32.xlu0 %v2789_v57  ;;  %2868 = vadd.xlane.f32.xlu2 %v2867_v40  ;;  %v2740_v57 = vpop.f32.mrf.mxu3 }
 0x837   :  { %v2814_v12 = vmul.f32 %v2776_v62, %v7512_v9 }
 0x839   :  { %v6895_v19 = vsub.f32 %v6827_v54, %v2814_v12  ;;  %v2801_v12 = vsel %vm97_vm0, %v6943_v39, 0.0 }
 0x83b   :  { %v2846_v34 = vmul.f32 %v6895_v19, %v6895_v19 }
 0x83d   :  { %v2870_v27 = vsel %vm97_vm0, %v2846_v34, 0.0  ;;  %v2741_v34 = vadd.f32 %v2740_v57, %v6735_v37 }
 0x83e   :  { %2871 = vadd.xlane.f32.xlu1 %v2870_v27  ;;  %2793 = vadd.xlane.f32.xlu2 %v2792_v33 }
 0x846   :  { %2796 = vadd.xlane.f32.xlu1 %v2795_v1  ;;  %v6957_v1 = vadd.f32 %v2741_v34, %v7521_v53 }
 0x848   :  { %v2804_v5 = vsel %vm97_vm0, %v6957_v1, 0.0 }
 0x856   :  { %v2779_v8 = vpop.xlane.xlu1 %2778 }
 0x857   :  { %v2815_v10 = vmul.f32 %v2779_v8, %v7512_v9 }
 0x859   :  { %v6913_v55 = vsub.f32 %v6833_v36, %v2815_v10 }
 0x85b   :  { %v2847_v3 = vmul.f32 %v6913_v55, %v6913_v55 }
 0x85d   :  { %v2873_v17 = vsel %vm97_vm0, %v2847_v3, 0.0 }
 0x85e   :  { %v2782_v32 = vpop.xlane.xlu0 %2781  ;;  %2874 = vadd.xlane.f32.xlu0 %v2873_v17  ;;  %v2743_v17 = vpop.f32.mrf.mxu3 }
 0x85f   :  { %v2816_v42 = vmul.f32 %v2782_v32, %v7512_v9 }
 0x861   :  { %v6933_v13 = vsub.f32 %v6840_v16, %v2816_v42  ;;  %v2860_v52 = vpop.xlane.xlu2 %2859 }
 0x862   :  { %v2906_v2 = vmul.f32 %v2860_v52, %v7512_v9 }
 0x863   :  { %v2848_v22 = vmul.f32 %v6933_v13, %v6933_v13 }
 0x864   :  { %v2922_v49 = vadd.f32 1e-05, %v2906_v2 }
 0x865   :  { %v2876_v48 = vsel %vm97_vm0, %v2848_v22, 0.0  ;;  %v2744_v22 = vadd.f32 %v2743_v17, %v6735_v37 }
 0x866   :  { %4793 = vrsqrt.f32 %v2922_v49  ;;  %2799 = vadd.xlane.f32.xlu0 %v2798_v60  ;;  %2877 = vadd.xlane.f32.xlu2 %v2876_v48  ;;  %vm2944_vm7 = vweird.f32 %v2922_v49  ;;  %v7522_v48 = vld [vmem:[#allocation19_spill] sm:$0xff] }
 0x867   :  { %v6980_v18 = vadd.f32 %v2744_v22, %v7522_v48 }
 0x869   :  { %v2785_v28 = vpop.xlane.xlu2 %2784  ;;  %v2807_v37 = vsel %vm97_vm0, %v6980_v18, 0.0 }
 0x86a   :  { %v2817_v20 = vmul.f32 %v2785_v28, %v7512_v9 }
 0x86b   :  { %v2863_v11 = vpop.xlane.xlu1 %2862 }
 0x86c   :  { %v2907_v4 = vmul.f32 %v2863_v11, %v7512_v9  ;;  %v4794_v29 = vpop.eup %4793  ;;  %v6948_v46 = vsub.f32 %v6853_v15, %v2817_v20 }
 0x86d   :  { %v2939_v40 = vmul.f32 %v4794_v29, %v2922_v49  ;;  %vm2945_vm6 = vweird.f32 %v4794_v29 }
 0x86e   :  { %v2923_v62 = vadd.f32 1e-05, %v2907_v4  ;;  %2802 = vadd.xlane.f32.xlu2 %v2801_v12  ;;  %v2849_v61 = vmul.f32 %v6948_v46, %v6948_v46  ;;  %vm2946_vm8 = vmor %vm2944_vm7, %vm2945_vm6 }
 0x86f   :  { %v2940_v7 = vmul.f32 %v4794_v29, %v2939_v40 }
 0x870   :  { %4795 = vrsqrt.f32 %v2923_v62  ;;  %v2879_v44 = vsel %vm97_vm0, %v2849_v61, 0.0  ;;  %vm2954_vm10 = vweird.f32 %v2923_v62 }
 0x871   :  { %v2941_v27 = vmul.f32 0.5, %v2940_v7  ;;  %2880 = vadd.xlane.f32.xlu1 %v2879_v44 }
 0x873   :  { %v2942_v33 = vsub.f32 1.5, %v2941_v27 }
 0x874   :  { %v2788_v8 = vpop.xlane.xlu1 %2787 }
 0x875   :  { %v2943_v14 = vmul.f32 %v4794_v29, %v2942_v33  ;;  %v2818_v30 = vmul.f32 %v2788_v8, %v7512_v9 }
 0x876   :  { %v4796_v10 = vpop.eup %4795 }
 0x877   :  { %v2949_v3 = vmul.f32 %v4796_v10, %v2923_v62  ;;  %v2947_v43 = vsel %vm2946_vm8, %v4794_v29, %v2943_v14  ;;  %v6964_v0 = vsub.f32 %v6865_v51, %v2818_v30  ;;  %vm2955_vm9 = vweird.f32 %v4796_v10 }
 0x878   :  { %v3098_v32 = vmul.f32 %v2947_v43, %v6843_v26  ;;  %vm2956_vm11 = vmor %vm2954_vm10, %vm2955_vm9 }
 0x879   :  { %v2950_v42 = vmul.f32 %v4796_v10, %v2949_v3  ;;  %2805 = vadd.xlane.f32.xlu1 %v2804_v5  ;;  %v2850_v52 = vmul.f32 %v6964_v0, %v6964_v0 }
 0x87a   :  { %v3115_v23 = vmul.f32 %v6961_v38, %v3098_v32 }
 0x87b   :  { %v2951_v2 = vmul.f32 0.5, %v2950_v42  ;;  %v2882_v49 = vsel %vm97_vm0, %v2850_v52, 0.0 }
 0x87c   :  { %v3132_v24 = vadd.f32 %v6967_v35, %v3115_v23  ;;  %2883 = vadd.xlane.f32.xlu0 %v2882_v49 }
 0x87d   :  { %v2952_v60 = vsub.f32 1.5, %v2951_v2 }
 0x87e   :  { %4387 = vmatmul.msk.f32.vlgmr.msra.gmra.mxu0 %vm97_vm0, %v3132_v24 }
 0x87f   :  { %v2953_v26 = vmul.f32 %v4796_v10, %v2952_v60 }
 0x881   :  { %v2957_v28 = vsel %vm2956_vm11, %v4796_v10, %v2953_v26 }
 0x882   :  { %v3099_v20 = vmul.f32 %v2957_v28, %v6856_v47 }
 0x884   :  { %v3116_v11 = vmul.f32 %v6961_v38, %v3099_v20  ;;  %2808 = vadd.xlane.f32.xlu0 %v2807_v37 }
 0x886   :  { %v3133_v4 = vadd.f32 %v6967_v35, %v3116_v11 }
 0x888   :  { %4388 = vmatmul.msk.f32.gmra.mxu0 %vm97_vm0, %v3133_v4 }
 0x8a1   :  { %v2866_v29 = vpop.xlane.xlu0 %2865 }
 0x8a2   :  { %v2908_v57 = vmul.f32 %v2866_v29, %v7512_v9 }
 0x8a4   :  { %v2924_v40 = vadd.f32 1e-05, %v2908_v57 }
 0x8a6   :  { %4797 = vrsqrt.f32 %v2924_v40  ;;  %vm2964_vm13 = vweird.f32 %v2924_v40 }
 0x8a9   :  { %v2791_v62 = vpop.xlane.xlu0 %2790  ;;  %v2869_v12 = vpop.xlane.xlu2 %2868 }
 0x8aa   :  { %v2819_v61 = vmul.f32 %v2791_v62, %v7512_v9  ;;  %v2909_v47 = vmul.f32 %v2869_v12, %v7512_v9 }
 0x8ac   :  { %v4798_v7 = vpop.eup %4797  ;;  %v6992_v34 = vsub.f32 %v6879_v25, %v2819_v61  ;;  %v2925_v44 = vadd.f32 1e-05, %v2909_v47 }
 0x8ad   :  { %v2959_v27 = vmul.f32 %v4798_v7, %v2924_v40  ;;  %vm2965_vm12 = vweird.f32 %v4798_v7 }
 0x8ae   :  { %4799 = vrsqrt.f32 %v2925_v44  ;;  %v2851_v33 = vmul.f32 %v6992_v34, %v6992_v34  ;;  %vm2966_vm14 = vmor %vm2964_vm13, %vm2965_vm12  ;;  %vm2974_vm1 = vweird.f32 %v2925_v44 }
 0x8af   :  { %v2960_v53 = vmul.f32 %v4798_v7, %v2959_v27 }
 0x8b0   :  { %v2885_v8 = vsel %vm97_vm0, %v2851_v33, 0.0 }
 0x8b1   :  { %v2961_v10 = vmul.f32 0.5, %v2960_v53  ;;  %v2872_v14 = vpop.xlane.xlu1 %2871  ;;  %2886 = vadd.xlane.f32.xlu2 %v2885_v8  ;;  %v2794_v30 = vpop.xlane.xlu2 %2793 }
 0x8b2   :  { %v2910_v3 = vmul.f32 %v2872_v14, %v7512_v9  ;;  %v2820_v43 = vmul.f32 %v2794_v30, %v7512_v9 }
 0x8b3   :  { %v2962_v17 = vsub.f32 1.5, %v2961_v10 }
 0x8b4   :  { %v4800_v32 = vpop.eup %4799  ;;  %v2926_v42 = vadd.f32 1e-05, %v2910_v3  ;;  %v7000_v5 = vsub.f32 %v6892_v31, %v2820_v43 }
 0x8b5   :  { %v2963_v52 = vmul.f32 %v4798_v7, %v2962_v17  ;;  %v2969_v23 = vmul.f32 %v4800_v32, %v2925_v44  ;;  %vm2975_vm15 = vweird.f32 %v4800_v32 }
 0x8b6   :  { %4801 = vrsqrt.f32 %v2926_v42  ;;  %v2852_v2 = vmul.f32 %v7000_v5, %v7000_v5  ;;  %vm2976_vm2 = vmor %vm2974_vm1, %vm2975_vm15  ;;  %vm2984_vm4 = vweird.f32 %v2926_v42 }
 0x8b7   :  { %v2967_v22 = vsel %vm2966_vm14, %v4798_v7, %v2963_v52  ;;  %v2970_v49 = vmul.f32 %v4800_v32, %v2969_v23 }
 0x8b8   :  { %v3100_v24 = vmul.f32 %v2967_v22, %v6871_v41  ;;  %v2888_v60 = vsel %vm97_vm0, %v2852_v2, 0.0 }
 0x8b9   :  { %v2971_v26 = vmul.f32 0.5, %v2970_v49  ;;  %v2797_v48 = vpop.xlane.xlu1 %2796  ;;  %2889 = vadd.xlane.f32.xlu1 %v2888_v60 }
 0x8ba   :  { %v2821_v28 = vmul.f32 %v2797_v48, %v7512_v9  ;;  %v3117_v20 = vmul.f32 %v6961_v38, %v3100_v24 }
 0x8bb   :  { %v2972_v37 = vsub.f32 1.5, %v2971_v26 }
 0x8bc   :  { %v4802_v11 = vpop.eup %4801  ;;  %v7009_v4 = vsub.f32 %v6904_v63, %v2821_v28  ;;  %v3134_v29 = vadd.f32 %v6967_v35, %v3117_v20 }
 0x8bd   :  { %v2973_v57 = vmul.f32 %v4800_v32, %v2972_v37  ;;  %v2979_v41 = vmul.f32 %v4802_v11, %v2926_v42  ;;  %vm2985_vm3 = vweird.f32 %v4802_v11 }
 0x8be   :  { %4389 = vmatmul.msk.f32.gmra.mxu0 %vm97_vm0, %v3134_v29  ;;  %v2853_v40 = vmul.f32 %v7009_v4, %v7009_v4  ;;  %vm2986_vm6 = vmor %vm2984_vm4, %vm2985_vm3 }
 0x8bf   :  { %v2977_v62 = vsel %vm2976_vm2, %v4800_v32, %v2973_v57  ;;  %v2980_v12 = vmul.f32 %v4802_v11, %v2979_v41 }
 0x8c0   :  { %v3101_v61 = vmul.f32 %v2977_v62, %v6882_v6  ;;  %v2891_v47 = vsel %vm97_vm0, %v2853_v40, 0.0 }
 0x8c1   :  { %v2981_v7 = vmul.f32 0.5, %v2980_v12  ;;  %2892 = vadd.xlane.f32.xlu2 %v2891_v47 }
 0x8c2   :  { %v3118_v27 = vmul.f32 %v6961_v38, %v3101_v61 }
 0x8c3   :  { %v2982_v33 = vsub.f32 1.5, %v2981_v7 }
 0x8c4   :  { %v3135_v44 = vadd.f32 %v6967_v35, %v3118_v27 }
 0x8c5   :  { %v2983_v53 = vmul.f32 %v4802_v11, %v2982_v33 }
 0x8c6   :  { %4390 = vmatmul.msk.f32.gmra.mxu0 %vm97_vm0, %v3135_v44 }
 0x8c7   :  { %v2987_v8 = vsel %vm2986_vm6, %v4802_v11, %v2983_v53 }
 0x8c8   :  { %v3102_v10 = vmul.f32 %v2987_v8, %v6895_v19 }
 0x8ca   :  { %v3119_v6 = vmul.f32 %v6961_v38, %v3102_v10 }
 0x8cc   :  { %v3136_v14 = vadd.f32 %v6967_v35, %v3119_v6 }
 0x8ce   :  { %4391 = vmatmul.msk.f32.gmra.mxu0 %vm97_vm0, %v3136_v14 }
 0x8d1   :  { %v2875_v30 = vpop.xlane.xlu0 %2874 }
 0x8d2   :  { %v2911_v3 = vmul.f32 %v2875_v30, %v7512_v9 }
 0x8d4   :  { %v2927_v43 = vadd.f32 1e-05, %v2911_v3 }
 0x8d6   :  { %4803 = vrsqrt.f32 %v2927_v43  ;;  %vm2994_vm8 = vweird.f32 %v2927_v43 }
 0x8d9   :  { %v2800_v17 = vpop.xlane.xlu0 %2799  ;;  %v2878_v32 = vpop.xlane.xlu2 %2877 }
 0x8da   :  { %v2822_v42 = vmul.f32 %v2800_v17, %v7512_v9  ;;  %v2912_v52 = vmul.f32 %v2878_v32, %v7512_v9 }
 0x8dc   :  { %v4804_v23 = vpop.eup %4803  ;;  %v7028_v19 = vsub.f32 %v6930_v58, %v2822_v42  ;;  %v2928_v2 = vadd.f32 1e-05, %v2912_v52 }
 0x8dd   :  { %v2989_v22 = vmul.f32 %v4804_v23, %v2927_v43  ;;  %vm2995_vm7 = vweird.f32 %v4804_v23 }
 0x8de   :  { %4805 = vrsqrt.f32 %v2928_v2  ;;  %v2854_v49 = vmul.f32 %v7028_v19, %v7028_v19  ;;  %vm2996_vm9 = vmor %vm2994_vm8, %vm2995_vm7  ;;  %vm3004_vm11 = vweird.f32 %v2928_v2 }
 0x8df   :  { %v2990_v24 = vmul.f32 %v4804_v23, %v2989_v22 }
 0x8e0   :  { %v2894_v60 = vsel %vm97_vm0, %v2854_v49, 0.0 }
 0x8e1   :  { %v2991_v26 = vmul.f32 0.5, %v2990_v24  ;;  %2895 = vadd.xlane.f32.xlu0 %v2894_v60  ;;  %v2803_v48 = vpop.xlane.xlu2 %2802 }
 0x8e2   :  { %v2823_v28 = vmul.f32 %v2803_v48, %v7512_v9 }
 0x8e3   :  { %v2992_v20 = vsub.f32 1.5, %v2991_v26 }
 0x8e4   :  { %v4806_v37 = vpop.eup %4805  ;;  %v7035_v11 = vsub.f32 %v6943_v39, %v2823_v28  ;;  %v2881_v29 = vpop.xlane.xlu1 %2880 }
 0x8e5   :  { %v2993_v57 = vmul.f32 %v4804_v23, %v2992_v20  ;;  %v2999_v41 = vmul.f32 %v4806_v37, %v2928_v2  ;;  %v2913_v40 = vmul.f32 %v2881_v29, %v7512_v9  ;;  %vm3005_vm10 = vweird.f32 %v4806_v37 }
 0x8e6   :  { %v2855_v62 = vmul.f32 %v7035_v11, %v7035_v11  ;;  %vm3006_vm12 = vmor %vm3004_vm11, %vm3005_vm10  ;;  %v7059_v20 = vperm.slane %v6732_v45, 5 }
 0x8e7   :  { %v2997_v12 = vsel %vm2996_vm9, %v4804_v23, %v2993_v57  ;;  %v3000_v61 = vmul.f32 %v4806_v37, %v2999_v41  ;;  %v2929_v47 = vadd.f32 1e-05, %v2913_v40 }
 0x8e8   :  { %v3103_v7 = vmul.f32 %v2997_v12, %v6913_v55  ;;  %v2897_v27 = vsel %vm97_vm0, %v2855_v62, 0.0 }
 0x8e9   :  { %v3001_v33 = vmul.f32 0.5, %v3000_v61  ;;  %4807 = vrsqrt.f32 %v2929_v47  ;;  %2898 = vadd.xlane.f32.xlu1 %v2897_v27  ;;  %vm3014_vm14 = vweird.f32 %v2929_v47 }
 0x8ea   :  { %v3120_v44 = vmul.f32 %v6961_v38, %v3103_v7 }
 0x8eb   :  { %v3002_v53 = vsub.f32 1.5, %v3001_v33 }
 0x8ec   :  { %v2806_v8 = vpop.xlane.xlu1 %2805  ;;  %v3137_v10 = vadd.f32 %v6967_v35, %v3120_v44 }
 0x8ed   :  { %v3003_v6 = vmul.f32 %v4806_v37, %v3002_v53  ;;  %v2824_v14 = vmul.f32 %v2806_v8, %v7512_v9 }
 0x8ee   :  { %4392 = vmatmul.msk.f32.gmra.mxu0 %vm97_vm0, %v3137_v10 }
 0x8ef   :  { %v4808_v55 = vpop.eup %4807  ;;  %v3007_v30 = vsel %vm3006_vm12, %v4806_v37, %v3003_v6  ;;  %v7047_v3 = vsub.f32 %v6957_v1, %v2824_v14  ;;  %v2884_v43 = vpop.xlane.xlu0 %2883 }
 0x8f0   :  { %v3104_v17 = vmul.f32 %v3007_v30, %v6933_v13  ;;  %v3009_v32 = vmul.f32 %v4808_v55, %v2929_v47  ;;  %v2914_v42 = vmul.f32 %v2884_v43, %v7512_v9  ;;  %vm3015_vm13 = vweird.f32 %v4808_v55 }
 0x8f1   :  { %v2856_v52 = vmul.f32 %v7047_v3, %v7047_v3  ;;  %vm3016_vm15 = vmor %vm3014_vm14, %vm3015_vm13 }
 0x8f2   :  { %v3010_v23 = vmul.f32 %v4808_v55, %v3009_v32  ;;  %v2930_v2 = vadd.f32 1e-05, %v2914_v42  ;;  %v3121_v22 = vmul.f32 %v6961_v38, %v3104_v17 }
 0x8f3   :  { %v2900_v49 = vsel %vm97_vm0, %v2856_v52, 0.0 }
 0x8f4   :  { %v3011_v24 = vmul.f32 0.5, %v3010_v23  ;;  %4809 = vrsqrt.f32 %v2930_v2  ;;  %2901 = vadd.xlane.f32.xlu2 %v2900_v49  ;;  %v3138_v60 = vadd.f32 %v6967_v35, %v3121_v22  ;;  %vm3024_vm2 = vweird.f32 %v2930_v2 }
 0x8f6   :  { %v3012_v26 = vsub.f32 1.5, %v3011_v24  ;;  %4393 = vmatmul.msk.f32.gmra.mxu0 %vm97_vm0, %v3138_v60  ;;  %v4405_v60 = vld [vmem:[%s7473_s3 + $0x50] sm:$0xff] }
 0x8f7   :  { %v2809_v13 = vpop.xlane.xlu0 %2808 }
 0x8f8   :  { %v3013_v48 = vmul.f32 %v4808_v55, %v3012_v26  ;;  %v2825_v28 = vmul.f32 %v2809_v13, %v7512_v9 }
 0x8fa   :  { %v4810_v37 = vpop.eup %4809  ;;  %v3017_v29 = vsel %vm3016_vm15, %v4808_v55, %v3013_v48  ;;  %v7062_v57 = vsub.f32 %v6980_v18, %v2825_v28  ;;  %v4404_v28 = vld [vmem:[%s7473_s3 + $0x48] sm:$0xff] }
 0x8fb   :  { %v3105_v41 = vmul.f32 %v3017_v29, %v6948_v46  ;;  %v3019_v40 = vmul.f32 %v4810_v37, %v2930_v2  ;;  %v3219_v62 = vpop.f32.mrf.mxu0  ;;  %vm3025_vm1 = vweird.f32 %v4810_v37  ;;  %v4403_v29 = vld [vmem:[%s7473_s3 + $0x40] sm:$0xff] }
 0x8fc   :  { %v7066_v12 = vadd.f32 %v3219_v62, %v7059_v20  ;;  %v2857_v61 = vmul.f32 %v7062_v57, %v7062_v57  ;;  %vm3026_vm3 = vmor %vm3024_vm2, %vm3025_vm1 }
 0x8fd   :  { %v3020_v47 = vmul.f32 %v4810_v37, %v3019_v40  ;;  %v3122_v45 = vmul.f32 %v6961_v38, %v3105_v41 }
 0x8fe   :  { %v7072_v7 = vmul.f32 0.70710677, %v7066_v12  ;;  %v2903_v27 = vsel %vm97_vm0, %v2857_v61, 0.0 }
 0x8ff   :  { %v3021_v33 = vmul.f32 0.5, %v3020_v47  ;;  %2904 = vadd.xlane.f32.xlu0 %v2903_v27  ;;  %v3139_v46 = vadd.f32 %v6967_v35, %v3122_v45 }
 0x900   :  { %v3299_v44 = vand.u32 2147483647, %v7072_v7  ;;  %vm3827_vm13 = vcmp.ge.f32.partialorder %v7072_v7, 0.0 }
 0x901   :  { %v3022_v53 = vsub.f32 1.5, %v3021_v33  ;;  %4394 = vmatmul.msk.f32.gmra.mxu0 %vm97_vm0, %v3139_v46 }
 0x902   :  { %v3315_v8 = vmul.f32 0.3275911, %v3299_v44  ;;  %v3731_v47 = vsub.f32 0.0, %v3299_v44 }
 0x903   :  { %v3023_v10 = vmul.f32 %v4810_v37, %v3022_v53 }
 0x904   :  { %v3331_v6 = vadd.f32 1.0, %v3315_v8  ;;  %v3747_v8 = vmul.f32 %v3731_v47, %v3299_v44 }
 0x905   :  { %v3222_v14 = vpop.f32.mrf.mxu0  ;;  %v3027_v55 = vsel %vm3026_vm3, %v4810_v37, %v3023_v10 }
 0x906   :  { %v7079_v30 = vadd.f32 %v3222_v14, %v7059_v20  ;;  %v3106_v43 = vmul.f32 %v3027_v55, %v6964_v0  ;;  %4811 = vrcp.f32 %v3331_v6  ;;  %v4406_v0 = vld [vmem:[%s7473_s3 + $0x58] sm:$0xff]  ;;  %v3358_v26 = vand.u32 2147483648, %v3331_v6 }
 0x907   :  { %3973 = vmatpush.msra.mxu1 %v4406_v0  ;;  %v3356_v48 = vand.u32 2147483647, %v3331_v6  ;;  %vm3352_vm6 = vweird.f32 %v3331_v6 }
 0x908   :  { %v7083_v17 = vmul.f32 0.70710677, %v7079_v30  ;;  %v3123_v32 = vmul.f32 %v6961_v38, %v3106_v43  ;;  %v3359_v41 = vor.u32 1.1754944e-38, %v3358_v26 }
 0x909   :  { %3974 = vmatpush.msra.mxu1 %v4405_v60  ;;  %vm3357_vm8 = vcmp.eq.f32.partialorder %v3356_v48, 8.507059e+37 }
 0x90a   :  { %v3300_v42 = vand.u32 2147483647, %v7083_v17  ;;  %v3140_v52 = vadd.f32 %v6967_v35, %v3123_v32  ;;  %vm3828_vm15 = vcmp.ge.f32.partialorder %v7083_v17, 0.0 }
 0x90b   :  { %3975 = vmatpush.msra.mxu1 %v4404_v28 }
 0x90c   :  { %v3316_v23 = vmul.f32 0.3275911, %v3300_v42  ;;  %v4812_v2 = vpop.eup %4811  ;;  %4395 = vmatmul.msk.f32.gmra.mxu0 %vm97_vm0, %v3140_v52  ;;  %v3763_v52 = vmul.f32 1.442695, %v3747_v8  ;;  %v3732_v0 = vsub.f32 0.0, %v3300_v42 }
 0x90d   :  { %v3348_v22 = vmul.f32 %v4812_v2, %v3331_v6  ;;  %vm3353_vm4 = vweird.f32 %v4812_v2  ;;  %3976 = vmatpush.msra.mxu1 %v4403_v29 }
 0x90e   :  { %v3332_v49 = vadd.f32 1.0, %v3316_v23  ;;  %vm3354_vm7 = vmor %vm3352_vm6, %vm3353_vm4 }
 0x90f   :  { %v3349_v24 = vsub.f32 1.0, %v3348_v22 }
 0x910   :  { %4813 = vrcp.f32 %v3332_v49  ;;  %v3373_v53 = vand.u32 2147483648, %v3332_v49  ;;  %v3371_v6 = vand.u32 2147483647, %v3332_v49  ;;  %vm3367_vm10 = vweird.f32 %v3332_v49 }
 0x911   :  { %v3350_v13 = vmul.f32 %v4812_v2, %v3349_v24  ;;  %4815 = vpow2.f32 %v3763_v52 }
 0x912   :  { %v3374_v32 = vor.u32 1.1754944e-38, %v3373_v53  ;;  %vm3372_vm12 = vcmp.eq.f32.partialorder %v3371_v6, 8.507059e+37 }
 0x913   :  { %v3351_v37 = vadd.f32 %v4812_v2, %v3350_v13  ;;  %v3748_v13 = vmul.f32 %v3732_v0, %v3300_v42 }
 0x915   :  { %v3355_v62 = vsel %vm3354_vm7, %v4812_v2, %v3351_v37 }
 0x916   :  { %v4814_v40 = vpop.eup %4813  ;;  %v3360_v61 = vsel %vm3357_vm8, %v3359_v41, %v3355_v62  ;;  %v3765_v62 = vmul.f32 1.442695, %v3748_v13 }
 0x917   :  { %v3363_v45 = vmul.f32 %v4814_v40, %v3332_v49  ;;  %v3587_v27 = vmul.f32 1.0614054, %v3360_v61  ;;  %vm3368_vm9 = vweird.f32 %v4814_v40 }
 0x918   :  { %vm3369_vm11 = vmor %vm3367_vm10, %vm3368_vm9 }
 0x919   :  { %v3364_v33 = vsub.f32 1.0, %v3363_v45  ;;  %v3603_v46 = vadd.f32 -1.4531521, %v3587_v27 }
 0x91b   :  { %v3365_v10 = vmul.f32 %v4814_v40, %v3364_v33  ;;  %v3619_v14 = vmul.f32 %v3603_v46, %v3360_v61 }
 0x91d   :  { %v3366_v55 = vadd.f32 %v4814_v40, %v3365_v10  ;;  %v3635_v43 = vadd.f32 1.4214138, %v3619_v14 }
 0x91f   :  { %v3370_v23 = vsel %vm3369_vm11, %v4814_v40, %v3366_v55  ;;  %v3651_v2 = vmul.f32 %v3635_v43, %v3360_v61  ;;  %v4816_v40 = vpop.eup %4815  ;;  %v3267_v43 = vmul.f32 0.5, %v7066_v12 }
 0x920   :  { %v3375_v22 = vsel %vm3372_vm12, %v3374_v32, %v3370_v23 }
 0x921   :  { %v3588_v24 = vmul.f32 1.0614054, %v3375_v22  ;;  %v3667_v60 = vadd.f32 -0.28449672, %v3651_v2 }
 0x923   :  { %v3604_v26 = vadd.f32 -1.4531521, %v3588_v24  ;;  %v3683_v44 = vmul.f32 %v3667_v60, %v3360_v61 }
 0x924   :  { %v2887_v28 = vpop.xlane.xlu2 %2886 }
 0x925   :  { %v3620_v48 = vmul.f32 %v3604_v26, %v3375_v22  ;;  %v3699_v37 = vadd.f32 0.2548296, %v3683_v44  ;;  %v2915_v49 = vmul.f32 %v2887_v28, %v7512_v9 }
 0x927   :  { %v3636_v29 = vadd.f32 1.4214138, %v3620_v48  ;;  %v3715_v41 = vmul.f32 %v3699_v37, %v3360_v61  ;;  %v2931_v47 = vadd.f32 1e-05, %v2915_v49 }
 0x929   :  { %v3652_v45 = vmul.f32 %v3636_v29, %v3375_v22  ;;  %v3795_v27 = vmul.f32 %v4816_v40, %v3715_v41  ;;  %4817 = vrsqrt.f32 %v2931_v47  ;;  %vm3034_vm1 = vweird.f32 %v2931_v47 }
 0x92a   :  { %4819 = vpow2.f32 %v3765_v62  ;;  %v3268_v41 = vmul.f32 0.5, %v7079_v30 }
 0x92b   :  { %v3668_v33 = vadd.f32 -0.28449672, %v3652_v45  ;;  %v3811_v46 = vsub.f32 1.0, %v3795_v27 }
 0x92c   :  { %v2890_v8 = vpop.xlane.xlu1 %2889 }
 0x92d   :  { %v3684_v53 = vmul.f32 %v3668_v33, %v3375_v22  ;;  %v3843_v10 = vsub.f32 0.0, %v3811_v46  ;;  %v2916_v42 = vmul.f32 %v2890_v8, %v7512_v9 }
 0x92f   :  { %v3700_v6 = vadd.f32 0.2548296, %v3684_v53  ;;  %v4818_v14 = vpop.eup %4817  ;;  %v3859_v55 = vsel %vm3827_vm13, %v3811_v46, %v3843_v10  ;;  %v2932_v61 = vadd.f32 1e-05, %v2916_v42 }
 0x930   :  { %v3875_v32 = vadd.f32 1.0, %v3859_v55  ;;  %v3029_v23 = vmul.f32 %v4818_v14, %v2931_v47  ;;  %v4820_v2 = vpop.eup %4819  ;;  %vm3035_vm14 = vweird.f32 %v4818_v14 }
 0x931   :  { %v3716_v52 = vmul.f32 %v3700_v6, %v3375_v22  ;;  %4821 = vrsqrt.f32 %v2932_v61  ;;  %vm3036_vm2 = vmor %vm3034_vm1, %vm3035_vm14  ;;  %vm3044_vm4 = vweird.f32 %v2932_v61 }
 0x932   :  { %v3891_v0 = vmul.f32 %v3875_v32, %v3267_v43  ;;  %v3030_v60 = vmul.f32 %v4818_v14, %v3029_v23 }
 0x933   :  { %v3796_v24 = vmul.f32 %v4820_v2, %v3716_v52 }
 0x934   :  { %v3031_v44 = vmul.f32 0.5, %v3030_v60  ;;  %4407 = vmatmul.msk.f32.vlgmr.msra.gmra.mxu1 %vm97_vm0, %v3891_v0  ;;  %v2893_v13 = vpop.xlane.xlu2 %2892 }
 0x935   :  { %v3812_v26 = vsub.f32 1.0, %v3796_v24  ;;  %v2917_v7 = vmul.f32 %v2893_v13, %v7512_v9 }
 0x936   :  { %v3032_v28 = vsub.f32 1.5, %v3031_v44 }
 0x937   :  { %v3844_v48 = vsub.f32 0.0, %v3812_v26  ;;  %v4822_v37 = vpop.eup %4821  ;;  %v2933_v12 = vadd.f32 1e-05, %v2917_v7 }
 0x938   :  { %v3033_v49 = vmul.f32 %v4818_v14, %v3032_v28  ;;  %v3039_v29 = vmul.f32 %v4822_v37, %v2932_v61  ;;  %vm3045_vm3 = vweird.f32 %v4822_v37 }
 0x939   :  { %v3860_v22 = vsel %vm3828_vm15, %v3812_v26, %v3844_v48  ;;  %4823 = vrsqrt.f32 %v2933_v12  ;;  %vm3046_vm6 = vmor %vm3044_vm4, %vm3045_vm3  ;;  %vm3054_vm8 = vweird.f32 %v2933_v12 }
 0x93a   :  { %v3876_v62 = vadd.f32 1.0, %v3860_v22  ;;  %v3037_v40 = vsel %vm3036_vm2, %v4818_v14, %v3033_v49  ;;  %v3040_v45 = vmul.f32 %v4822_v37, %v3039_v29 }
 0x93b   :  { %v3107_v33 = vmul.f32 %v3037_v40, %v6992_v34  ;;  %v3225_v46 = vpop.f32.mrf.mxu0 }
 0x93c   :  { %v3892_v27 = vmul.f32 %v3876_v62, %v3268_v41  ;;  %v3041_v53 = vmul.f32 0.5, %v3040_v45  ;;  %v7111_v8 = vadd.f32 %v3225_v46, %v7059_v20 }
 0x93d   :  { %v3124_v17 = vmul.f32 %v6961_v38, %v3107_v33 }
 0x93e   :  { %4408 = vmatmul.msk.f32.gmra.mxu1 %vm97_vm0, %v3892_v27  ;;  %v3042_v47 = vsub.f32 1.5, %v3041_v53  ;;  %v7116_v30 = vmul.f32 0.70710677, %v7111_v8 }
 0x93f   :  { %v4824_v10 = vpop.eup %4823  ;;  %v3141_v42 = vadd.f32 %v6967_v35, %v3124_v17 }
 0x940   :  { %v3043_v6 = vmul.f32 %v4822_v37, %v3042_v47  ;;  %v3049_v34 = vmul.f32 %v4824_v10, %v2933_v12  ;;  %v3301_v14 = vand.u32 2147483647, %v7116_v30  ;;  %vm3055_vm7 = vweird.f32 %v4824_v10 }
 0x941   :  { %4396 = vmatmul.msk.f32.gmra.mxu0 %vm97_vm0, %v3141_v42  ;;  %vm3056_vm9 = vmor %vm3054_vm8, %vm3055_vm7  ;;  %vm3829_vm8 = vcmp.ge.f32.partialorder %v7116_v30, 0.0 }
 0x942   :  { %v3047_v55 = vsel %vm3046_vm6, %v4822_v37, %v3043_v6  ;;  %v3050_v43 = vmul.f32 %v4824_v10, %v3049_v34  ;;  %v3317_v32 = vmul.f32 0.3275911, %v3301_v14 }
 0x943   :  { %v3108_v52 = vmul.f32 %v3047_v55, %v7000_v5  ;;  %v3228_v23 = vpop.f32.mrf.mxu0 }
 0x944   :  { %v3051_v2 = vmul.f32 0.5, %v3050_v43  ;;  %v3333_v0 = vadd.f32 1.0, %v3317_v32  ;;  %v7123_v24 = vadd.f32 %v3228_v23, %v7059_v20  ;;  %v3733_v32 = vsub.f32 0.0, %v3301_v14 }
 0x945   :  { %v3125_v60 = vmul.f32 %v6961_v38, %v3108_v52 }
 0x946   :  { %v3052_v61 = vsub.f32 1.5, %v3051_v2  ;;  %4825 = vrcp.f32 %v3333_v0  ;;  %v7127_v26 = vmul.f32 0.70710677, %v7123_v24  ;;  %v3388_v45 = vand.u32 2147483648, %v3333_v0 }
 0x947   :  { %v3142_v13 = vadd.f32 %v6967_v35, %v3125_v60  ;;  %v3386_v33 = vand.u32 2147483647, %v3333_v0  ;;  %vm3382_vm11 = vweird.f32 %v3333_v0 }
 0x948   :  { %v3053_v44 = vmul.f32 %v4824_v10, %v3052_v61  ;;  %v7131_v5 = vand.u32 2147483647, %v7127_v26  ;;  %v3389_v47 = vor.u32 1.1754944e-38, %v3388_v45 }
 0x949   :  { %4397 = vmatmul.msk.f32.gmra.mxu0 %vm97_vm0, %v3142_v13  ;;  %vm3387_vm13 = vcmp.eq.f32.partialorder %v3386_v33, 8.507059e+37 }
 0x94a   :  { %v3057_v7 = vsel %vm3056_vm9, %v4824_v10, %v3053_v44  ;;  %v3318_v28 = vmul.f32 0.3275911, %v7131_v5  ;;  %v3749_v44 = vmul.f32 %v3733_v32, %v3301_v14  ;;  %v3734_v14 = vsub.f32 0.0, %v7131_v5 }
 0x94b   :  { %v3109_v48 = vmul.f32 %v3057_v7, %v7009_v4  ;;  %v3231_v37 = vpop.f32.mrf.mxu0 }
 0x94c   :  { %v4826_v22 = vpop.eup %4825  ;;  %v7137_v49 = vadd.f32 %v3231_v37, %v7059_v20  ;;  %v3334_v12 = vadd.f32 1.0, %v3318_v28 }
 0x94d   :  { %v3378_v29 = vmul.f32 %v4826_v22, %v3333_v0  ;;  %v3126_v62 = vmul.f32 %v6961_v38, %v3109_v48  ;;  %vm3383_vm10 = vweird.f32 %v4826_v22 }
 0x94e   :  { %v7140_v41 = vmul.f32 0.70710677, %v7137_v49  ;;  %4827 = vrcp.f32 %v3334_v12  ;;  %vm3384_vm12 = vmor %vm3382_vm11, %vm3383_vm10  ;;  %v3403_v61 = vand.u32 2147483648, %v3334_v12  ;;  %v3401_v7 = vand.u32 2147483647, %v3334_v12 }
 0x94f   :  { %v3379_v40 = vsub.f32 1.0, %v3378_v29  ;;  %v3143_v46 = vadd.f32 %v6967_v35, %v3126_v62  ;;  %vm3397_vm15 = vweird.f32 %v3334_v12 }
 0x950   :  { %v7144_v27 = vand.u32 2147483647, %v7140_v41  ;;  %v3404_v62 = vor.u32 1.1754944e-38, %v3403_v61  ;;  %vm3402_vm2 = vcmp.eq.f32.partialorder %v3401_v7, 8.507059e+37 }
 0x951   :  { %v3380_v4 = vmul.f32 %v4826_v22, %v3379_v40  ;;  %4398 = vmatmul.msk.f32.gmra.mxu0 %vm97_vm0, %v3143_v46 }
 0x952   :  { %v3319_v53 = vmul.f32 0.3275911, %v7144_v27 }
 0x953   :  { %v3381_v17 = vadd.f32 %v4826_v22, %v3380_v4  ;;  %v3767_v4 = vmul.f32 1.442695, %v3749_v44 }
 0x954   :  { %v3335_v10 = vadd.f32 1.0, %v3319_v53  ;;  %v2896_v42 = vpop.xlane.xlu0 %2895  ;;  %v4828_v6 = vpop.eup %4827 }
 0x955   :  { %v3385_v34 = vsel %vm3384_vm12, %v4826_v22, %v3381_v17  ;;  %v2918_v55 = vmul.f32 %v2896_v42, %v7512_v9  ;;  %v3393_v52 = vmul.f32 %v4828_v6, %v3334_v12  ;;  %vm3398_vm14 = vweird.f32 %v4828_v6 }
 0x956   :  { %v3390_v43 = vsel %vm3387_vm13, %v3389_v47, %v3385_v34  ;;  %4829 = vrcp.f32 %v3335_v10  ;;  %vm3399_vm1 = vmor %vm3397_vm15, %vm3398_vm14  ;;  %v3416_v42 = vand.u32 2147483647, %v3335_v10  ;;  %v3418_v34 = vand.u32 2147483648, %v3335_v10 }
 0x957   :  { %v3589_v23 = vmul.f32 1.0614054, %v3390_v43  ;;  %v3394_v2 = vsub.f32 1.0, %v3393_v52  ;;  %v7150_v60 = vadd.f32 1e-05, %v2918_v55  ;;  %vm3412_vm4 = vweird.f32 %v3335_v10 }
 0x958   :  { %vm3417_vm7 = vcmp.eq.f32.partialorder %v3416_v42, 8.507059e+37  ;;  %vm3830_vm15 = vcmp.ge.f32.partialorder %v7127_v26, 0.0 }
 0x959   :  { %v3605_v0 = vadd.f32 -1.4531521, %v3589_v23  ;;  %v3395_v13 = vmul.f32 %v4828_v6, %v3394_v2  ;;  %4831 = vrsqrt.f32 %v7150_v60  ;;  %vm3064_vm10 = vweird.f32 %v7150_v60 }
 0x95b   :  { %v3621_v48 = vmul.f32 %v3605_v0, %v3390_v43  ;;  %v3396_v37 = vadd.f32 %v4828_v6, %v3395_v13  ;;  %v3750_v0 = vmul.f32 %v3734_v14, %v7131_v5  ;;  %v3419_v13 = vor.u32 1.1754944e-38, %v3418_v34 }
 0x95c   :  { %v4830_v28 = vpop.eup %4829  ;;  %v2899_v22 = vpop.xlane.xlu1 %2898 }
 0x95d   :  { %v3637_v29 = vadd.f32 1.4214138, %v3621_v48  ;;  %v3408_v40 = vmul.f32 %v4830_v28, %v3335_v10  ;;  %v2919_v45 = vmul.f32 %v2899_v22, %v7512_v9  ;;  %v3400_v33 = vsel %vm3399_vm1, %v4828_v6, %v3396_v37 }
 0x95e   :  { %v7155_v53 = vsel %vm3402_vm2, %v3404_v62, %v3400_v33  ;;  %vm3413_vm3 = vweird.f32 %v4830_v28  ;;  %v3735_v22 = vsub.f32 0.0, %v7144_v27  ;;  %v3769_v10 = vmul.f32 1.442695, %v3750_v0 }
 0x95f   :  { %v3653_v46 = vmul.f32 %v3637_v29, %v3390_v43  ;;  %v3409_v17 = vsub.f32 1.0, %v3408_v40  ;;  %v7157_v47 = vadd.f32 1e-05, %v2919_v45  ;;  %v3590_v12 = vmul.f32 1.0614054, %v7155_v53  ;;  %v4832_v55 = vpop.eup %4831  ;;  %vm3414_vm6 = vmor %vm3412_vm4, %vm3413_vm3 }
 0x960   :  { %v3059_v23 = vmul.f32 %v4832_v55, %v7150_v60  ;;  %v3269_v29 = vmul.f32 0.5, %v7111_v8  ;;  %vm3065_vm9 = vweird.f32 %v4832_v55  ;;  %v3751_v34 = vmul.f32 %v3735_v22, %v7144_v27 }
 0x961   :  { %v3669_v32 = vadd.f32 -0.28449672, %v3653_v46  ;;  %v3410_v52 = vmul.f32 %v4830_v28, %v3409_v17  ;;  %4833 = vrsqrt.f32 %v7157_v47  ;;  %v3606_v6 = vadd.f32 -1.4531521, %v3590_v12  ;;  %vm3066_vm11 = vmor %vm3064_vm10, %vm3065_vm9 }
 0x962   :  { %4835 = vpow2.f32 %v3767_v4  ;;  %v3060_v7 = vmul.f32 %v4832_v55, %v3059_v23  ;;  %vm3074_vm13 = vweird.f32 %v7157_v47  ;;  %vm3831_vm4 = vcmp.ge.f32.partialorder %v7140_v41, 0.0 }
 0x963   :  { %v3685_v2 = vmul.f32 %v3669_v32, %v3390_v43  ;;  %v3411_v61 = vadd.f32 %v4830_v28, %v3410_v52  ;;  %v3622_v44 = vmul.f32 %v3606_v6, %v7155_v53  ;;  %4837 = vpow2.f32 %v3769_v10 }
 0x964   :  { %v3061_v45 = vmul.f32 0.5, %v3060_v7 }
 0x965   :  { %v3701_v48 = vadd.f32 0.2548296, %v3685_v2  ;;  %v3415_v37 = vsel %vm3414_vm6, %v4830_v28, %v3411_v61  ;;  %v3638_v62 = vadd.f32 1.4214138, %v3622_v44 }
 0x966   :  { %v7166_v40 = vsel %vm3417_vm7, %v3419_v13, %v3415_v37  ;;  %v3062_v17 = vsub.f32 1.5, %v3061_v45 }
 0x967   :  { %v4834_v4 = vpop.eup %4833  ;;  %v3717_v5 = vmul.f32 %v3701_v48, %v3390_v43  ;;  %v3591_v33 = vmul.f32 1.0614054, %v7166_v40  ;;  %v2902_v14 = vpop.xlane.xlu2 %2901  ;;  %v3654_v28 = vmul.f32 %v3638_v62, %v7155_v53  ;;  %v3771_v62 = vmul.f32 1.442695, %v3751_v34 }
 0x968   :  { %v4836_v46 = vpop.eup %4835  ;;  %v3069_v12 = vmul.f32 %v4834_v4, %v7157_v47  ;;  %v2920_v32 = vmul.f32 %v2902_v14, %v7512_v9  ;;  %v3063_v52 = vmul.f32 %v4832_v55, %v3062_v17  ;;  %vm3075_vm12 = vweird.f32 %v4834_v4 }
 0x969   :  { %v3797_v8 = vmul.f32 %v4836_v46, %v3717_v5  ;;  %v3607_v42 = vadd.f32 -1.4531521, %v3591_v33  ;;  %v3670_v43 = vadd.f32 -0.28449672, %v3654_v28  ;;  %v4838_v28 = vpop.eup %4837  ;;  %vm3076_vm14 = vmor %vm3074_vm13, %vm3075_vm12 }
 0x96a   :  { %v3070_v6 = vmul.f32 %v4834_v4, %v3069_v12  ;;  %v7176_v0 = vadd.f32 1e-05, %v2920_v32  ;;  %v3067_v13 = vsel %vm3066_vm11, %v4832_v55, %v3063_v52 }
 0x96b   :  { %v3813_v23 = vsub.f32 1.0, %v3797_v8  ;;  %v3623_v2 = vmul.f32 %v3607_v42, %v7166_v40  ;;  %v3234_v61 = vpop.f32.mrf.mxu0  ;;  %v3686_v44 = vmul.f32 %v3670_v43, %v7155_v53  ;;  %v3110_v60 = vmul.f32 %v3067_v13, %v7028_v19 }
 0x96c   :  { %v3071_v7 = vmul.f32 0.5, %v3070_v6  ;;  %v7180_v27 = vadd.f32 %v3234_v61, %v7059_v20  ;;  %4839 = vrsqrt.f32 %v7176_v0  ;;  %vm3084_vm2 = vweird.f32 %v7176_v0 }
 0x96d   :  { %v3845_v48 = vsub.f32 0.0, %v3813_v23  ;;  %v3639_v37 = vadd.f32 1.4214138, %v3623_v2  ;;  %v3702_v22 = vadd.f32 0.2548296, %v3686_v44  ;;  %v3127_v33 = vmul.f32 %v6961_v38, %v3110_v60 }
 0x96e   :  { %v3072_v45 = vsub.f32 1.5, %v3071_v7  ;;  %v7188_v55 = vmul.f32 0.70710677, %v7180_v27  ;;  %4841 = vpow2.f32 %v3771_v62  ;;  %v3270_v62 = vmul.f32 0.5, %v7123_v24 }
 0x96f   :  { %v3861_v5 = vsel %vm3829_vm8, %v3813_v23, %v3845_v48  ;;  %v3655_v10 = vmul.f32 %v3639_v37, %v7166_v40  ;;  %v3718_v46 = vmul.f32 %v3702_v22, %v7155_v53  ;;  %v3144_v30 = vadd.f32 %v6967_v35, %v3127_v33 }
 0x970   :  { %v3877_v14 = vadd.f32 1.0, %v3861_v5  ;;  %v3073_v19 = vmul.f32 %v4834_v4, %v3072_v45  ;;  %v7194_v12 = vand.u32 2147483647, %v7188_v55 }
 0x971   :  { %v3671_v17 = vadd.f32 -0.28449672, %v3655_v10  ;;  %v3798_v42 = vmul.f32 %v4838_v28, %v3718_v46  ;;  %4399 = vmatmul.msk.f32.gmra.mxu0 %vm97_vm0, %v3144_v30 }
 0x972   :  { %v3893_v8 = vmul.f32 %v3877_v14, %v3269_v29  ;;  %v3077_v34 = vsel %vm3076_vm14, %v4834_v4, %v3073_v19  ;;  %v2905_v32 = vpop.xlane.xlu0 %2904  ;;  %v4840_v43 = vpop.eup %4839  ;;  %v3320_v53 = vmul.f32 0.3275911, %v7194_v12 }
 0x973   :  { %v3687_v52 = vmul.f32 %v3671_v17, %v7166_v40  ;;  %v3814_v47 = vsub.f32 1.0, %v3798_v42  ;;  %v3111_v6 = vmul.f32 %v3077_v34, %v7035_v11  ;;  %v3079_v23 = vmul.f32 %v4840_v43, %v7176_v0  ;;  %v3237_v61 = vpop.f32.mrf.mxu0 }
 0x974   :  { %v2921_v2 = vmul.f32 %v2905_v32, %v7512_v9  ;;  %4409 = vmatmul.msk.f32.gmra.mxu1 %vm97_vm0, %v3893_v8  ;;  %v3336_v4 = vadd.f32 1.0, %v3320_v53  ;;  %v7209_v11 = vadd.f32 %v3237_v61, %v7059_v20  ;;  %v4842_v37 = vpop.eup %4841  ;;  %vm3085_vm1 = vweird.f32 %v4840_v43 }
 0x975   :  { %v3703_v29 = vadd.f32 0.2548296, %v3687_v52  ;;  %v3846_v44 = vsub.f32 0.0, %v3814_v47  ;;  %v3080_v13 = vmul.f32 %v4840_v43, %v3079_v23  ;;  %v3128_v22 = vmul.f32 %v6961_v38, %v3111_v6  ;;  %vm3086_vm3 = vmor %vm3084_vm2, %vm3085_vm1 }
 0x976   :  { %v7204_v7 = vadd.f32 1e-05, %v2921_v2  ;;  %4843 = vrcp.f32 %v3336_v4  ;;  %v3271_v0 = vmul.f32 0.5, %v7137_v49  ;;  %v3431_v6 = vand.u32 2147483647, %v3336_v4 }
 0x977   :  { %v3719_v48 = vmul.f32 %v3703_v29, %v7166_v40  ;;  %v3862_v60 = vsel %vm3830_vm15, %v3814_v47, %v3846_v44  ;;  %v3081_v9 = vmul.f32 0.5, %v3080_v13  ;;  %v7215_v40 = vmul.f32 0.70710677, %v7209_v11 }
 0x978   :  { %v3878_v45 = vadd.f32 1.0, %v3862_v60  ;;  %4845 = vrsqrt.f32 %v7204_v7  ;;  %v3145_v46 = vadd.f32 %v6967_v35, %v3128_v22  ;;  %v3433_v2 = vand.u32 2147483648, %v3336_v4 }
 0x979   :  { %v3799_v5 = vmul.f32 %v4842_v37, %v3719_v48  ;;  %v3082_v10 = vsub.f32 1.5, %v3081_v9  ;;  %v7220_v24 = vand.u32 2147483647, %v7215_v40  ;;  %vm3427_vm7 = vweird.f32 %v3336_v4 }
 0x97a   :  { %v3894_v26 = vmul.f32 %v3878_v45, %v3270_v62  ;;  %4400 = vmatmul.msk.f32.gmra.mxu0 %vm97_vm0, %v3145_v46  ;;  %v3434_v48 = vor.u32 1.1754944e-38, %v3433_v2  ;;  %vm3432_vm9 = vcmp.eq.f32.partialorder %v3431_v6, 8.507059e+37  ;;  %v3736_v45 = vsub.f32 0.0, %v7194_v12 }
 0x97b   :  { %v3815_v33 = vsub.f32 1.0, %v3799_v5  ;;  %v3083_v14 = vmul.f32 %v4840_v43, %v3082_v10  ;;  %v3321_v52 = vmul.f32 0.3275911, %v7220_v24  ;;  %vm3094_vm11 = vweird.f32 %v7204_v7 }
 0x97c   :  { %v4844_v19 = vpop.eup %4843  ;;  %4410 = vmatmul.msk.f32.gmra.mxu1 %vm97_vm0, %v3894_v26 }
 0x97d   :  { %v3847_v28 = vsub.f32 0.0, %v3815_v33  ;;  %v3087_v17 = vsel %vm3086_vm3, %v4840_v43, %v3083_v14  ;;  %v3423_v30 = vmul.f32 %v4844_v19, %v3336_v4  ;;  %v3337_v41 = vadd.f32 1.0, %v3321_v52 }
 0x97e   :  { %v3240_v8 = vpop.f32.mrf.mxu0  ;;  %v4846_v42 = vpop.eup %4845  ;;  %v3112_v32 = vmul.f32 %v3087_v17, %v7047_v3  ;;  %vm3428_vm6 = vweird.f32 %v4844_v19  ;;  %v3752_v17 = vmul.f32 %v3736_v45, %v7194_v12 }
 0x97f   :  { %v3863_v34 = vsel %vm3831_vm4, %v3815_v33, %v3847_v28  ;;  %v3424_v47 = vsub.f32 1.0, %v3423_v30  ;;  %v3089_v23 = vmul.f32 %v4846_v42, %v7204_v7  ;;  %v7230_v43 = vadd.f32 %v3240_v8, %v7059_v20  ;;  %vm3429_vm8 = vmor %vm3427_vm7, %vm3428_vm6 }
 0x980   :  { %v3879_v53 = vadd.f32 1.0, %v3863_v34  ;;  %v3129_v61 = vmul.f32 %v6961_v38, %v3112_v32  ;;  %4847 = vrcp.f32 %v3337_v41  ;;  %vm3095_vm10 = vweird.f32 %v4846_v42 }
 0x981   :  { %v3425_v44 = vmul.f32 %v4844_v19, %v3424_v47  ;;  %v3090_v49 = vmul.f32 %v4846_v42, %v3089_v23  ;;  %v7234_v37 = vmul.f32 0.70710677, %v7230_v43  ;;  %vm3096_vm12 = vmor %vm3094_vm11, %vm3095_vm10  ;;  %v3448_v52 = vand.u32 2147483648, %v3337_v41 }
 0x982   :  { %v3895_v29 = vmul.f32 %v3879_v53, %v3271_v0  ;;  %v3146_v60 = vadd.f32 %v6967_v35, %v3129_v61  ;;  %v3446_v47 = vand.u32 2147483647, %v3337_v41  ;;  %v3773_v6 = vmul.f32 1.442695, %v3752_v17 }
 0x983   :  { %v3426_v3 = vadd.f32 %v4844_v19, %v3425_v44  ;;  %v3091_v13 = vmul.f32 0.5, %v3090_v49  ;;  %v7240_v5 = vand.u32 2147483647, %v7234_v37  ;;  %vm3442_vm14 = vweird.f32 %v3337_v41 }
 0x984   :  { %4411 = vmatmul.msk.f32.gmra.mxu1 %vm97_vm0, %v3895_v29  ;;  %4401 = vmatmul.msk.f32.gmra.mxu0 %vm97_vm0, %v3146_v60  ;;  %v3449_v2 = vor.u32 1.1754944e-38, %v3448_v52  ;;  %vm3447_vm1 = vcmp.eq.f32.partialorder %v3446_v47, 8.507059e+37  ;;  %vm3832_vm7 = vcmp.ge.f32.partialorder %v7188_v55, 0.0 }
 0x985   :  { %v3430_v9 = vsel %vm3429_vm8, %v4844_v19, %v3426_v3  ;;  %v3092_v22 = vsub.f32 1.5, %v3091_v13  ;;  %v3322_v33 = vmul.f32 0.3275911, %v7240_v5 }
 0x986   :  { %v3435_v62 = vsel %vm3432_vm9, %v3434_v48, %v3430_v9  ;;  %v4848_v26 = vpop.eup %4847  ;;  %v3737_v48 = vsub.f32 0.0, %v7220_v24 }
 0x987   :  { %v3592_v4 = vmul.f32 1.0614054, %v3435_v62  ;;  %v3093_v10 = vmul.f32 %v4846_v42, %v3092_v22  ;;  %v3438_v28 = vmul.f32 %v4848_v26, %v3337_v41  ;;  %v3338_v8 = vadd.f32 1.0, %v3322_v33 }
 0x988   :  { %vm3443_vm13 = vweird.f32 %v4848_v26 }
 0x989   :  { %v3243_v14 = vpop.f32.mrf.mxu0  ;;  %v3608_v46 = vadd.f32 -1.4531521, %v3592_v4  ;;  %v3097_v19 = vsel %vm3096_vm12, %v4846_v42, %v3093_v10  ;;  %v3439_v32 = vsub.f32 1.0, %v3438_v28  ;;  %4849 = vrcp.f32 %v3338_v8  ;;  %vm3444_vm15 = vmor %vm3442_vm14, %vm3443_vm13 }
 0x98a   :  { %v3113_v30 = vmul.f32 %v3097_v19, %v7062_v57  ;;  %v7248_v0 = vadd.f32 %v3243_v14, %v7059_v20  ;;  %4851 = vpow2.f32 %v3773_v6  ;;  %v3463_v33 = vand.u32 2147483648, %v3338_v8 }
 0x98b   :  { %v3624_v34 = vmul.f32 %v3608_v46, %v3435_v62  ;;  %v3440_v53 = vmul.f32 %v4848_v26, %v3439_v32  ;;  %vm3457_vm3 = vweird.f32 %v3338_v8  ;;  %vm3833_vm12 = vcmp.ge.f32.partialorder %v7215_v40, 0.0 }
 0x98c   :  { %v7251_v42 = vmul.f32 0.70710677, %v7248_v0  ;;  %v3130_v12 = vmul.f32 %v6961_v38, %v3113_v30  ;;  %v3464_v52 = vor.u32 1.1754944e-38, %v3463_v33  ;;  %vm3834_vm13 = vcmp.ge.f32.partialorder %v7234_v37, 0.0 }
 0x98d   :  { %v3640_v7 = vadd.f32 1.4214138, %v3624_v34  ;;  %v3441_v57 = vadd.f32 %v4848_v26, %v3440_v53 }
 0x98e   :  { %v7255_v61 = vand.u32 2147483647, %v7251_v42  ;;  %v3147_v29 = vadd.f32 %v6967_v35, %v3130_v12  ;;  %v3753_v35 = vmul.f32 %v3737_v48, %v7220_v24  ;;  %v3738_v12 = vsub.f32 0.0, %v7240_v5 }
 0x98f   :  { %v3656_v23 = vmul.f32 %v3640_v7, %v3435_v62  ;;  %v3445_v49 = vsel %vm3444_vm15, %v4848_v26, %v3441_v57  ;;  %v4850_v3 = vpop.eup %4849  ;;  %v3461_v26 = vand.u32 2147483647, %v3338_v8  ;;  %vm3835_vm14 = vcmp.ge.f32.partialorder %v7251_v42, 0.0 }
 0x990   :  { %v3450_v13 = vsel %vm3447_vm1, %v3449_v2, %v3445_v49  ;;  %v3323_v38 = vmul.f32 0.3275911, %v7255_v61  ;;  %4402 = vmatmul.msk.f32.gmra.mxu0 %vm97_vm0, %v3147_v29  ;;  %v3453_v9 = vmul.f32 %v4850_v3, %v3338_v8  ;;  %vm3458_vm2 = vweird.f32 %v4850_v3  ;;  %v4852_v28 = vpop.eup %4851 }
 0x991   :  { %v3672_v44 = vadd.f32 -0.28449672, %v3656_v23  ;;  %v3593_v60 = vmul.f32 1.0614054, %v3450_v13  ;;  %v3775_v32 = vmul.f32 1.442695, %v3753_v35  ;;  %vm3459_vm4 = vmor %vm3457_vm3, %vm3458_vm2 }
 0x992   :  { %v3339_v22 = vadd.f32 1.0, %v3323_v38  ;;  %v3454_v10 = vsub.f32 1.0, %v3453_v9  ;;  %vm3462_vm6 = vcmp.eq.f32.partialorder %v3461_v26, 8.507059e+37  ;;  %v3272_v29 = vmul.f32 0.5, %v7180_v27 }
 0x993   :  { %v3688_v41 = vmul.f32 %v3672_v44, %v3435_v62  ;;  %v3609_v4 = vadd.f32 -1.4531521, %v3593_v60 }
 0x994   :  { %4853 = vrcp.f32 %v3339_v22  ;;  %v3455_v19 = vmul.f32 %v4850_v3, %v3454_v10  ;;  %v3478_v60 = vand.u32 2147483648, %v3339_v22  ;;  %vm3472_vm9 = vweird.f32 %v3339_v22 }
 0x995   :  { %v3704_v45 = vadd.f32 0.2548296, %v3688_v41  ;;  %v3625_v46 = vmul.f32 %v3609_v4, %v3450_v13  ;;  %4855 = vpow2.f32 %v3775_v32  ;;  %v3476_v41 = vand.u32 2147483647, %v3339_v22 }
 0x996   :  { %v3456_v34 = vadd.f32 %v4850_v3, %v3455_v19 }
 0x997   :  { %v3720_v14 = vmul.f32 %v3704_v45, %v3435_v62  ;;  %v3641_v30 = vadd.f32 1.4214138, %v3625_v46  ;;  %vm3477_vm11 = vcmp.eq.f32.partialorder %v3476_v41, 8.507059e+37 }
 0x998   :  { %v3460_v47 = vsel %vm3459_vm4, %v4850_v3, %v3456_v34  ;;  %v3754_v3 = vmul.f32 %v3738_v12, %v7240_v5 }
 0x999   :  { %v3800_v17 = vmul.f32 %v4852_v28, %v3720_v14  ;;  %v3657_v53 = vmul.f32 %v3641_v30, %v3450_v13  ;;  %v3465_v6 = vsel %vm3462_vm6, %v3464_v52, %v3460_v47  ;;  %v3479_v14 = vor.u32 1.1754944e-38, %v3478_v60 }
 0x99a   :  { %v4854_v24 = vpop.eup %4853  ;;  %v3594_v57 = vmul.f32 1.0614054, %v3465_v6  ;;  %v3777_v33 = vmul.f32 1.442695, %v3754_v3 }
 0x99b   :  { %v3816_v7 = vsub.f32 1.0, %v3800_v17  ;;  %v3673_v23 = vadd.f32 -0.28449672, %v3657_v53  ;;  %v3468_v2 = vmul.f32 %v4854_v24, %v3339_v22  ;;  %vm3473_vm8 = vweird.f32 %v4854_v24  ;;  %v4856_v55 = vpop.eup %4855 }
 0x99c   :  { %v3610_v49 = vadd.f32 -1.4531521, %v3594_v57  ;;  %vm3474_vm10 = vmor %vm3472_vm9, %vm3473_vm8  ;;  %v3739_v17 = vsub.f32 0.0, %v7255_v61  ;;  %4857 = vpow2.f32 %v3777_v33 }
 0x99d   :  { %v3848_v62 = vsub.f32 0.0, %v3816_v7  ;;  %v3689_v44 = vmul.f32 %v3673_v23, %v3450_v13  ;;  %v3469_v48 = vsub.f32 1.0, %v3468_v2 }
 0x99e   :  { %v3626_v45 = vmul.f32 %v3610_v49, %v3465_v6 }
 0x99f   :  { %v3864_v8 = vsel %vm3832_vm7, %v3816_v7, %v3848_v62  ;;  %v3705_v9 = vadd.f32 0.2548296, %v3689_v44  ;;  %v3470_v4 = vmul.f32 %v4854_v24, %v3469_v48  ;;  %v3755_v7 = vmul.f32 %v3739_v17, %v7255_v61 }
 0x9a0   :  { %v3880_v38 = vadd.f32 1.0, %v3864_v8  ;;  %v3642_v26 = vadd.f32 1.4214138, %v3626_v45 }
 0x9a1   :  { %v3721_v35 = vmul.f32 %v3705_v9, %v3450_v13  ;;  %v3471_v27 = vadd.f32 %v4854_v24, %v3470_v4  ;;  %v3779_v8 = vmul.f32 1.442695, %v3755_v7 }
 0x9a2   :  { %v3896_v10 = vmul.f32 %v3880_v38, %v3272_v29  ;;  %v3658_v19 = vmul.f32 %v3642_v26, %v3465_v6  ;;  %v4858_v2 = vpop.eup %4857 }
 0x9a3   :  { %v3801_v46 = vmul.f32 %v4856_v55, %v3721_v35  ;;  %v3475_v5 = vsel %vm3474_vm10, %v4854_v24, %v3471_v27  ;;  %v3273_v24 = vmul.f32 0.5, %v7209_v11  ;;  %4859 = vpow2.f32 %v3779_v8 }
 0x9a4   :  { %4412 = vmatmul.msk.f32.gmra.mxu1 %vm97_vm0, %v3896_v10  ;;  %v3480_v28 = vsel %vm3477_vm11, %v3479_v14, %v3475_v5  ;;  %v3674_v34 = vadd.f32 -0.28449672, %v3658_v19  ;;  %v3274_v11 = vmul.f32 0.5, %v7230_v43  ;;  %v3275_v55 = vmul.f32 0.5, %v7248_v0 }
 0x9a5   :  { %v3817_v30 = vsub.f32 1.0, %v3801_v46  ;;  %v3595_v32 = vmul.f32 1.0614054, %v3480_v28 }
 0x9a6   :  { %v3690_v52 = vmul.f32 %v3674_v34, %v3465_v6 }
 0x9a7   :  { %v3849_v13 = vsub.f32 0.0, %v3817_v30  ;;  %v3611_v22 = vadd.f32 -1.4531521, %v3595_v32 }
 0x9a8   :  { %v3706_v47 = vadd.f32 0.2548296, %v3690_v52 }
 0x9a9   :  { %v3865_v53 = vsel %vm3833_vm12, %v3817_v30, %v3849_v13  ;;  %v3627_v12 = vmul.f32 %v3611_v22, %v3480_v28  ;;  %v4860_v9 = vpop.eup %4859 }
 0x9aa   :  { %v3881_v62 = vadd.f32 1.0, %v3865_v53  ;;  %v3722_v23 = vmul.f32 %v3706_v47, %v3465_v6 }
 0x9ab   :  { %v3643_v57 = vadd.f32 1.4214138, %v3627_v12 }
 0x9ac   :  { %v3897_v29 = vmul.f32 %v3881_v62, %v3273_v24  ;;  %v3802_v44 = vmul.f32 %v4858_v2, %v3722_v23 }
 0x9ad   :  { %v3659_v49 = vmul.f32 %v3643_v57, %v3480_v28 }
 0x9ae   :  { %4413 = vmatmul.msk.f32.gmra.mxu1 %vm97_vm0, %v3897_v29  ;;  %v3818_v48 = vsub.f32 1.0, %v3802_v44 }
 0x9af   :  { %v3675_v38 = vadd.f32 -0.28449672, %v3659_v49 }
 0x9b0   :  { %v3850_v40 = vsub.f32 0.0, %v3818_v48 }
 0x9b1   :  { %v3691_v61 = vmul.f32 %v3675_v38, %v3480_v28 }
 0x9b2   :  { %v3866_v3 = vsel %vm3834_vm13, %v3818_v48, %v3850_v40 }
 0x9b3   :  { %v3707_v41 = vadd.f32 0.2548296, %v3691_v61  ;;  %v3882_v6 = vadd.f32 1.0, %v3866_v3 }
 0x9b5   :  { %v3723_v60 = vmul.f32 %v3707_v41, %v3480_v28  ;;  %v3898_v45 = vmul.f32 %v3882_v6, %v3274_v11 }
 0x9b7   :  { %v3803_v4 = vmul.f32 %v4860_v9, %v3723_v60  ;;  %4414 = vmatmul.msk.f32.gmra.mxu1 %vm97_vm0, %v3898_v45 }
 0x9b9   :  { %v3819_v10 = vsub.f32 1.0, %v3803_v4 }
 0x9bb   :  { %v3851_v35 = vsub.f32 0.0, %v3819_v10 }
 0x9bd   :  { %v3867_v37 = vsel %vm3835_vm14, %v3819_v10, %v3851_v35 }
 0x9be   :  { %v3246_v26 = vpop.f32.mrf.mxu0  ;;  %v3883_v33 = vadd.f32 1.0, %v3867_v37 }
 0x9bf   :  { %v7277_v27 = vadd.f32 %v3246_v26, %v7059_v20 }
 0x9c0   :  { %v3899_v14 = vmul.f32 %v3883_v33, %v3275_v55 }
 0x9c1   :  { %v7281_v43 = vmul.f32 0.70710677, %v7277_v27 }
 0x9c2   :  { %4415 = vmatmul.msk.f32.gmra.mxu1 %vm97_vm0, %v3899_v14 }
 0x9c3   :  { %v3308_v46 = vand.u32 2147483647, %v7281_v43  ;;  %vm3836_vm13 = vcmp.ge.f32.partialorder %v7281_v43, 0.0 }
 0x9c5   :  { %v3324_v19 = vmul.f32 0.3275911, %v3308_v46  ;;  %v3740_v49 = vsub.f32 0.0, %v3308_v46 }
 0x9c6   :  { %v3249_v28 = vpop.f32.mrf.mxu0 }
 0x9c7   :  { %v3340_v5 = vadd.f32 1.0, %v3324_v19  ;;  %v7286_v42 = vadd.f32 %v3249_v28, %v7059_v20  ;;  %v3756_v11 = vmul.f32 %v3740_v49, %v3308_v46 }
 0x9c9   :  { %4861 = vrcp.f32 %v3340_v5  ;;  %v7289_v17 = vmul.f32 0.70710677, %v7286_v42  ;;  %v3493_v53 = vand.u32 2147483648, %v3340_v5  ;;  %v3491_v24 = vand.u32 2147483647, %v3340_v5 }
 0x9ca   :  { %vm3487_vm1 = vweird.f32 %v3340_v5  ;;  %v3781_v26 = vmul.f32 1.442695, %v3756_v11 }
 0x9cb   :  { %v3309_v0 = vand.u32 2147483647, %v7289_v17  ;;  %v3494_v57 = vor.u32 1.1754944e-38, %v3493_v53  ;;  %vm3492_vm3 = vcmp.eq.f32.partialorder %v3491_v24, 8.507059e+37  ;;  %vm3837_vm14 = vcmp.ge.f32.partialorder %v7289_v17, 0.0 }
 0x9cd   :  { %v3325_v30 = vmul.f32 0.3275911, %v3309_v0  ;;  %v3741_v55 = vsub.f32 0.0, %v3309_v0 }
 0x9ce   :  { %v3252_v52 = vpop.f32.mrf.mxu0 }
 0x9cf   :  { %v4862_v34 = vpop.eup %4861  ;;  %v3341_v13 = vadd.f32 1.0, %v3325_v30  ;;  %v7293_v22 = vadd.f32 %v3252_v52, %v7059_v20 }
 0x9d0   :  { %v3483_v32 = vmul.f32 %v4862_v34, %v3340_v5  ;;  %vm3488_vm15 = vweird.f32 %v4862_v34 }
 0x9d1   :  { %4863 = vrcp.f32 %v3341_v13  ;;  %v7296_v47 = vmul.f32 0.70710677, %v7293_v22  ;;  %vm3489_vm2 = vmor %vm3487_vm1, %vm3488_vm15  ;;  %v3508_v41 = vand.u32 2147483648, %v3341_v13  ;;  %v3506_v60 = vand.u32 2147483647, %v3341_v13 }
 0x9d2   :  { %v3484_v7 = vsub.f32 1.0, %v3483_v32  ;;  %vm3502_vm6 = vweird.f32 %v3341_v13 }
 0x9d3   :  { %v7299_v62 = vand.u32 2147483647, %v7296_v47  ;;  %v3509_v10 = vor.u32 1.1754944e-38, %v3508_v41  ;;  %vm3507_vm8 = vcmp.eq.f32.partialorder %v3506_v60, 8.507059e+37  ;;  %vm3838_vm15 = vcmp.ge.f32.partialorder %v7296_v47, 0.0 }
 0x9d4   :  { %v3485_v12 = vmul.f32 %v4862_v34, %v3484_v7 }
 0x9d5   :  { %v3326_v2 = vmul.f32 0.3275911, %v7299_v62 }
 0x9d6   :  { %v3486_v23 = vadd.f32 %v4862_v34, %v3485_v12 }
 0x9d7   :  { %v4864_v29 = vpop.eup %4863  ;;  %v3342_v38 = vadd.f32 1.0, %v3326_v2 }
 0x9d8   :  { %v3490_v8 = vsel %vm3489_vm2, %v4862_v34, %v3486_v23  ;;  %v3498_v48 = vmul.f32 %v4864_v29, %v3341_v13  ;;  %vm3503_vm4 = vweird.f32 %v4864_v29  ;;  %v3757_v34 = vmul.f32 %v3741_v55, %v3309_v0 }
 0x9d9   :  { %v3495_v44 = vsel %vm3492_vm3, %v3494_v57, %v3490_v8  ;;  %4865 = vrcp.f32 %v3342_v38  ;;  %vm3504_vm7 = vmor %vm3502_vm6, %vm3503_vm4  ;;  %v3523_v32 = vand.u32 2147483648, %v3342_v38  ;;  %v3521_v7 = vand.u32 2147483647, %v3342_v38 }
 0x9da   :  { %v3596_v40 = vmul.f32 1.0614054, %v3495_v44  ;;  %v3499_v61 = vsub.f32 1.0, %v3498_v48  ;;  %4867 = vpow2.f32 %v3781_v26  ;;  %vm3517_vm10 = vweird.f32 %v3342_v38 }
 0x9db   :  { %v3524_v57 = vor.u32 1.1754944e-38, %v3523_v32  ;;  %vm3522_vm12 = vcmp.eq.f32.partialorder %v3521_v7, 8.507059e+37  ;;  %v3742_v0 = vsub.f32 0.0, %v7299_v62 }
 0x9dc   :  { %v3612_v3 = vadd.f32 -1.4531521, %v3596_v40  ;;  %v3500_v6 = vmul.f32 %v4864_v29, %v3499_v61 }
 0x9de   :  { %v3628_v9 = vmul.f32 %v3612_v3, %v3495_v44  ;;  %v3501_v45 = vadd.f32 %v4864_v29, %v3500_v6 }
 0x9df   :  { %v4866_v35 = vpop.eup %4865 }
 0x9e0   :  { %v3644_v4 = vadd.f32 1.4214138, %v3628_v9  ;;  %v3505_v37 = vsel %vm3504_vm7, %v4864_v29, %v3501_v45  ;;  %v3513_v19 = vmul.f32 %v4866_v35, %v3342_v38  ;;  %vm3518_vm9 = vweird.f32 %v4866_v35  ;;  %v4868_v49 = vpop.eup %4867 }
 0x9e1   :  { %v3510_v14 = vsel %vm3507_vm8, %v3509_v10, %v3505_v37  ;;  %vm3519_vm11 = vmor %vm3517_vm10, %vm3518_vm9  ;;  %v3783_v29 = vmul.f32 1.442695, %v3757_v34  ;;  %v3758_v38 = vmul.f32 %v3742_v0, %v7299_v62 }
 0x9e2   :  { %v3660_v33 = vmul.f32 %v3644_v4, %v3495_v44  ;;  %v3597_v5 = vmul.f32 1.0614054, %v3510_v14  ;;  %v3514_v46 = vsub.f32 1.0, %v3513_v19 }
 0x9e3   :  { %4869 = vpow2.f32 %v3783_v29  ;;  %v3785_v19 = vmul.f32 1.442695, %v3758_v38 }
 0x9e4   :  { %v3676_v28 = vadd.f32 -0.28449672, %v3660_v33  ;;  %v3613_v30 = vadd.f32 -1.4531521, %v3597_v5  ;;  %v3515_v13 = vmul.f32 %v4866_v35, %v3514_v46 }
 0x9e5   :  { %4871 = vpow2.f32 %v3785_v19 }
 0x9e6   :  { %v3692_v52 = vmul.f32 %v3676_v28, %v3495_v44  ;;  %v3629_v53 = vmul.f32 %v3613_v30, %v3510_v14  ;;  %v3516_v24 = vadd.f32 %v4866_v35, %v3515_v13 }
 0x9e8   :  { %v3708_v12 = vadd.f32 0.2548296, %v3692_v52  ;;  %v3645_v23 = vadd.f32 1.4214138, %v3629_v53  ;;  %v3520_v8 = vsel %vm3519_vm11, %v4866_v35, %v3516_v24  ;;  %v3276_v35 = vmul.f32 0.5, %v7277_v27 }
 0x9e9   :  { %v3525_v40 = vsel %vm3522_vm12, %v3524_v57, %v3520_v8  ;;  %v4870_v62 = vpop.eup %4869 }
 0x9ea   :  { %v3724_v2 = vmul.f32 %v3708_v12, %v3495_v44  ;;  %v3661_v48 = vmul.f32 %v3645_v23, %v3510_v14  ;;  %v3598_v3 = vmul.f32 1.0614054, %v3525_v40  ;;  %v3277_v23 = vmul.f32 0.5, %v7286_v42 }
 0x9eb   :  { %v4872_v29 = vpop.eup %4871 }
 0x9ec   :  { %v3804_v61 = vmul.f32 %v4868_v49, %v3724_v2  ;;  %v3677_v41 = vadd.f32 -0.28449672, %v3661_v48  ;;  %v3614_v6 = vadd.f32 -1.4531521, %v3598_v3 }
 0x9ee   :  { %v3820_v11 = vsub.f32 1.0, %v3804_v61  ;;  %v3693_v60 = vmul.f32 %v3677_v41, %v3510_v14  ;;  %v3630_v45 = vmul.f32 %v3614_v6, %v3525_v40  ;;  %v3255_v44 = vpop.f32.mrf.mxu0  ;;  %v3278_v6 = vmul.f32 0.5, %v7293_v22 }
 0x9ef   :  { %v7306_v10 = vadd.f32 %v3255_v44, %v7059_v20 }
 0x9f0   :  { %v3852_v9 = vsub.f32 0.0, %v3820_v11  ;;  %v3709_v4 = vadd.f32 0.2548296, %v3693_v60  ;;  %v3646_v37 = vadd.f32 1.4214138, %v3630_v45 }
 0x9f1   :  { %v7310_v5 = vmul.f32 0.70710677, %v7306_v10 }
 0x9f2   :  { %v3868_v26 = vsel %vm3836_vm13, %v3820_v11, %v3852_v9  ;;  %v3725_v33 = vmul.f32 %v3709_v4, %v3510_v14  ;;  %v3662_v28 = vmul.f32 %v3646_v37, %v3525_v40  ;;  %v7314_v14 = vpop.f32.mrf.mxu1 }
 0x9f3   :  { %v3884_v55 = vadd.f32 1.0, %v3868_v26  ;;  %v3311_v43 = vand.u32 2147483647, %v7310_v5 }
 0x9f4   :  { %v3805_v30 = vmul.f32 %v4870_v62, %v3725_v33  ;;  %v3678_v34 = vadd.f32 -0.28449672, %v3662_v28 }
 0x9f5   :  { %v3900_v46 = vmul.f32 %v3884_v55, %v3276_v35  ;;  %v3327_v52 = vmul.f32 0.3275911, %v3311_v43 }
 0x9f6   :  { %v3821_v32 = vsub.f32 1.0, %v3805_v30  ;;  %v3694_v27 = vmul.f32 %v3678_v34, %v3525_v40 }
 0x9f7   :  { %4416 = vmatmul.msk.f32.gmra.mxu1 %vm97_vm0, %v3900_v46  ;;  %v3343_v7 = vadd.f32 1.0, %v3327_v52  ;;  %v3258_v24 = vpop.f32.mrf.mxu0  ;;  %v3743_v46 = vsub.f32 0.0, %v3311_v43 }
 0x9f8   :  { %v3853_v13 = vsub.f32 0.0, %v3821_v32  ;;  %v3710_v53 = vadd.f32 0.2548296, %v3694_v27  ;;  %v7319_v8 = vadd.f32 %v3258_v24, %v7059_v20 }
 0x9f9   :  { %4873 = vrcp.f32 %v3343_v7  ;;  %v3538_v44 = vand.u32 2147483648, %v3343_v7  ;;  %v3536_v37 = vand.u32 2147483647, %v3343_v7  ;;  %vm3532_vm2 = vweird.f32 %v3343_v7 }
 0x9fa   :  { %v3869_v12 = vsel %vm3837_vm14, %v3821_v32, %v3853_v13  ;;  %v3726_v2 = vmul.f32 %v3710_v53, %v3525_v40  ;;  %v7322_v0 = vmul.f32 0.70710677, %v7319_v8  ;;  %v7328_v41 = vpop.f32.mrf.mxu1  ;;  %vm3839_vm14 = vcmp.ge.f32.partialorder %v7310_v5, 0.0 }
 0x9fb   :  { %v3885_v57 = vadd.f32 1.0, %v3869_v12  ;;  %v3539_v47 = vor.u32 1.1754944e-38, %v3538_v44  ;;  %vm3537_vm4 = vcmp.eq.f32.partialorder %v3536_v37, 8.507059e+37 }
 0x9fc   :  { %v3806_v48 = vmul.f32 %v4872_v29, %v3726_v2  ;;  %v7326_v3 = vand.u32 2147483647, %v7322_v0 }
 0x9fd   :  { %v3901_v49 = vmul.f32 %v3885_v57, %v3277_v23 }
 0x9fe   :  { %v3822_v61 = vsub.f32 1.0, %v3806_v48  ;;  %v3328_v11 = vmul.f32 0.3275911, %v7326_v3 }
 0x9ff   :  { %4417 = vmatmul.msk.f32.gmra.mxu1 %vm97_vm0, %v3901_v49  ;;  %v4874_v17 = vpop.eup %4873 }
 0xa00   :  { %v3854_v42 = vsub.f32 0.0, %v3822_v61  ;;  %v3528_v40 = vmul.f32 %v4874_v17, %v3343_v7  ;;  %v3344_v4 = vadd.f32 1.0, %v3328_v11  ;;  %vm3533_vm1 = vweird.f32 %v4874_v17 }
 0xa01   :  { %v3261_v9 = vpop.f32.mrf.mxu0  ;;  %vm3534_vm3 = vmor %vm3532_vm2, %vm3533_vm1  ;;  %v3759_v7 = vmul.f32 %v3743_v46, %v3311_v43 }
 0xa02   :  { %v3870_v60 = vsel %vm3838_vm15, %v3822_v61, %v3854_v42  ;;  %v3529_v38 = vsub.f32 1.0, %v3528_v40  ;;  %v7334_v35 = vadd.f32 %v3261_v9, %v7059_v20  ;;  %4875 = vrcp.f32 %v3344_v4  ;;  %v7340_v62 = vpop.f32.mrf.mxu1 }
 0xa03   :  { %v3886_v45 = vadd.f32 1.0, %v3870_v60  ;;  %v3551_v57 = vand.u32 2147483647, %v3344_v4  ;;  %v3553_v2 = vand.u32 2147483648, %v3344_v4  ;;  %v3787_v61 = vmul.f32 1.442695, %v3759_v7 }
 0xa04   :  { %v3530_v26 = vmul.f32 %v4874_v17, %v3529_v38  ;;  %v7337_v22 = vmul.f32 0.70710677, %v7334_v35  ;;  %vm3547_vm7 = vweird.f32 %v3344_v4 }
 0xa05   :  { %v3902_v55 = vmul.f32 %v3886_v45, %v3278_v6  ;;  %v3554_v43 = vor.u32 1.1754944e-38, %v3553_v2  ;;  %vm3552_vm9 = vcmp.eq.f32.partialorder %v3551_v57, 8.507059e+37 }
 0xa06   :  { %v3531_v33 = vadd.f32 %v4874_v17, %v3530_v26  ;;  %v7343_v30 = vand.u32 2147483647, %v7337_v22 }
 0xa07   :  { %4418 = vmatmul.msk.f32.gmra.mxu1 %vm97_vm0, %v3902_v55 }
 0xa08   :  { %v3535_v19 = vsel %vm3534_vm3, %v4874_v17, %v3531_v33  ;;  %v4876_v32 = vpop.eup %4875  ;;  %v3329_v52 = vmul.f32 0.3275911, %v7343_v30 }
 0xa09   :  { %v3540_v28 = vsel %vm3537_vm4, %v3539_v47, %v3535_v19  ;;  %v3543_v13 = vmul.f32 %v4876_v32, %v3344_v4  ;;  %vm3548_vm6 = vweird.f32 %v4876_v32  ;;  %vm3840_vm4 = vcmp.ge.f32.partialorder %v7322_v0, 0.0 }
 0xa0a   :  { %v3599_v34 = vmul.f32 1.0614054, %v3540_v28  ;;  %v3345_v53 = vadd.f32 1.0, %v3329_v52  ;;  %v7349_v40 = vpop.f32.mrf.mxu1  ;;  %vm3549_vm8 = vmor %vm3547_vm7, %vm3548_vm6  ;;  %vm3841_vm6 = vcmp.ge.f32.partialorder %v7337_v22, 0.0 }
 0xa0b   :  { %v3544_v24 = vsub.f32 1.0, %v3543_v13 }
 0xa0c   :  { %v3615_v27 = vadd.f32 -1.4531521, %v3599_v34  ;;  %4877 = vrcp.f32 %v3345_v53  ;;  %v3566_v46 = vand.u32 2147483647, %v3345_v53  ;;  %v3568_v34 = vand.u32 2147483648, %v3345_v53 }
 0xa0d   :  { %v3264_v23 = vpop.f32.mrf.mxu0  ;;  %v3545_v49 = vmul.f32 %v4876_v32, %v3544_v24  ;;  %4879 = vpow2.f32 %v3787_v61  ;;  %vm3562_vm11 = vweird.f32 %v3345_v53 }
 0xa0e   :  { %v3631_v12 = vmul.f32 %v3615_v27, %v3540_v28  ;;  %v7347_v48 = vadd.f32 %v3264_v23, %v7059_v20  ;;  %v3744_v20 = vsub.f32 0.0, %v7326_v3  ;;  %vm3567_vm13 = vcmp.eq.f32.partialorder %v3566_v46, 8.507059e+37 }
 0xa0f   :  { %v3546_v42 = vadd.f32 %v4876_v32, %v3545_v49 }
 0xa10   :  { %v3647_v29 = vadd.f32 1.4214138, %v3631_v12  ;;  %v7352_v11 = vmul.f32 0.70710677, %v7347_v48  ;;  %v3760_v19 = vmul.f32 %v3744_v20, %v7326_v3 }
 0xa11   :  { %v3550_v60 = vsel %vm3549_vm8, %v4876_v32, %v3546_v42 }
 0xa12   :  { %v3663_v17 = vmul.f32 %v3647_v29, %v3540_v28  ;;  %v4878_v38 = vpop.eup %4877  ;;  %v3555_v9 = vsel %vm3552_vm9, %v3554_v43, %v3550_v60  ;;  %v7356_v45 = vand.u32 2147483647, %v7352_v11  ;;  %v7360_v57 = vpop.f32.mrf.mxu1  ;;  %v3789_v2 = vmul.f32 1.442695, %v3760_v19 }
 0xa13   :  { %v3600_v4 = vmul.f32 1.0614054, %v3555_v9  ;;  %v3558_v26 = vmul.f32 %v4878_v38, %v3345_v53  ;;  %vm3563_vm10 = vweird.f32 %v4878_v38  ;;  %v4880_v7 = vpop.eup %4879  ;;  %v3569_v29 = vor.u32 1.1754944e-38, %v3568_v34 }
 0xa14   :  { %v3679_v6 = vadd.f32 -0.28449672, %v3663_v17  ;;  %v3330_v37 = vmul.f32 0.3275911, %v7356_v45  ;;  %vm3564_vm12 = vmor %vm3562_vm11, %vm3563_vm10  ;;  %vm3842_vm7 = vcmp.ge.f32.partialorder %v7352_v11, 0.0 }
 0xa15   :  { %v3616_v33 = vadd.f32 -1.4531521, %v3600_v4  ;;  %v3559_v47 = vsub.f32 1.0, %v3558_v26  ;;  %v3279_v26 = vmul.f32 0.5, %v7306_v10 }
 0xa16   :  { %v3695_v44 = vmul.f32 %v3679_v6, %v3540_v28  ;;  %v3346_v32 = vadd.f32 1.0, %v3330_v37 }
 0xa17   :  { %v3632_v27 = vmul.f32 %v3616_v33, %v3555_v9  ;;  %v3560_v13 = vmul.f32 %v4878_v38, %v3559_v47 }
 0xa18   :  { %v3711_v55 = vadd.f32 0.2548296, %v3695_v44  ;;  %4881 = vrcp.f32 %v3346_v32  ;;  %v3581_v34 = vand.u32 2147483647, %v3346_v32  ;;  %vm3577_vm1 = vweird.f32 %v3346_v32 }
 0xa19   :  { %v3648_v24 = vadd.f32 1.4214138, %v3632_v27  ;;  %v3561_v23 = vadd.f32 %v4878_v38, %v3560_v13  ;;  %4883 = vpow2.f32 %v3789_v2 }
 0xa1a   :  { %v3727_v52 = vmul.f32 %v3711_v55, %v3540_v28  ;;  %v3745_v28 = vsub.f32 0.0, %v7343_v30  ;;  %vm3582_vm3 = vcmp.eq.f32.partialorder %v3581_v34, 8.507059e+37  ;;  %v4894_v34 = vld [vmem:[%s7474_s4] sm:$0xff] }
 0xa1b   :  { %v3664_v3 = vmul.f32 %v3648_v24, %v3555_v9  ;;  %v3565_v61 = vsel %vm3564_vm12, %v4878_v38, %v3561_v23 }
 0xa1c   :  { %v3807_v12 = vmul.f32 %v4880_v7, %v3727_v52  ;;  %v3570_v17 = vsel %vm3567_vm13, %v3569_v29, %v3565_v61  ;;  %v3761_v38 = vmul.f32 %v3745_v28, %v7343_v30  ;;  %v3583_v52 = vand.u32 2147483648, %v3346_v32 }
 0xa1d   :  { %v3680_v43 = vadd.f32 -0.28449672, %v3664_v3  ;;  %v3601_v6 = vmul.f32 1.0614054, %v3570_v17 }
 0xa1e   :  { %v3823_v49 = vsub.f32 1.0, %v3807_v12  ;;  %v4882_v60 = vpop.eup %4881  ;;  %v3791_v12 = vmul.f32 1.442695, %v3761_v38  ;;  %v3584_v30 = vor.u32 1.1754944e-38, %v3583_v52  ;;  %v7377_v52 = vperm.slane %v4894_v34, 6 }
 0xa1f   :  { %v3696_v20 = vmul.f32 %v3680_v43, %v3555_v9  ;;  %v3617_v44 = vadd.f32 -1.4531521, %v3601_v6  ;;  %v3573_v4 = vmul.f32 %v4882_v60, %v3346_v32  ;;  %vm3578_vm15 = vweird.f32 %v4882_v60  ;;  %v4884_v7 = vpop.eup %4883 }
 0xa20   :  { %v3855_v42 = vsub.f32 0.0, %v3823_v49  ;;  %vm3579_vm2 = vmor %vm3577_vm1, %vm3578_vm15  ;;  %4885 = vpow2.f32 %v3791_v12  ;;  %v3280_v32 = vmul.f32 0.5, %v7319_v8 }
 0xa21   :  { %v3712_v55 = vadd.f32 0.2548296, %v3696_v20  ;;  %v3633_v33 = vmul.f32 %v3617_v44, %v3570_v17  ;;  %v3574_v47 = vsub.f32 1.0, %v3573_v4  ;;  %v7366_v19 = vpop.f32.mrf.mxu1 }
 0xa22   :  { %v3871_v53 = vsel %vm3839_vm14, %v3823_v49, %v3855_v42  ;;  %v3994_v22 = vadd.f32 %v7366_v19, %v7377_v52 }
 0xa23   :  { %v3887_v37 = vadd.f32 1.0, %v3871_v53  ;;  %v3728_v27 = vmul.f32 %v3712_v55, %v3555_v9  ;;  %v3649_v5 = vadd.f32 1.4214138, %v3633_v33  ;;  %v3575_v13 = vmul.f32 %v4882_v60, %v3574_v47 }
 0xa24   :  { %v3746_v9 = vsub.f32 0.0, %v7356_v45 }
 0xa25   :  { %v3903_v46 = vmul.f32 %v3887_v37, %v3279_v26  ;;  %v3808_v10 = vmul.f32 %v4884_v7, %v3728_v27  ;;  %v3665_v24 = vmul.f32 %v3649_v5, %v3570_v17  ;;  %v3576_v23 = vadd.f32 %v4882_v60, %v3575_v13 }
 0xa26   :  { %v3762_v4 = vmul.f32 %v3746_v9, %v7356_v45  ;;  %v4886_v37 = vpop.eup %4885  ;;  %v3281_v7 = vmul.f32 0.5, %v7334_v35 }
 0xa27   :  { %4419 = vmatmul.msk.f32.gmra.mxu1 %vm97_vm0, %v3903_v46  ;;  %v3824_v2 = vsub.f32 1.0, %v3808_v10  ;;  %v3681_v29 = vadd.f32 -0.28449672, %v3665_v24  ;;  %v3580_v49 = vsel %vm3579_vm2, %v4882_v60, %v3576_v23 }
 0xa28   :  { %v3585_v3 = vsel %vm3582_vm3, %v3584_v30, %v3580_v49  ;;  %v3793_v47 = vmul.f32 1.442695, %v3762_v4 }
 0xa29   :  { %v3856_v61 = vsub.f32 0.0, %v3824_v2  ;;  %v3697_v28 = vmul.f32 %v3681_v29, %v3570_v17  ;;  %v3602_v42 = vmul.f32 1.0614054, %v3585_v3 }
 0xa2a   :  { %4887 = vpow2.f32 %v3793_v47 }
 0xa2b   :  { %v3872_v43 = vsel %vm3840_vm4, %v3824_v2, %v3856_v61  ;;  %v3713_v6 = vadd.f32 0.2548296, %v3697_v28  ;;  %v3618_v53 = vadd.f32 -1.4531521, %v3602_v42  ;;  %v3996_v20 = vpop.f32.mrf.mxu1  ;;  %v4031_v61 = vadd.f32 %v3994_v22, %v6833_v36 }
 0xa2c   :  { %v3888_v44 = vadd.f32 1.0, %v3872_v43  ;;  %v3997_v10 = vadd.f32 %v3996_v20, %v7377_v52  ;;  %v3282_v42 = vmul.f32 0.5, %v7347_v48  ;;  %v3985_v36 = vadd.f32 %v7340_v62, %v7377_v52  ;;  %v4895_v62 = vld [vmem:[%s7475_s5] sm:$0xff] }
 0xa2d   :  { %v3729_v60 = vmul.f32 %v3713_v6, %v3570_v17  ;;  %v3634_v26 = vmul.f32 %v3618_v53, %v3585_v3  ;;  %v3979_v48 = vadd.f32 %v7314_v14, %v7377_v52 }
 0xa2e   :  { %v3904_v38 = vmul.f32 %v3888_v44, %v3280_v32  ;;  %v4032_v49 = vadd.f32 %v3997_v10, %v6840_v16  ;;  %v3988_v16 = vadd.f32 %v7349_v40, %v7377_v52  ;;  %v3982_v40 = vadd.f32 %v7328_v41, %v7377_v52 }
 0xa2f   :  { %v3809_v55 = vmul.f32 %v4886_v37, %v3729_v60  ;;  %v3650_v33 = vadd.f32 1.4214138, %v3634_v26 }
 0xa30   :  { %4420 = vmatmul.msk.f32.gmra.mxu1 %vm97_vm0, %v3904_v38  ;;  %v4888_v29 = vpop.eup %4887  ;;  %v4027_v11 = vadd.f32 %v3982_v40, %v6759_v56  ;;  %v4897_v56 = vld [vmem:[%s7475_s5 + $0x10] sm:$0xff] }
 0xa31   :  { %v3825_v46 = vsub.f32 1.0, %v3809_v55  ;;  %v3666_v0 = vmul.f32 %v3650_v33, %v3585_v3 }
 0xa33   :  { %v3857_v8 = vsub.f32 0.0, %v3825_v46  ;;  %v3682_v27 = vadd.f32 -0.28449672, %v3666_v0 }
 0xa34   :  { %v3999_v45 = vpop.f32.mrf.mxu1 }
 0xa35   :  { %v4000_v17 = vadd.f32 %v3999_v45, %v7377_v52  ;;  %v3873_v5 = vsel %vm3841_vm6, %v3825_v46, %v3857_v8  ;;  %v3698_v13 = vmul.f32 %v3682_v27, %v3585_v3 }
 0xa36   :  { %v3889_v12 = vadd.f32 1.0, %v3873_v5 }
 0xa37   :  { %v4033_v24 = vadd.f32 %v4000_v17, %v6853_v15  ;;  %v3714_v23 = vadd.f32 0.2548296, %v3698_v13  ;;  %v3991_v15 = vadd.f32 %v7360_v57, %v7377_v52  ;;  %v4029_v57 = vadd.f32 %v3988_v16, %v6821_v59 }
 0xa38   :  { %v3905_v30 = vmul.f32 %v3889_v12, %v3281_v7  ;;  %v4026_v59 = vadd.f32 %v3979_v48, %v6746_v50  ;;  %v4898_v50 = vld [vmem:[%s7475_s5 + $0x18] sm:$0xff] }
 0xa39   :  { %4423 = vmatpush.xpose.msk.msra.mxu2 %vm97_vm0, %v4033_v24  ;;  %v3730_v2 = vmul.f32 %v3714_v23, %v3585_v3  ;;  %v4030_v19 = vadd.f32 %v3991_v15, %v6827_v54  ;;  %v4028_v54 = vadd.f32 %v3985_v36, %v6814_v21  ;;  %v4896_v21 = vld [vmem:[%s7475_s5 + $0x8] sm:$0xff]  ;;  %s4928_s5 = smov [#allocation2]  }
 0xa3a   :  { %4421 = vmatmul.msk.f32.gmra.mxu1 %vm97_vm0, %v3905_v30  ;;  %s4173_s2 = sshll.u32 %s4928_s5, 4  ;;  %s4174_s2 = int_to_ptr.vmem [resolvable:$true] %s4173_s2 }
 0xa3b   :  { %v3810_v9 = vmul.f32 %v4888_v29, %v3730_v2 }
 0xa3d   :  { %4424 = vmatpush.xpose.msk.msra.mxu2 %vm97_vm0, %v4032_v49  ;;  %v3826_v35 = vsub.f32 1.0, %v3810_v9 }
 0xa3f   :  { %v3858_v28 = vsub.f32 0.0, %v3826_v35  ;;  %v4002_v14 = vpop.f32.mrf.mxu1 }
 0xa41   :  { %4425 = vmatpush.xpose.msk.msra.mxu2 %vm97_vm0, %v4031_v61  ;;  %v3874_v3 = vsel %vm3842_vm7, %v3826_v35, %v3858_v28 }
 0xa42   :  { %v3890_v43 = vadd.f32 1.0, %v3874_v3 }
 0xa44   :  { %v3906_v6 = vmul.f32 %v3890_v43, %v3282_v42 }
 0xa45   :  { %4426 = vmatpush.xpose.msk.msra.mxu2 %vm97_vm0, %v4030_v19 }
 0xa46   :  { %4422 = vmatmul.msk.f32.gmra.mxu1 %vm97_vm0, %v3906_v6 }
 0xa49   :  { %4427 = vmatpush.xpose.msk.msra.mxu2 %vm97_vm0, %v4029_v57 }
 0xa4d   :  { %4428 = vmatpush.xpose.msk.msra.mxu2 %vm97_vm0, %v4028_v54 }
 0xa51   :  { %4429 = vmatpush.xpose.msk.msra.mxu2 %vm97_vm0, %v4027_v11 }
 0xa55   :  { %4430 = vmatpush.xpose.msk.msra.mxu2 %vm97_vm0, %v4026_v59 }
 0xa58   :  { %4431 = vmatmul.msk.f32.vlgmr.msra.gmra.mxu2 %vm97_vm0, %v4895_v62 }
 0xa60   :  { %4432 = vmatmul.msk.f32.gmra.mxu2 %vm97_vm0, %v4896_v21 }
 0xa68   :  { %4433 = vmatmul.msk.f32.gmra.mxu2 %vm97_vm0, %v4897_v56 }
 0xa70   :  { %4434 = vmatmul.msk.f32.gmra.mxu2 %vm97_vm0, %v4898_v50 }
 0xa74   :  { %v4005_v41 = vpop.f32.mrf.mxu1 }
 0xa7c   :  { %v4008_v53 = vpop.f32.mrf.mxu1 }
 0xa84   :  { %v4011_v20 = vpop.f32.mrf.mxu1 }
 0xa85   :  { %v4012_v0 = vadd.f32 %v4011_v20, %v7377_v52 }
 0xa87   :  { %v4037_v8 = vadd.f32 %v4012_v0, %v6904_v63 }
 0xaa4   :  { %v4014_v32 = vpop.f32.mrf.mxu1 }
 0xaa5   :  { %v4015_v47 = vadd.f32 %v4014_v32, %v7377_v52 }
 0xaa7   :  { %v4038_v34 = vadd.f32 %v4015_v47, %v6930_v58 }
 0xaad   :  { %v4017_v44 = vpop.f32.mrf.mxu1 }
 0xaae   :  { %v4018_v55 = vadd.f32 %v4017_v44, %v7377_v52 }
 0xab0   :  { %v4039_v46 = vadd.f32 %v4018_v55, %v6943_v39  ;;  %v4003_v39 = vadd.f32 %v4002_v14, %v7377_v52 }
 0xab2   :  { %v4034_v58 = vadd.f32 %v4003_v39, %v6865_v51 }
 0xab7   :  { %v4020_v4 = vpop.f32.mrf.mxu1 }
 0xab8   :  { %v4021_v37 = vadd.f32 %v4020_v4, %v7377_v52 }
 0xaba   :  { %v4040_v33 = vadd.f32 %v4021_v37, %v6957_v1  ;;  %v4006_v1 = vadd.f32 %v4005_v41, %v7377_v52 }
 0xabc   :  { %v4035_v45 = vadd.f32 %v4006_v1, %v6879_v25 }
 0xac3   :  { %v4023_v60 = vpop.f32.mrf.mxu1 }
 0xac4   :  { %v4024_v26 = vadd.f32 %v4023_v60, %v7377_v52 }
 0xac6   :  { %v4041_v38 = vadd.f32 %v4024_v26, %v6980_v18  ;;  %v4009_v18 = vadd.f32 %v4008_v53, %v7377_v52 }
 0xac8   :  { %4435 = vmatpush.xpose.msk.msra.mxu3 %vm97_vm0, %v4041_v38  ;;  %v4036_v27 = vadd.f32 %v4009_v18, %v6892_v31 }
 0xacc   :  { %4436 = vmatpush.xpose.msk.msra.mxu3 %vm97_vm0, %v4040_v33 }
 0xad0   :  { %4437 = vmatpush.xpose.msk.msra.mxu3 %vm97_vm0, %v4039_v46 }
 0xad4   :  { %4438 = vmatpush.xpose.msk.msra.mxu3 %vm97_vm0, %v4038_v34 }
 0xad8   :  { %4439 = vmatpush.xpose.msk.msra.mxu3 %vm97_vm0, %v4037_v8 }
 0xadb   :  { %v4095_v17 = vpop.f32.mrf.mxu2 }
 0xadc   :  { %4440 = vmatpush.xpose.msk.msra.mxu3 %vm97_vm0, %v4036_v27  ;;  %4107 = vst.msk [vmem:[#allocation2] sm:$0xff] %vm1060_vm5, %v4095_v17 }
 0xae0   :  { %4441 = vmatpush.xpose.msk.msra.mxu3 %vm97_vm0, %v4035_v45 }
 0xae3   :  { %v4098_v31 = vpop.f32.mrf.mxu2 }
 0xae4   :  { %4442 = vmatpush.xpose.msk.msra.mxu3 %vm97_vm0, %v4034_v58  ;;  %4108 = vst.msk [vmem:[#allocation2 + $0x8] sm:$0xff] %vm1060_vm5, %v4098_v31 }
 0xae7   :  { %4443 = vmatmul.msk.f32.vlgmr.msra.gmra.mxu3 %vm97_vm0, %v4895_v62 }
 0xaeb   :  { %v4101_v25 = vpop.f32.mrf.mxu2 }
 0xaec   :  { %4109 = vst.msk [vmem:[#allocation2 + $0x10] sm:$0xff] %vm1060_vm5, %v4101_v25 }
 0xaef   :  { %4444 = vmatmul.msk.f32.gmra.mxu3 %vm97_vm0, %v4896_v21 }
 0xaf3   :  { %v4104_v63 = vpop.f32.mrf.mxu2 }
 0xaf4   :  { %4110 = vst.msk [vmem:[#allocation2 + $0x18] sm:$0xff] %vm1060_vm5, %v4104_v63 }
 0xaf7   :  { %4445 = vmatmul.msk.f32.gmra.mxu3 %vm97_vm0, %v4897_v56 }
 0xaff   :  { %4446 = vmatmul.msk.f32.gmra.mxu3 %vm97_vm0, %v4898_v50 }
 0xb6a   :  { %v4152_v51 = vpop.f32.mrf.mxu3 }
 0xb6b   :  { %4165 = vst.msk [vmem:[#allocation2 + $0x20] sm:$0xff] %vm1060_vm5, %v4152_v51 }
 0xb72   :  { %v4155_v52 = vpop.f32.mrf.mxu3 }
 0xb73   :  { %4166 = vst.msk [vmem:[#allocation2 + $0x28] sm:$0xff] %vm1060_vm5, %v4155_v52 }
 0xb7a   :  { %v4158_v5 = vpop.f32.mrf.mxu3 }
 0xb7b   :  { %4167 = vst.msk [vmem:[#allocation2 + $0x30] sm:$0xff] %vm1060_vm5, %v4158_v5 }
 0xb82   :  { %v4161_v13 = vpop.f32.mrf.mxu3 }
 0xb83   :  { %4168 = vst.msk [vmem:[#allocation2 + $0x38] sm:$0xff] %vm1060_vm5, %v4161_v13 }
 0xb84   :  { %4181 = dma.vmem_to_hbm [thread:$0]  %s4174_s2, 1024, %s4176_s11, [#allocation3], %s4929_s12, %s4929_s12, %s4930_s13  }
 0xb85   :  { %4923 = dma.done.wait [#allocation3], 1024  }
 0xb86   :  { %4924 = vsyncadd [#allocation3], 4294966272 }
 0xb87   :  { %4186 = vsyncpa [#allocation3], 1 }

</bundles_post_ra>
